<compile_context>
chip_gen: v7x
topology: tpu7x:2x2x1
jax: 0.10.0
libtpu: 0.0.40
codegen_flags: <defaults>
</compile_context>

<pallas_src>
import functools

import jax
import jax.numpy as jnp
from jax import lax
from jax.experimental import pallas as pl
from jax.experimental.pallas import tpu as pltpu

BN_EPS = 1e-5
LANE = 128


def _round_up_lane(c):
    return ((c + LANE - 1) // LANE) * LANE


def _pick_row_tile(h):
    # 8 rows x W cols per tile is already >= 512 flattened rows at real SegNet
    # widths.  Raise for v6e's 128 MiB VMEM; keep modest for v7x's 64 MiB.
    return 8 if h % 8 == 0 else h


# ---------------------------------------------------------------------------
# Pass 1: [previous layer's BN+ReLU (fused)] -> 3x3 conv -> per-tile BN
# partial sums.  Grid = (batch, row-tile).
# ---------------------------------------------------------------------------
def _conv_stats_kernel(body_ref, top_ref, bot_ref, w_ref, sc_ref, sh_ref,
                       conv_ref, stat_ref, ext_ref, patch_ref,
                       *, th, w_img, cin_p, cout_p, n_tiles, apply_prenorm):
    i = pl.program_id(1)
    r_out = th * w_img                  # conv-output rows of this tile
    rw = (th + 2) * w_img               # rows of the flattened input window

    top = top_ref[0].reshape(w_img, cin_p)
    body = body_ref[0].reshape(r_out, cin_p)
    bot = bot_ref[0].reshape(w_img, cin_p)

    if apply_prenorm:
        # Previous layer's BatchNorm + ReLU, applied while resident in VMEM.
        sc = sc_ref[...]
        sh = sh_ref[...]
        top = jnp.maximum(top * sc + sh, 0.0)
        body = jnp.maximum(body * sc + sh, 0.0)
        bot = jnp.maximum(bot * sc + sh, 0.0)

    # Halo rows that fall outside the image are conv zero-padding (must be
    # zeroed *after* the fused BN+ReLU).
    top = jnp.where(i == 0, 0.0, top)
    bot = jnp.where(i == n_tiles - 1, 0.0, bot)

    # Assemble the flattened (th+2, W) row window in a VMEM scratch, with an
    # 8-row zero apron on both ends so the +-1-column tap slices stay in range.
    zeros8 = jnp.zeros((8, cin_p), jnp.float32)
    ext_ref[0:8] = zeros8
    ext_ref[8:8 + w_img] = top
    ext_ref[8 + w_img:8 + w_img + r_out] = body
    ext_ref[8 + w_img + r_out:8 + rw] = bot
    ext_ref[8 + rw:8 + rw + 8] = zeros8
    ext = ext_ref[...]

    # im2col: nine shifted views -> one (rows, 9*Cin) patch (lane-aligned
    # stores into scratch), then a single big-K MXU matmul.
    col = lax.broadcasted_iota(
        jnp.int32, (th, w_img, cin_p), 1).reshape(r_out, cin_p)
    for kh in range(3):
        for kw in range(3):
            start = 8 + kh * w_img + (kw - 1)
            piece = ext[start:start + r_out]
            if kw == 0:     # needs column w-1: zero at the left image edge
                piece = jnp.where(col == 0, 0.0, piece)
            elif kw == 2:   # needs column w+1: zero at the right image edge
                piece = jnp.where(col == w_img - 1, 0.0, piece)
            k = kh * 3 + kw
            patch_ref[:, k * cin_p:(k + 1) * cin_p] = piece

    conv = jnp.dot(patch_ref[...], w_ref[...],
                   preferred_element_type=jnp.float32)       # (r_out, cout_p)

    conv_ref[0] = conv.reshape(th, w_img, cout_p)
    # Per-tile BatchNorm partials; the (tiny) global reduction over all tiles
    # is finished in the wrapper, keeping the batch statistics exact.
    stat_ref[0, 0, 0:1, :] = jnp.sum(conv, axis=0, keepdims=True)
    stat_ref[0, 0, 1:2, :] = jnp.sum(conv * conv, axis=0, keepdims=True)


def _conv3x3_bn_pass(x, w_flat, prev_scale, prev_shift, *, apply_prenorm, th):
    n, h, w_img, cin_p = x.shape
    k9, cout_p = w_flat.shape
    assert k9 == 9 * cin_p
    n_tiles = h // th

    kernel = functools.partial(
        _conv_stats_kernel, th=th, w_img=w_img, cin_p=cin_p, cout_p=cout_p,
        n_tiles=n_tiles, apply_prenorm=apply_prenorm)

    conv, stats = pl.pallas_call(
        kernel,
        grid=(n, n_tiles),
        in_specs=[
            # body rows of the tile
            pl.BlockSpec((1, th, w_img, cin_p), lambda b, i: (b, i, 0, 0)),
            # one halo row above / below (row-granular blocks, clamped index;
            # out-of-image rows are zero-masked inside the kernel)
            pl.BlockSpec((1, 1, w_img, cin_p),
                         lambda b, i: (b, jnp.maximum(i * th - 1, 0), 0, 0)),
            pl.BlockSpec((1, 1, w_img, cin_p),
                         lambda b, i: (b, jnp.minimum(i * th + th, h - 1), 0, 0)),
            # folded (9*Cin, Cout) weight, resident across the grid
            pl.BlockSpec((k9, cout_p), lambda b, i: (0, 0)),
            # previous layer's folded BN scale / shift
            pl.BlockSpec((1, cin_p), lambda b, i: (0, 0)),
            pl.BlockSpec((1, cin_p), lambda b, i: (0, 0)),
        ],
        out_specs=(
            pl.BlockSpec((1, th, w_img, cout_p), lambda b, i: (b, i, 0, 0)),
            pl.BlockSpec((1, 1, 2, cout_p), lambda b, i: (b, i, 0, 0)),
        ),
        out_shape=(
            jax.ShapeDtypeStruct((n, h, w_img, cout_p), jnp.float32),
            jax.ShapeDtypeStruct((n, n_tiles, 2, cout_p), jnp.float32),
        ),
        scratch_shapes=[
            pltpu.VMEM((16 + (th + 2) * w_img, cin_p), jnp.float32),  # window
            pltpu.VMEM((th * w_img, 9 * cin_p), jnp.float32),         # im2col
        ],
        compiler_params=pltpu.CompilerParams(
            dimension_semantics=("parallel", "parallel"),
            vmem_limit_bytes=32 * 1024 * 1024),
    )(x, x, x, w_flat, prev_scale, prev_shift)
    return conv, stats


def _finalize_bn(stats, gamma_p, beta_p, count):
    """Finish the global BN reduction and fold gamma/beta into scale/shift."""
    s = jnp.sum(stats[:, :, 0, :], axis=(0, 1))
    ss = jnp.sum(stats[:, :, 1, :], axis=(0, 1))
    mean = s / count
    var = jnp.maximum(ss / count - mean * mean, 0.0)   # biased batch variance
    scale = gamma_p * lax.rsqrt(var + BN_EPS)
    shift = beta_p - mean * scale
    return scale[None, :], shift[None, :]


# ---------------------------------------------------------------------------
# Pass 2 (last layer only): fused BN + ReLU + 2x2/stride-2 max-pool + argmax.
# The wrapper reshapes (N,H,W,C) -> (N,H,W/2,2C) for free, so column pairs sit
# on the lane dim and all four pool taps are lane-aligned slices in-kernel.
# ---------------------------------------------------------------------------
def _bn_relu_pool_kernel(x_ref, sc_ref, sh_ref, val_ref, idx_ref,
                         *, th, w_img, cout_p):
    i = pl.program_id(1)
    ho_t = th // 2
    wo = w_img // 2

    x = x_ref[0]                                          # (th, wo, 2*cout_p)
    y = jnp.maximum(x * sc_ref[...] + sh_ref[...], 0.0)   # last layer BN+ReLU
    y = y.reshape(ho_t, 2, wo, 2 * cout_p)                # split row pairs
    r0 = y[:, 0]
    r1 = y[:, 1]
    a = r0[:, :, :cout_p]      # (+0 row, +0 col)
    b = r0[:, :, cout_p:]      # (+0 row, +1 col)
    c = r1[:, :, :cout_p]      # (+1 row, +0 col)
    d = r1[:, :, cout_p:]      # (+1 row, +1 col)

    row = 2 * (i * ho_t
               + lax.broadcasted_iota(jnp.int32, (ho_t, wo, cout_p), 0))
    col = 2 * lax.broadcasted_iota(jnp.int32, (ho_t, wo, cout_p), 1)

    best_v = a
    best_i = row * w_img + col
    for val, dr, dc in ((b, 0, 1), (c, 1, 0), (d, 1, 1)):
        cand = (row + dr) * w_img + (col + dc)
        take = val > best_v          # strict '>' == first-max-wins tie break
        best_i = jnp.where(take, cand, best_i)
        best_v = jnp.where(take, val, best_v)

    val_ref[0] = best_v
    idx_ref[0] = best_i


def _bn_relu_maxpool(conv, scale, shift, *, th):
    n, h, w_img, cout_p = conv.shape
    ho, wo = h // 2, w_img // 2
    n_tiles = h // th

    x2 = conv.reshape(n, h, wo, 2 * cout_p)   # free reshape: col pairs -> lanes
    sc2 = jnp.concatenate([scale, scale], axis=-1)
    sh2 = jnp.concatenate([shift, shift], axis=-1)

    kernel = functools.partial(_bn_relu_pool_kernel,
                               th=th, w_img=w_img, cout_p=cout_p)
    vals, idx = pl.pallas_call(
        kernel,
        grid=(n, n_tiles),
        in_specs=[
            pl.BlockSpec((1, th, wo, 2 * cout_p), lambda b, i: (b, i, 0, 0)),
            pl.BlockSpec((1, 2 * cout_p), lambda b, i: (0, 0)),
            pl.BlockSpec((1, 2 * cout_p), lambda b, i: (0, 0)),
        ],
        out_specs=(
            pl.BlockSpec((1, th // 2, wo, cout_p), lambda b, i: (b, i, 0, 0)),
            pl.BlockSpec((1, th // 2, wo, cout_p), lambda b, i: (b, i, 0, 0)),
        ),
        out_shape=(
            jax.ShapeDtypeStruct((n, ho, wo, cout_p), jnp.float32),
            jax.ShapeDtypeStruct((n, ho, wo, cout_p), jnp.int32),
        ),
        compiler_params=pltpu.CompilerParams(
            dimension_semantics=("parallel", "parallel"),
            vmem_limit_bytes=32 * 1024 * 1024),
    )(x2, sc2, sh2)
    return vals, idx


# ---------------------------------------------------------------------------
# Parameter handling / wrapper (NCHW in, NCHW out like the PyTorch module).
# ---------------------------------------------------------------------------
def _prep_weight(w):
    kh, kw, cin, cout = w.shape
    cin_p, cout_p = _round_up_lane(cin), _round_up_lane(cout)
    w_p = jnp.zeros((kh, kw, cin_p, cout_p), jnp.float32)
    w_p = w_p.at[:, :, :cin, :cout].set(w.astype(jnp.float32))
    return w_p.reshape(kh * kw * cin_p, cout_p)


def _pad_vec(v, cp):
    return jnp.zeros((cp,), jnp.float32).at[:v.shape[0]].set(
        v.astype(jnp.float32))


def init_encoder_block_params(key, in_n, out_n, n_layer):
    dims = [(in_n, out_n), (out_n, out_n)]
    if n_layer == 3:
        dims.append((out_n, out_n))
    params = []
    for ci, co in dims:
        key, kw_key, kg, kb = jax.random.split(key, 4)
        w = jax.random.normal(kw_key, (3, 3, ci, co), jnp.float32) * 0.1  # HWIO
        gamma = 1.0 + 0.1 * jax.random.normal(kg, (co,), jnp.float32)
        beta = 0.1 * jax.random.normal(kb, (co,), jnp.float32)
        # NOTE: no conv bias - it cancels exactly under training-mode BN.
        params.append((w, gamma, beta))
    return params


def encoder_block_forward(x_nchw, params):
    x = jnp.transpose(x_nchw, (0, 2, 3, 1)).astype(jnp.float32)  # NCHW -> NHWC
    n, h, w_img, cin = x.shape
    assert h % 2 == 0 and w_img % 2 == 0
    th = _pick_row_tile(h)

    cin_p = _round_up_lane(cin)
    # Channel padding done ONCE at block entry (lane-dense layout throughout).
    act = jnp.pad(x, ((0, 0), (0, 0), (0, 0), (0, cin_p - cin)))

    scale = jnp.ones((1, cin_p), jnp.float32)    # unused for the first layer
    shift = jnp.zeros((1, cin_p), jnp.float32)
    apply_prenorm = False
    conv = None
    for (w, gamma, beta) in params:
        cout_p = _round_up_lane(w.shape[3])
        conv, stats = _conv3x3_bn_pass(act, _prep_weight(w), scale, shift,
                                       apply_prenorm=apply_prenorm, th=th)
        scale, shift = _finalize_bn(stats, _pad_vec(gamma, cout_p),
                                    _pad_vec(beta, cout_p), n * h * w_img)
        act = conv          # raw conv; its BN+ReLU is fused into the next pass
        apply_prenorm = True

    vals, idx = _bn_relu_maxpool(conv, scale, shift, th=th)

    cout = params[-1][0].shape[3]
    out_nchw = jnp.transpose(vals[..., :cout], (0, 3, 1, 2))
    # TODO(synk): PyTorch returns int64 pool indices; int32 used (x64 off).
    # TODO(synk): BatchNorm running_mean/var momentum update is host-side
    # state and is not emitted (only training-mode normalization is computed).
    idx_nchw = jnp.transpose(idx[..., :cout], (0, 3, 1, 2))
    return out_nchw, idx_nchw


# ---------------------------------------------------------------------------
# Pure-JAX reference (for a self-check).
# ---------------------------------------------------------------------------
def _reference_forward(x_nchw, params):
    x = jnp.transpose(x_nchw, (0, 2, 3, 1)).astype(jnp.float32)
    for (w, gamma, beta) in params:
        y = lax.conv_general_dilated(
            x, w, window_strides=(1, 1), padding="SAME",
            dimension_numbers=("NHWC", "HWIO", "NHWC"))
        mean = jnp.mean(y, axis=(0, 1, 2))
        var = jnp.mean((y - mean) ** 2, axis=(0, 1, 2))
        x = jnp.maximum((y - mean) * lax.rsqrt(var + BN_EPS) * gamma + beta,
                        0.0)
    n, h, w_img, c = x.shape
    xr = x.reshape(n, h // 2, 2, w_img // 2, 2, c)
    a, b = xr[:, :, 0, :, 0], xr[:, :, 0, :, 1]
    cc, d = xr[:, :, 1, :, 0], xr[:, :, 1, :, 1]
    row = 2 * lax.broadcasted_iota(jnp.int32, a.shape, 1)
    col = 2 * lax.broadcasted_iota(jnp.int32, a.shape, 2)
    best_v, best_i = a, row * w_img + col
    for v, dr, dc in ((b, 0, 1), (cc, 1, 0), (d, 1, 1)):
        cand = (row + dr) * w_img + (col + dc)
        take = v > best_v
        best_i = jnp.where(take, cand, best_i)
        best_v = jnp.where(take, v, best_v)
    act = jnp.transpose(x, (0, 3, 1, 2))
    return (jnp.transpose(best_v, (0, 3, 1, 2)),
            jnp.transpose(best_i, (0, 3, 1, 2)), act)


if __name__ == "__main__":
    key = jax.random.PRNGKey(0)
    kx, kp = jax.random.split(key)

    N, in_n, out_n, HW, n_layer = 2, 4, 8, 16, 2
    x = jax.random.normal(kx, (N, in_n, HW, HW), jnp.float32)
    params = init_encoder_block_params(kp, in_n, out_n, n_layer)

    out, indices = jax.jit(encoder_block_forward)(x, params)
    jax.block_until_ready((out, indices))

    assert out.shape == (N, out_n, HW // 2, HW // 2)
    assert indices.shape == (N, out_n, HW // 2, HW // 2)

    # Cross-check against a pure-JAX reference.
    ref_out, _, ref_act = _reference_forward(x, params)
    assert jnp.allclose(out, ref_out, rtol=5e-3, atol=5e-3), \
        float(jnp.max(jnp.abs(out - ref_out)))
    flat = ref_act.reshape(N, out_n, HW * HW)
    gathered = jnp.take_along_axis(
        flat, indices.reshape(N, out_n, -1), axis=2).reshape(indices.shape)
    assert jnp.allclose(gathered, out, rtol=5e-3, atol=5e-3)

    print("KERNEL_OK")
</pallas_src>

<mosaic_0001>
module attributes {stable_mosaic.version = 11 : i64} {
  func.func @_conv_stats_kernel(%arg0: i32, %arg1: i32, %arg2: memref<1x8x16x128xf32, #tpu.memory_space<vmem>>, %arg3: memref<1x1x16x128xf32, #tpu.memory_space<vmem>>, %arg4: memref<1x1x16x128xf32, #tpu.memory_space<vmem>>, %arg5: memref<1152x128xf32, #tpu.memory_space<vmem>>, %arg6: memref<1x128xf32, #tpu.memory_space<vmem>>, %arg7: memref<1x128xf32, #tpu.memory_space<vmem>>, %arg8: memref<1x8x16x128xf32, #tpu.memory_space<vmem>>, %arg9: memref<1x1x2x128xf32, #tpu.memory_space<vmem>>, %arg10: memref<176x128xf32, #tpu.memory_space<vmem>>, %arg11: memref<128x1152xf32, #tpu.memory_space<vmem>>) attributes {dimension_semantics = [#tpu.dimension_semantics<parallel>, #tpu.dimension_semantics<parallel>], iteration_bounds = array<i64: 2, 2>, scalar_prefetch = 0 : i64, scratch_operands = 2 : i64, tpu.core_type = #tpu.core_type<tc>, window_params = [{transform_indices = @transform_0, window_bounds = array<i64: 1, 8, 16, 128>}, {transform_indices = @transform_1, window_bounds = array<i64: 1, 1, 16, 128>}, {transform_indices = @transform_2, window_bounds = array<i64: 1, 1, 16, 128>}, {pipeline_mode = #tpu.pipeline_mode<synchronous>, transform_indices = @transform_3, window_bounds = array<i64: 1152, 128>}, {pipeline_mode = #tpu.pipeline_mode<synchronous>, transform_indices = @transform_4, window_bounds = array<i64: 1, 128>}, {pipeline_mode = #tpu.pipeline_mode<synchronous>, transform_indices = @transform_5, window_bounds = array<i64: 1, 128>}, {transform_indices = @transform_6, window_bounds = array<i64: 1, 8, 16, 128>}, {transform_indices = @transform_7, window_bounds = array<i64: 1, 1, 2, 128>}]} {
    %c0 = arith.constant 0 : index
    %c0_0 = arith.constant 0 : index
    %c0_1 = arith.constant 0 : index
    %c0_2 = arith.constant 0 : index
    %0 = vector.load %arg3[%c0, %c0_0, %c0_1, %c0_2] : memref<1x1x16x128xf32, #tpu.memory_space<vmem>>, vector<1x1x16x128xf32>
    %1 = vector.shape_cast %0 : vector<1x1x16x128xf32> to vector<1x16x128xf32>
    %2 = vector.shape_cast %1 : vector<1x16x128xf32> to vector<16x128xf32>
    %c0_3 = arith.constant 0 : index
    %c0_4 = arith.constant 0 : index
    %c0_5 = arith.constant 0 : index
    %c0_6 = arith.constant 0 : index
    %3 = vector.load %arg2[%c0_3, %c0_4, %c0_5, %c0_6] : memref<1x8x16x128xf32, #tpu.memory_space<vmem>>, vector<1x8x16x128xf32>
    %4 = vector.shape_cast %3 : vector<1x8x16x128xf32> to vector<8x16x128xf32>
    %5 = vector.shape_cast %4 : vector<8x16x128xf32> to vector<128x128xf32>
    %c0_7 = arith.constant 0 : index
    %c0_8 = arith.constant 0 : index
    %c0_9 = arith.constant 0 : index
    %c0_10 = arith.constant 0 : index
    %6 = vector.load %arg4[%c0_7, %c0_8, %c0_9, %c0_10] : memref<1x1x16x128xf32, #tpu.memory_space<vmem>>, vector<1x1x16x128xf32>
    %7 = vector.shape_cast %6 : vector<1x1x16x128xf32> to vector<1x16x128xf32>
    %8 = vector.shape_cast %7 : vector<1x16x128xf32> to vector<16x128xf32>
    %c0_i32 = arith.constant 0 : i32
    %9 = arith.cmpi eq, %arg1, %c0_i32 : i32
    %cst = arith.constant 0.000000e+00 : f32
    %10 = vector.broadcast %cst : f32 to vector<16x128xf32>
    %11 = arith.select %9, %10, %2 : vector<16x128xf32>
    %c1_i32 = arith.constant 1 : i32
    %12 = arith.cmpi eq, %arg1, %c1_i32 : i32
    %cst_11 = arith.constant 0.000000e+00 : f32
    %13 = vector.broadcast %cst_11 : f32 to vector<16x128xf32>
    %14 = arith.select %12, %13, %8 : vector<16x128xf32>
    %cst_12 = arith.constant 0.000000e+00 : f32
    %15 = vector.broadcast %cst_12 : f32 to vector<8x128xf32>
    %c0_13 = arith.constant 0 : index
    %c0_14 = arith.constant 0 : index
    %16 = vector.load %arg10[%c0_13, %c0_14] : memref<176x128xf32, #tpu.memory_space<vmem>>, vector<8x128xf32>
    tpu.vector_store %arg10[%c0_13, %c0_14], %15 {strides = array<i32>} : memref<176x128xf32, #tpu.memory_space<vmem>>, vector<8x128xf32>,
    %c8 = arith.constant 8 : index
    %c0_15 = arith.constant 0 : index
    %17 = vector.load %arg10[%c8, %c0_15] : memref<176x128xf32, #tpu.memory_space<vmem>>, vector<16x128xf32>
    tpu.vector_store %arg10[%c8, %c0_15], %11 {strides = array<i32>} : memref<176x128xf32, #tpu.memory_space<vmem>>, vector<16x128xf32>,
    %c24 = arith.constant 24 : index
    %c0_16 = arith.constant 0 : index
    %18 = vector.load %arg10[%c24, %c0_16] : memref<176x128xf32, #tpu.memory_space<vmem>>, vector<128x128xf32>
    tpu.vector_store %arg10[%c24, %c0_16], %5 {strides = array<i32>} : memref<176x128xf32, #tpu.memory_space<vmem>>, vector<128x128xf32>,
    %c152 = arith.constant 152 : index
    %c0_17 = arith.constant 0 : index
    %19 = vector.load %arg10[%c152, %c0_17] : memref<176x128xf32, #tpu.memory_space<vmem>>, vector<16x128xf32>
    tpu.vector_store %arg10[%c152, %c0_17], %14 {strides = array<i32>} : memref<176x128xf32, #tpu.memory_space<vmem>>, vector<16x128xf32>,
    %c168 = arith.constant 168 : index
    %c0_18 = arith.constant 0 : index
    %20 = vector.load %arg10[%c168, %c0_18] : memref<176x128xf32, #tpu.memory_space<vmem>>, vector<8x128xf32>
    tpu.vector_store %arg10[%c168, %c0_18], %15 {strides = array<i32>} : memref<176x128xf32, #tpu.memory_space<vmem>>, vector<8x128xf32>,
    %c0_19 = arith.constant 0 : index
    %c0_20 = arith.constant 0 : index
    %21 = vector.load %arg10[%c0_19, %c0_20] : memref<176x128xf32, #tpu.memory_space<vmem>>, vector<176x128xf32>
    %22 = tpu.iota {dimensions = array<i32: 1>} : vector<8x16x128xi32>
    %23 = vector.shape_cast %22 : vector<8x16x128xi32> to vector<128x128xi32>
    %24 = vector.extract_strided_slice %21 {offsets = [7, 0], sizes = [128, 128], strides = [1, 1]} : vector<176x128xf32> to vector<128x128xf32>
    %c0_i32_21 = arith.constant 0 : i32
    %25 = vector.broadcast %c0_i32_21 : i32 to vector<128x128xi32>
    %26 = arith.cmpi eq, %23, %25 : vector<128x128xi32>
    %cst_22 = arith.constant 0.000000e+00 : f32
    %27 = vector.broadcast %cst_22 : f32 to vector<128x128xf32>
    %28 = arith.select %26, %27, %24 : vector<128x128xi1>, vector<128x128xf32>
    %c0_23 = arith.constant 0 : index
    %c0_24 = arith.constant 0 : index
    %29 = vector.load %arg11[%c0_23, %c0_24] : memref<128x1152xf32, #tpu.memory_space<vmem>>, vector<128x128xf32>
    tpu.vector_store %arg11[%c0_23, %c0_24], %28 {strides = array<i32>} : memref<128x1152xf32, #tpu.memory_space<vmem>>, vector<128x128xf32>,
    %30 = vector.extract_strided_slice %21 {offsets = [8, 0], sizes = [128, 128], strides = [1, 1]} : vector<176x128xf32> to vector<128x128xf32>
    %c0_25 = arith.constant 0 : index
    %c128 = arith.constant 128 : index
    %31 = vector.load %arg11[%c0_25, %c128] : memref<128x1152xf32, #tpu.memory_space<vmem>>, vector<128x128xf32>
    tpu.vector_store %arg11[%c0_25, %c128], %30 {strides = array<i32>} : memref<128x1152xf32, #tpu.memory_space<vmem>>, vector<128x128xf32>,
    %32 = vector.extract_strided_slice %21 {offsets = [9, 0], sizes = [128, 128], strides = [1, 1]} : vector<176x128xf32> to vector<128x128xf32>
    %c15_i32 = arith.constant 15 : i32
    %33 = vector.broadcast %c15_i32 : i32 to vector<128x128xi32>
    %34 = arith.cmpi eq, %23, %33 : vector<128x128xi32>
    %cst_26 = arith.constant 0.000000e+00 : f32
    %35 = vector.broadcast %cst_26 : f32 to vector<128x128xf32>
    %36 = arith.select %34, %35, %32 : vector<128x128xi1>, vector<128x128xf32>
    %c0_27 = arith.constant 0 : index
    %c256 = arith.constant 256 : index
    %37 = vector.load %arg11[%c0_27, %c256] : memref<128x1152xf32, #tpu.memory_space<vmem>>, vector<128x128xf32>
    tpu.vector_store %arg11[%c0_27, %c256], %36 {strides = array<i32>} : memref<128x1152xf32, #tpu.memory_space<vmem>>, vector<128x128xf32>,
    %38 = vector.extract_strided_slice %21 {offsets = [23, 0], sizes = [128, 128], strides = [1, 1]} : vector<176x128xf32> to vector<128x128xf32>
    %c0_i32_28 = arith.constant 0 : i32
    %39 = vector.broadcast %c0_i32_28 : i32 to vector<128x128xi32>
    %40 = arith.cmpi eq, %23, %39 : vector<128x128xi32>
    %cst_29 = arith.constant 0.000000e+00 : f32
    %41 = vector.broadcast %cst_29 : f32 to vector<128x128xf32>
    %42 = arith.select %40, %41, %38 : vector<128x128xi1>, vector<128x128xf32>
    %c0_30 = arith.constant 0 : index
    %c384 = arith.constant 384 : index
    %43 = vector.load %arg11[%c0_30, %c384] : memref<128x1152xf32, #tpu.memory_space<vmem>>, vector<128x128xf32>
    tpu.vector_store %arg11[%c0_30, %c384], %42 {strides = array<i32>} : memref<128x1152xf32, #tpu.memory_space<vmem>>, vector<128x128xf32>,
    %44 = vector.extract_strided_slice %21 {offsets = [24, 0], sizes = [128, 128], strides = [1, 1]} : vector<176x128xf32> to vector<128x128xf32>
    %c0_31 = arith.constant 0 : index
    %c512 = arith.constant 512 : index
    %45 = vector.load %arg11[%c0_31, %c512] : memref<128x1152xf32, #tpu.memory_space<vmem>>, vector<128x128xf32>
    tpu.vector_store %arg11[%c0_31, %c512], %44 {strides = array<i32>} : memref<128x1152xf32, #tpu.memory_space<vmem>>, vector<128x128xf32>,
    %46 = vector.extract_strided_slice %21 {offsets = [25, 0], sizes = [128, 128], strides = [1, 1]} : vector<176x128xf32> to vector<128x128xf32>
    %c15_i32_32 = arith.constant 15 : i32
    %47 = vector.broadcast %c15_i32_32 : i32 to vector<128x128xi32>
    %48 = arith.cmpi eq, %23, %47 : vector<128x128xi32>
    %cst_33 = arith.constant 0.000000e+00 : f32
    %49 = vector.broadcast %cst_33 : f32 to vector<128x128xf32>
    %50 = arith.select %48, %49, %46 : vector<128x128xi1>, vector<128x128xf32>
    %c0_34 = arith.constant 0 : index
    %c640 = arith.constant 640 : index
    %51 = vector.load %arg11[%c0_34, %c640] : memref<128x1152xf32, #tpu.memory_space<vmem>>, vector<128x128xf32>
    tpu.vector_store %arg11[%c0_34, %c640], %50 {strides = array<i32>} : memref<128x1152xf32, #tpu.memory_space<vmem>>, vector<128x128xf32>,
    %52 = vector.extract_strided_slice %21 {offsets = [39, 0], sizes = [128, 128], strides = [1, 1]} : vector<176x128xf32> to vector<128x128xf32>
    %c0_i32_35 = arith.constant 0 : i32
    %53 = vector.broadcast %c0_i32_35 : i32 to vector<128x128xi32>
    %54 = arith.cmpi eq, %23, %53 : vector<128x128xi32>
    %cst_36 = arith.constant 0.000000e+00 : f32
    %55 = vector.broadcast %cst_36 : f32 to vector<128x128xf32>
    %56 = arith.select %54, %55, %52 : vector<128x128xi1>, vector<128x128xf32>
    %c0_37 = arith.constant 0 : index
    %c768 = arith.constant 768 : index
    %57 = vector.load %arg11[%c0_37, %c768] : memref<128x1152xf32, #tpu.memory_space<vmem>>, vector<128x128xf32>
    tpu.vector_store %arg11[%c0_37, %c768], %56 {strides = array<i32>} : memref<128x1152xf32, #tpu.memory_space<vmem>>, vector<128x128xf32>,
    %58 = vector.extract_strided_slice %21 {offsets = [40, 0], sizes = [128, 128], strides = [1, 1]} : vector<176x128xf32> to vector<128x128xf32>
    %c0_38 = arith.constant 0 : index
    %c896 = arith.constant 896 : index
    %59 = vector.load %arg11[%c0_38, %c896] : memref<128x1152xf32, #tpu.memory_space<vmem>>, vector<128x128xf32>
    tpu.vector_store %arg11[%c0_38, %c896], %58 {strides = array<i32>} : memref<128x1152xf32, #tpu.memory_space<vmem>>, vector<128x128xf32>,
    %60 = vector.extract_strided_slice %21 {offsets = [41, 0], sizes = [128, 128], strides = [1, 1]} : vector<176x128xf32> to vector<128x128xf32>
    %c15_i32_39 = arith.constant 15 : i32
    %61 = vector.broadcast %c15_i32_39 : i32 to vector<128x128xi32>
    %62 = arith.cmpi eq, %23, %61 : vector<128x128xi32>
    %cst_40 = arith.constant 0.000000e+00 : f32
    %63 = vector.broadcast %cst_40 : f32 to vector<128x128xf32>
    %64 = arith.select %62, %63, %60 : vector<128x128xi1>, vector<128x128xf32>
    %c0_41 = arith.constant 0 : index
    %c1024 = arith.constant 1024 : index
    %65 = vector.load %arg11[%c0_41, %c1024] : memref<128x1152xf32, #tpu.memory_space<vmem>>, vector<128x128xf32>
    tpu.vector_store %arg11[%c0_41, %c1024], %64 {strides = array<i32>} : memref<128x1152xf32, #tpu.memory_space<vmem>>, vector<128x128xf32>,
    %c0_42 = arith.constant 0 : index
    %c0_43 = arith.constant 0 : index
    %66 = vector.load %arg11[%c0_42, %c0_43] : memref<128x1152xf32, #tpu.memory_space<vmem>>, vector<128x1152xf32>
    %c0_44 = arith.constant 0 : index
    %c0_45 = arith.constant 0 : index
    %67 = vector.load %arg5[%c0_44, %c0_45] : memref<1152x128xf32, #tpu.memory_space<vmem>>, vector<1152x128xf32>
    %cst_46 = arith.constant dense<0.000000e+00> : vector<128x128xf32>
    %68 = tpu.matmul %66, %67, %cst_46 {dimension_numbers = #tpu.dot_dimension_numbers<[1], [0], [0], [1], [0, 0, 1, 1], [], []>} : vector<128x1152xf32>, vector<1152x128xf32>, vector<128x128xf32> -> vector<128x128xf32>
    %69 = vector.shape_cast %68 : vector<128x128xf32> to vector<8x16x128xf32>
    %c0_47 = arith.constant 0 : index
    %c0_48 = arith.constant 0 : index
    %c0_49 = arith.constant 0 : index
    %c0_50 = arith.constant 0 : index
    %70 = vector.load %arg8[%c0_47, %c0_48, %c0_49, %c0_50] : memref<1x8x16x128xf32, #tpu.memory_space<vmem>>, vector<1x8x16x128xf32>
    %71 = vector.shape_cast %70 : vector<1x8x16x128xf32> to vector<8x16x128xf32>
    %72 = vector.shape_cast %69 : vector<8x16x128xf32> to vector<1x8x16x128xf32>
    tpu.vector_store %arg8[%c0_47, %c0_48, %c0_49, %c0_50], %72 {strides = array<i32>} : memref<1x8x16x128xf32, #tpu.memory_space<vmem>>, vector<1x8x16x128xf32>,
    %cst_51 = arith.constant dense<0.000000e+00> : vector<128xf32>
    %73 = vector.multi_reduction <add>, %68, %cst_51 [0] : vector<128x128xf32> to vector<128xf32>
    %74 = vector.shape_cast %73 : vector<128xf32> to vector<1x128xf32>
    %c0_52 = arith.constant 0 : index
    %c0_53 = arith.constant 0 : index
    %c0_54 = arith.constant 0 : index
    %c0_55 = arith.constant 0 : index
    %75 = vector.load %arg9[%c0_52, %c0_53, %c0_54, %c0_55] : memref<1x1x2x128xf32, #tpu.memory_space<vmem>>, vector<1x1x1x128xf32>
    %76 = vector.shape_cast %75 : vector<1x1x1x128xf32> to vector<1x128xf32>
    %77 = vector.shape_cast %74 : vector<1x128xf32> to vector<1x1x1x128xf32>
    tpu.vector_store %arg9[%c0_52, %c0_53, %c0_54, %c0_55], %77 {strides = array<i32>} : memref<1x1x2x128xf32, #tpu.memory_space<vmem>>, vector<1x1x1x128xf32>,
    %78 = arith.mulf %68, %68 : vector<128x128xf32>
    %cst_56 = arith.constant dense<0.000000e+00> : vector<128xf32>
    %79 = vector.multi_reduction <add>, %78, %cst_56 [0] : vector<128x128xf32> to vector<128xf32>
    %80 = vector.shape_cast %79 : vector<128xf32> to vector<1x128xf32>
    %c0_57 = arith.constant 0 : index
    %c0_58 = arith.constant 0 : index
    %c1 = arith.constant 1 : index
    %c0_59 = arith.constant 0 : index
    %81 = vector.load %arg9[%c0_57, %c0_58, %c1, %c0_59] : memref<1x1x2x128xf32, #tpu.memory_space<vmem>>, vector<1x1x1x128xf32>
    %82 = vector.shape_cast %81 : vector<1x1x1x128xf32> to vector<1x128xf32>
    %83 = vector.shape_cast %80 : vector<1x128xf32> to vector<1x1x1x128xf32>
    tpu.vector_store %arg9[%c0_57, %c0_58, %c1, %c0_59], %83 {strides = array<i32>} : memref<1x1x2x128xf32, #tpu.memory_space<vmem>>, vector<1x1x1x128xf32>,
    return
  }
  func.func @transform_0(%arg0: i32, %arg1: i32) -> (i32, i32, i32, i32) {
    %c0_i32 = arith.constant 0 : i32
    %c0_i32_0 = arith.constant 0 : i32
    %c0_i32_1 = arith.constant 0 : i32
    return %arg0, %arg1, %c0_i32, %c0_i32_0 : i32, i32, i32, i32
  }
  func.func @transform_1(%arg0: i32, %arg1: i32) -> (i32, i32, i32, i32) {
    %c8_i32 = arith.constant 8 : i32
    %0 = arith.muli %arg1, %c8_i32 : i32
    %c1_i32 = arith.constant 1 : i32
    %1 = arith.subi %0, %c1_i32 : i32
    %c0_i32 = arith.constant 0 : i32
    %2 = arith.maxsi %1, %c0_i32 : i32
    %c0_i32_0 = arith.constant 0 : i32
    %c0_i32_1 = arith.constant 0 : i32
    %c0_i32_2 = arith.constant 0 : i32
    return %arg0, %2, %c0_i32_0, %c0_i32_1 : i32, i32, i32, i32
  }
  func.func @transform_2(%arg0: i32, %arg1: i32) -> (i32, i32, i32, i32) {
    %c8_i32 = arith.constant 8 : i32
    %0 = arith.muli %arg1, %c8_i32 : i32
    %c8_i32_0 = arith.constant 8 : i32
    %1 = arith.addi %0, %c8_i32_0 : i32
    %c15_i32 = arith.constant 15 : i32
    %2 = arith.minsi %1, %c15_i32 : i32
    %c0_i32 = arith.constant 0 : i32
    %c0_i32_1 = arith.constant 0 : i32
    %c0_i32_2 = arith.constant 0 : i32
    return %arg0, %2, %c0_i32, %c0_i32_1 : i32, i32, i32, i32
  }
  func.func @transform_3(%arg0: i32, %arg1: i32) -> (i32, i32) {
    %c0_i32 = arith.constant 0 : i32
    %c0_i32_0 = arith.constant 0 : i32
    %c0_i32_1 = arith.constant 0 : i32
    return %c0_i32, %c0_i32_0 : i32, i32
  }
  func.func @transform_4(%arg0: i32, %arg1: i32) -> (i32, i32) {
    %c0_i32 = arith.constant 0 : i32
    %c0_i32_0 = arith.constant 0 : i32
    %c0_i32_1 = arith.constant 0 : i32
    return %c0_i32, %c0_i32_0 : i32, i32
  }
  func.func @transform_5(%arg0: i32, %arg1: i32) -> (i32, i32) {
    %c0_i32 = arith.constant 0 : i32
    %c0_i32_0 = arith.constant 0 : i32
    %c0_i32_1 = arith.constant 0 : i32
    return %c0_i32, %c0_i32_0 : i32, i32
  }
  func.func @transform_6(%arg0: i32, %arg1: i32) -> (i32, i32, i32, i32) {
    %c0_i32 = arith.constant 0 : i32
    %c0_i32_0 = arith.constant 0 : i32
    %c0_i32_1 = arith.constant 0 : i32
    return %arg0, %arg1, %c0_i32, %c0_i32_0 : i32, i32, i32, i32
  }
  func.func @transform_7(%arg0: i32, %arg1: i32) -> (i32, i32, i32, i32) {
    %c0_i32 = arith.constant 0 : i32
    %c0_i32_0 = arith.constant 0 : i32
    %c0_i32_1 = arith.constant 0 : i32
    return %arg0, %arg1, %c0_i32, %c0_i32_0 : i32, i32, i32, i32
  }
}

module attributes {stable_mosaic.version = 11 : i64} {
  func.func @_conv_stats_kernel(%arg0: i32, %arg1: i32, %arg2: memref<1x8x16x128xf32, #tpu.memory_space<vmem>>, %arg3: memref<1x1x16x128xf32, #tpu.memory_space<vmem>>, %arg4: memref<1x1x16x128xf32, #tpu.memory_space<vmem>>, %arg5: memref<1152x128xf32, #tpu.memory_space<vmem>>, %arg6: memref<1x128xf32, #tpu.memory_space<vmem>>, %arg7: memref<1x128xf32, #tpu.memory_space<vmem>>, %arg8: memref<1x8x16x128xf32, #tpu.memory_space<vmem>>, %arg9: memref<1x1x2x128xf32, #tpu.memory_space<vmem>>, %arg10: memref<176x128xf32, #tpu.memory_space<vmem>>, %arg11: memref<128x1152xf32, #tpu.memory_space<vmem>>) attributes {dimension_semantics = [#tpu.dimension_semantics<parallel>, #tpu.dimension_semantics<parallel>], iteration_bounds = array<i64: 2, 2>, scalar_prefetch = 0 : i64, scratch_operands = 2 : i64, tpu.core_type = #tpu.core_type<tc>, window_params = [{transform_indices = @transform_0, window_bounds = array<i64: 1, 8, 16, 128>}, {transform_indices = @transform_1, window_bounds = array<i64: 1, 1, 16, 128>}, {transform_indices = @transform_2, window_bounds = array<i64: 1, 1, 16, 128>}, {pipeline_mode = #tpu.pipeline_mode<synchronous>, transform_indices = @transform_3, window_bounds = array<i64: 1152, 128>}, {pipeline_mode = #tpu.pipeline_mode<synchronous>, transform_indices = @transform_4, window_bounds = array<i64: 1, 128>}, {pipeline_mode = #tpu.pipeline_mode<synchronous>, transform_indices = @transform_5, window_bounds = array<i64: 1, 128>}, {transform_indices = @transform_6, window_bounds = array<i64: 1, 8, 16, 128>}, {transform_indices = @transform_7, window_bounds = array<i64: 1, 1, 2, 128>}]} {
    %c0 = arith.constant 0 : index
    %c0_0 = arith.constant 0 : index
    %c0_1 = arith.constant 0 : index
    %c0_2 = arith.constant 0 : index
    %0 = vector.load %arg3[%c0, %c0_0, %c0_1, %c0_2] : memref<1x1x16x128xf32, #tpu.memory_space<vmem>>, vector<1x1x16x128xf32>
    %1 = vector.shape_cast %0 : vector<1x1x16x128xf32> to vector<1x16x128xf32>
    %2 = vector.shape_cast %1 : vector<1x16x128xf32> to vector<16x128xf32>
    %c0_3 = arith.constant 0 : index
    %c0_4 = arith.constant 0 : index
    %c0_5 = arith.constant 0 : index
    %c0_6 = arith.constant 0 : index
    %3 = vector.load %arg2[%c0_3, %c0_4, %c0_5, %c0_6] : memref<1x8x16x128xf32, #tpu.memory_space<vmem>>, vector<1x8x16x128xf32>
    %4 = vector.shape_cast %3 : vector<1x8x16x128xf32> to vector<8x16x128xf32>
    %5 = vector.shape_cast %4 : vector<8x16x128xf32> to vector<128x128xf32>
    %c0_7 = arith.constant 0 : index
    %c0_8 = arith.constant 0 : index
    %c0_9 = arith.constant 0 : index
    %c0_10 = arith.constant 0 : index
    %6 = vector.load %arg4[%c0_7, %c0_8, %c0_9, %c0_10] : memref<1x1x16x128xf32, #tpu.memory_space<vmem>>, vector<1x1x16x128xf32>
    %7 = vector.shape_cast %6 : vector<1x1x16x128xf32> to vector<1x16x128xf32>
    %8 = vector.shape_cast %7 : vector<1x16x128xf32> to vector<16x128xf32>
    %c0_11 = arith.constant 0 : index
    %c0_12 = arith.constant 0 : index
    %9 = vector.load %arg6[%c0_11, %c0_12] : memref<1x128xf32, #tpu.memory_space<vmem>>, vector<1x128xf32>
    %c0_13 = arith.constant 0 : index
    %c0_14 = arith.constant 0 : index
    %10 = vector.load %arg7[%c0_13, %c0_14] : memref<1x128xf32, #tpu.memory_space<vmem>>, vector<1x128xf32>
    %11 = vector.broadcast %9 : vector<1x128xf32> to vector<16x128xf32>
    %12 = arith.mulf %2, %11 : vector<16x128xf32>
    %13 = vector.broadcast %10 : vector<1x128xf32> to vector<16x128xf32>
    %14 = arith.addf %12, %13 : vector<16x128xf32>
    %cst = arith.constant 0.000000e+00 : f32
    %15 = vector.broadcast %cst : f32 to vector<16x128xf32>
    %16 = arith.maximumf %14, %15 : vector<16x128xf32>
    %17 = vector.broadcast %9 : vector<1x128xf32> to vector<128x128xf32>
    %18 = arith.mulf %5, %17 : vector<128x128xf32>
    %19 = vector.broadcast %10 : vector<1x128xf32> to vector<128x128xf32>
    %20 = arith.addf %18, %19 : vector<128x128xf32>
    %cst_15 = arith.constant 0.000000e+00 : f32
    %21 = vector.broadcast %cst_15 : f32 to vector<128x128xf32>
    %22 = arith.maximumf %20, %21 : vector<128x128xf32>
    %23 = vector.broadcast %9 : vector<1x128xf32> to vector<16x128xf32>
    %24 = arith.mulf %8, %23 : vector<16x128xf32>
    %25 = vector.broadcast %10 : vector<1x128xf32> to vector<16x128xf32>
    %26 = arith.addf %24, %25 : vector<16x128xf32>
    %cst_16 = arith.constant 0.000000e+00 : f32
    %27 = vector.broadcast %cst_16 : f32 to vector<16x128xf32>
    %28 = arith.maximumf %26, %27 : vector<16x128xf32>
    %c0_i32 = arith.constant 0 : i32
    %29 = arith.cmpi eq, %arg1, %c0_i32 : i32
    %cst_17 = arith.constant 0.000000e+00 : f32
    %30 = vector.broadcast %cst_17 : f32 to vector<16x128xf32>
    %31 = arith.select %29, %30, %16 : vector<16x128xf32>
    %c1_i32 = arith.constant 1 : i32
    %32 = arith.cmpi eq, %arg1, %c1_i32 : i32
    %cst_18 = arith.constant 0.000000e+00 : f32
    %33 = vector.broadcast %cst_18 : f32 to vector<16x128xf32>
    %34 = arith.select %32, %33, %28 : vector<16x128xf32>
    %cst_19 = arith.constant 0.000000e+00 : f32
    %35 = vector.broadcast %cst_19 : f32 to vector<8x128xf32>
    %c0_20 = arith.constant 0 : index
    %c0_21 = arith.constant 0 : index
    %36 = vector.load %arg10[%c0_20, %c0_21] : memref<176x128xf32, #tpu.memory_space<vmem>>, vector<8x128xf32>
    tpu.vector_store %arg10[%c0_20, %c0_21], %35 {strides = array<i32>} : memref<176x128xf32, #tpu.memory_space<vmem>>, vector<8x128xf32>,
    %c8 = arith.constant 8 : index
    %c0_22 = arith.constant 0 : index
    %37 = vector.load %arg10[%c8, %c0_22] : memref<176x128xf32, #tpu.memory_space<vmem>>, vector<16x128xf32>
    tpu.vector_store %arg10[%c8, %c0_22], %31 {strides = array<i32>} : memref<176x128xf32, #tpu.memory_space<vmem>>, vector<16x128xf32>,
    %c24 = arith.constant 24 : index
    %c0_23 = arith.constant 0 : index
    %38 = vector.load %arg10[%c24, %c0_23] : memref<176x128xf32, #tpu.memory_space<vmem>>, vector<128x128xf32>
    tpu.vector_store %arg10[%c24, %c0_23], %22 {strides = array<i32>} : memref<176x128xf32, #tpu.memory_space<vmem>>, vector<128x128xf32>,
    %c152 = arith.constant 152 : index
    %c0_24 = arith.constant 0 : index
    %39 = vector.load %arg10[%c152, %c0_24] : memref<176x128xf32, #tpu.memory_space<vmem>>, vector<16x128xf32>
    tpu.vector_store %arg10[%c152, %c0_24], %34 {strides = array<i32>} : memref<176x128xf32, #tpu.memory_space<vmem>>, vector<16x128xf32>,
    %c168 = arith.constant 168 : index
    %c0_25 = arith.constant 0 : index
    %40 = vector.load %arg10[%c168, %c0_25] : memref<176x128xf32, #tpu.memory_space<vmem>>, vector<8x128xf32>
    tpu.vector_store %arg10[%c168, %c0_25], %35 {strides = array<i32>} : memref<176x128xf32, #tpu.memory_space<vmem>>, vector<8x128xf32>,
    %c0_26 = arith.constant 0 : index
    %c0_27 = arith.constant 0 : index
    %41 = vector.load %arg10[%c0_26, %c0_27] : memref<176x128xf32, #tpu.memory_space<vmem>>, vector<176x128xf32>
    %42 = tpu.iota {dimensions = array<i32: 1>} : vector<8x16x128xi32>
    %43 = vector.shape_cast %42 : vector<8x16x128xi32> to vector<128x128xi32>
    %44 = vector.extract_strided_slice %41 {offsets = [7, 0], sizes = [128, 128], strides = [1, 1]} : vector<176x128xf32> to vector<128x128xf32>
    %c0_i32_28 = arith.constant 0 : i32
    %45 = vector.broadcast %c0_i32_28 : i32 to vector<128x128xi32>
    %46 = arith.cmpi eq, %43, %45 : vector<128x128xi32>
    %cst_29 = arith.constant 0.000000e+00 : f32
    %47 = vector.broadcast %cst_29 : f32 to vector<128x128xf32>
    %48 = arith.select %46, %47, %44 : vector<128x128xi1>, vector<128x128xf32>
    %c0_30 = arith.constant 0 : index
    %c0_31 = arith.constant 0 : index
    %49 = vector.load %arg11[%c0_30, %c0_31] : memref<128x1152xf32, #tpu.memory_space<vmem>>, vector<128x128xf32>
    tpu.vector_store %arg11[%c0_30, %c0_31], %48 {strides = array<i32>} : memref<128x1152xf32, #tpu.memory_space<vmem>>, vector<128x128xf32>,
    %50 = vector.extract_strided_slice %41 {offsets = [8, 0], sizes = [128, 128], strides = [1, 1]} : vector<176x128xf32> to vector<128x128xf32>
    %c0_32 = arith.constant 0 : index
    %c128 = arith.constant 128 : index
    %51 = vector.load %arg11[%c0_32, %c128] : memref<128x1152xf32, #tpu.memory_space<vmem>>, vector<128x128xf32>
    tpu.vector_store %arg11[%c0_32, %c128], %50 {strides = array<i32>} : memref<128x1152xf32, #tpu.memory_space<vmem>>, vector<128x128xf32>,
    %52 = vector.extract_strided_slice %41 {offsets = [9, 0], sizes = [128, 128], strides = [1, 1]} : vector<176x128xf32> to vector<128x128xf32>
    %c15_i32 = arith.constant 15 : i32
    %53 = vector.broadcast %c15_i32 : i32 to vector<128x128xi32>
    %54 = arith.cmpi eq, %43, %53 : vector<128x128xi32>
    %cst_33 = arith.constant 0.000000e+00 : f32
    %55 = vector.broadcast %cst_33 : f32 to vector<128x128xf32>
    %56 = arith.select %54, %55, %52 : vector<128x128xi1>, vector<128x128xf32>
    %c0_34 = arith.constant 0 : index
    %c256 = arith.constant 256 : index
    %57 = vector.load %arg11[%c0_34, %c256] : memref<128x1152xf32, #tpu.memory_space<vmem>>, vector<128x128xf32>
    tpu.vector_store %arg11[%c0_34, %c256], %56 {strides = array<i32>} : memref<128x1152xf32, #tpu.memory_space<vmem>>, vector<128x128xf32>,
    %58 = vector.extract_strided_slice %41 {offsets = [23, 0], sizes = [128, 128], strides = [1, 1]} : vector<176x128xf32> to vector<128x128xf32>
    %c0_i32_35 = arith.constant 0 : i32
    %59 = vector.broadcast %c0_i32_35 : i32 to vector<128x128xi32>
    %60 = arith.cmpi eq, %43, %59 : vector<128x128xi32>
    %cst_36 = arith.constant 0.000000e+00 : f32
    %61 = vector.broadcast %cst_36 : f32 to vector<128x128xf32>
    %62 = arith.select %60, %61, %58 : vector<128x128xi1>, vector<128x128xf32>
    %c0_37 = arith.constant 0 : index
    %c384 = arith.constant 384 : index
    %63 = vector.load %arg11[%c0_37, %c384] : memref<128x1152xf32, #tpu.memory_space<vmem>>, vector<128x128xf32>
    tpu.vector_store %arg11[%c0_37, %c384], %62 {strides = array<i32>} : memref<128x1152xf32, #tpu.memory_space<vmem>>, vector<128x128xf32>,
    %64 = vector.extract_strided_slice %41 {offsets = [24, 0], sizes = [128, 128], strides = [1, 1]} : vector<176x128xf32> to vector<128x128xf32>
    %c0_38 = arith.constant 0 : index
    %c512 = arith.constant 512 : index
    %65 = vector.load %arg11[%c0_38, %c512] : memref<128x1152xf32, #tpu.memory_space<vmem>>, vector<128x128xf32>
    tpu.vector_store %arg11[%c0_38, %c512], %64 {strides = array<i32>} : memref<128x1152xf32, #tpu.memory_space<vmem>>, vector<128x128xf32>,
    %66 = vector.extract_strided_slice %41 {offsets = [25, 0], sizes = [128, 128], strides = [1, 1]} : vector<176x128xf32> to vector<128x128xf32>
    %c15_i32_39 = arith.constant 15 : i32
    %67 = vector.broadcast %c15_i32_39 : i32 to vector<128x128xi32>
    %68 = arith.cmpi eq, %43, %67 : vector<128x128xi32>
    %cst_40 = arith.constant 0.000000e+00 : f32
    %69 = vector.broadcast %cst_40 : f32 to vector<128x128xf32>
    %70 = arith.select %68, %69, %66 : vector<128x128xi1>, vector<128x128xf32>
    %c0_41 = arith.constant 0 : index
    %c640 = arith.constant 640 : index
    %71 = vector.load %arg11[%c0_41, %c640] : memref<128x1152xf32, #tpu.memory_space<vmem>>, vector<128x128xf32>
    tpu.vector_store %arg11[%c0_41, %c640], %70 {strides = array<i32>} : memref<128x1152xf32, #tpu.memory_space<vmem>>, vector<128x128xf32>,
    %72 = vector.extract_strided_slice %41 {offsets = [39, 0], sizes = [128, 128], strides = [1, 1]} : vector<176x128xf32> to vector<128x128xf32>
    %c0_i32_42 = arith.constant 0 : i32
    %73 = vector.broadcast %c0_i32_42 : i32 to vector<128x128xi32>
    %74 = arith.cmpi eq, %43, %73 : vector<128x128xi32>
    %cst_43 = arith.constant 0.000000e+00 : f32
    %75 = vector.broadcast %cst_43 : f32 to vector<128x128xf32>
    %76 = arith.select %74, %75, %72 : vector<128x128xi1>, vector<128x128xf32>
    %c0_44 = arith.constant 0 : index
    %c768 = arith.constant 768 : index
    %77 = vector.load %arg11[%c0_44, %c768] : memref<128x1152xf32, #tpu.memory_space<vmem>>, vector<128x128xf32>
    tpu.vector_store %arg11[%c0_44, %c768], %76 {strides = array<i32>} : memref<128x1152xf32, #tpu.memory_space<vmem>>, vector<128x128xf32>,
    %78 = vector.extract_strided_slice %41 {offsets = [40, 0], sizes = [128, 128], strides = [1, 1]} : vector<176x128xf32> to vector<128x128xf32>
    %c0_45 = arith.constant 0 : index
    %c896 = arith.constant 896 : index
    %79 = vector.load %arg11[%c0_45, %c896] : memref<128x1152xf32, #tpu.memory_space<vmem>>, vector<128x128xf32>
    tpu.vector_store %arg11[%c0_45, %c896], %78 {strides = array<i32>} : memref<128x1152xf32, #tpu.memory_space<vmem>>, vector<128x128xf32>,
    %80 = vector.extract_strided_slice %41 {offsets = [41, 0], sizes = [128, 128], strides = [1, 1]} : vector<176x128xf32> to vector<128x128xf32>
    %c15_i32_46 = arith.constant 15 : i32
    %81 = vector.broadcast %c15_i32_46 : i32 to vector<128x128xi32>
    %82 = arith.cmpi eq, %43, %81 : vector<128x128xi32>
    %cst_47 = arith.constant 0.000000e+00 : f32
    %83 = vector.broadcast %cst_47 : f32 to vector<128x128xf32>
    %84 = arith.select %82, %83, %80 : vector<128x128xi1>, vector<128x128xf32>
    %c0_48 = arith.constant 0 : index
    %c1024 = arith.constant 1024 : index
    %85 = vector.load %arg11[%c0_48, %c1024] : memref<128x1152xf32, #tpu.memory_space<vmem>>, vector<128x128xf32>
    tpu.vector_store %arg11[%c0_48, %c1024], %84 {strides = array<i32>} : memref<128x1152xf32, #tpu.memory_space<vmem>>, vector<128x128xf32>,
    %c0_49 = arith.constant 0 : index
    %c0_50 = arith.constant 0 : index
    %86 = vector.load %arg11[%c0_49, %c0_50] : memref<128x1152xf32, #tpu.memory_space<vmem>>, vector<128x1152xf32>
    %c0_51 = arith.constant 0 : index
    %c0_52 = arith.constant 0 : index
    %87 = vector.load %arg5[%c0_51, %c0_52] : memref<1152x128xf32, #tpu.memory_space<vmem>>, vector<1152x128xf32>
    %cst_53 = arith.constant dense<0.000000e+00> : vector<128x128xf32>
    %88 = tpu.matmul %86, %87, %cst_53 {dimension_numbers = #tpu.dot_dimension_numbers<[1], [0], [0], [1], [0, 0, 1, 1], [], []>} : vector<128x1152xf32>, vector<1152x128xf32>, vector<128x128xf32> -> vector<128x128xf32>
    %89 = vector.shape_cast %88 : vector<128x128xf32> to vector<8x16x128xf32>
    %c0_54 = arith.constant 0 : index
    %c0_55 = arith.constant 0 : index
    %c0_56 = arith.constant 0 : index
    %c0_57 = arith.constant 0 : index
    %90 = vector.load %arg8[%c0_54, %c0_55, %c0_56, %c0_57] : memref<1x8x16x128xf32, #tpu.memory_space<vmem>>, vector<1x8x16x128xf32>
    %91 = vector.shape_cast %90 : vector<1x8x16x128xf32> to vector<8x16x128xf32>
    %92 = vector.shape_cast %89 : vector<8x16x128xf32> to vector<1x8x16x128xf32>
    tpu.vector_store %arg8[%c0_54, %c0_55, %c0_56, %c0_57], %92 {strides = array<i32>} : memref<1x8x16x128xf32, #tpu.memory_space<vmem>>, vector<1x8x16x128xf32>,
    %cst_58 = arith.constant dense<0.000000e+00> : vector<128xf32>
    %93 = vector.multi_reduction <add>, %88, %cst_58 [0] : vector<128x128xf32> to vector<128xf32>
    %94 = vector.shape_cast %93 : vector<128xf32> to vector<1x128xf32>
    %c0_59 = arith.constant 0 : index
    %c0_60 = arith.constant 0 : index
    %c0_61 = arith.constant 0 : index
    %c0_62 = arith.constant 0 : index
    %95 = vector.load %arg9[%c0_59, %c0_60, %c0_61, %c0_62] : memref<1x1x2x128xf32, #tpu.memory_space<vmem>>, vector<1x1x1x128xf32>
    %96 = vector.shape_cast %95 : vector<1x1x1x128xf32> to vector<1x128xf32>
    %97 = vector.shape_cast %94 : vector<1x128xf32> to vector<1x1x1x128xf32>
    tpu.vector_store %arg9[%c0_59, %c0_60, %c0_61, %c0_62], %97 {strides = array<i32>} : memref<1x1x2x128xf32, #tpu.memory_space<vmem>>, vector<1x1x1x128xf32>,
    %98 = arith.mulf %88, %88 : vector<128x128xf32>
    %cst_63 = arith.constant dense<0.000000e+00> : vector<128xf32>
    %99 = vector.multi_reduction <add>, %98, %cst_63 [0] : vector<128x128xf32> to vector<128xf32>
    %100 = vector.shape_cast %99 : vector<128xf32> to vector<1x128xf32>
    %c0_64 = arith.constant 0 : index
    %c0_65 = arith.constant 0 : index
    %c1 = arith.constant 1 : index
    %c0_66 = arith.constant 0 : index
    %101 = vector.load %arg9[%c0_64, %c0_65, %c1, %c0_66] : memref<1x1x2x128xf32, #tpu.memory_space<vmem>>, vector<1x1x1x128xf32>
    %102 = vector.shape_cast %101 : vector<1x1x1x128xf32> to vector<1x128xf32>
    %103 = vector.shape_cast %100 : vector<1x128xf32> to vector<1x1x1x128xf32>
    tpu.vector_store %arg9[%c0_64, %c0_65, %c1, %c0_66], %103 {strides = array<i32>} : memref<1x1x2x128xf32, #tpu.memory_space<vmem>>, vector<1x1x1x128xf32>,
    return
  }
  func.func @transform_0(%arg0: i32, %arg1: i32) -> (i32, i32, i32, i32) {
    %c0_i32 = arith.constant 0 : i32
    %c0_i32_0 = arith.constant 0 : i32
    %c0_i32_1 = arith.constant 0 : i32
    return %arg0, %arg1, %c0_i32, %c0_i32_0 : i32, i32, i32, i32
  }
  func.func @transform_1(%arg0: i32, %arg1: i32) -> (i32, i32, i32, i32) {
    %c8_i32 = arith.constant 8 : i32
    %0 = arith.muli %arg1, %c8_i32 : i32
    %c1_i32 = arith.constant 1 : i32
    %1 = arith.subi %0, %c1_i32 : i32
    %c0_i32 = arith.constant 0 : i32
    %2 = arith.maxsi %1, %c0_i32 : i32
    %c0_i32_0 = arith.constant 0 : i32
    %c0_i32_1 = arith.constant 0 : i32
    %c0_i32_2 = arith.constant 0 : i32
    return %arg0, %2, %c0_i32_0, %c0_i32_1 : i32, i32, i32, i32
  }
  func.func @transform_2(%arg0: i32, %arg1: i32) -> (i32, i32, i32, i32) {
    %c8_i32 = arith.constant 8 : i32
    %0 = arith.muli %arg1, %c8_i32 : i32
    %c8_i32_0 = arith.constant 8 : i32
    %1 = arith.addi %0, %c8_i32_0 : i32
    %c15_i32 = arith.constant 15 : i32
    %2 = arith.minsi %1, %c15_i32 : i32
    %c0_i32 = arith.constant 0 : i32
    %c0_i32_1 = arith.constant 0 : i32
    %c0_i32_2 = arith.constant 0 : i32
    return %arg0, %2, %c0_i32, %c0_i32_1 : i32, i32, i32, i32
  }
  func.func @transform_3(%arg0: i32, %arg1: i32) -> (i32, i32) {
    %c0_i32 = arith.constant 0 : i32
    %c0_i32_0 = arith.constant 0 : i32
    %c0_i32_1 = arith.constant 0 : i32
    return %c0_i32, %c0_i32_0 : i32, i32
  }
  func.func @transform_4(%arg0: i32, %arg1: i32) -> (i32, i32) {
    %c0_i32 = arith.constant 0 : i32
    %c0_i32_0 = arith.constant 0 : i32
    %c0_i32_1 = arith.constant 0 : i32
    return %c0_i32, %c0_i32_0 : i32, i32
  }
  func.func @transform_5(%arg0: i32, %arg1: i32) -> (i32, i32) {
    %c0_i32 = arith.constant 0 : i32
    %c0_i32_0 = arith.constant 0 : i32
    %c0_i32_1 = arith.constant 0 : i32
    return %c0_i32, %c0_i32_0 : i32, i32
  }
  func.func @transform_6(%arg0: i32, %arg1: i32) -> (i32, i32, i32, i32) {
    %c0_i32 = arith.constant 0 : i32
    %c0_i32_0 = arith.constant 0 : i32
    %c0_i32_1 = arith.constant 0 : i32
    return %arg0, %arg1, %c0_i32, %c0_i32_0 : i32, i32, i32, i32
  }
  func.func @transform_7(%arg0: i32, %arg1: i32) -> (i32, i32, i32, i32) {
    %c0_i32 = arith.constant 0 : i32
    %c0_i32_0 = arith.constant 0 : i32
    %c0_i32_1 = arith.constant 0 : i32
    return %arg0, %arg1, %c0_i32, %c0_i32_0 : i32, i32, i32, i32
  }
}

module attributes {stable_mosaic.version = 11 : i64} {
  func.func @_bn_relu_pool_kernel(%arg0: i32, %arg1: i32, %arg2: memref<1x8x8x256xf32, #tpu.memory_space<vmem>>, %arg3: memref<1x256xf32, #tpu.memory_space<vmem>>, %arg4: memref<1x256xf32, #tpu.memory_space<vmem>>, %arg5: memref<1x4x8x128xf32, #tpu.memory_space<vmem>>, %arg6: memref<1x4x8x128xi32, #tpu.memory_space<vmem>>) attributes {dimension_semantics = [#tpu.dimension_semantics<parallel>, #tpu.dimension_semantics<parallel>], iteration_bounds = array<i64: 2, 2>, scalar_prefetch = 0 : i64, scratch_operands = 0 : i64, tpu.core_type = #tpu.core_type<tc>, window_params = [{transform_indices = @transform_0, window_bounds = array<i64: 1, 8, 8, 256>}, {pipeline_mode = #tpu.pipeline_mode<synchronous>, transform_indices = @transform_1, window_bounds = array<i64: 1, 256>}, {pipeline_mode = #tpu.pipeline_mode<synchronous>, transform_indices = @transform_2, window_bounds = array<i64: 1, 256>}, {transform_indices = @transform_3, window_bounds = array<i64: 1, 4, 8, 128>}, {transform_indices = @transform_4, window_bounds = array<i64: 1, 4, 8, 128>}]} {
    %c0 = arith.constant 0 : index
    %c0_0 = arith.constant 0 : index
    %c0_1 = arith.constant 0 : index
    %c0_2 = arith.constant 0 : index
    %0 = vector.load %arg2[%c0, %c0_0, %c0_1, %c0_2] : memref<1x8x8x256xf32, #tpu.memory_space<vmem>>, vector<1x8x8x256xf32>
    %1 = vector.shape_cast %0 : vector<1x8x8x256xf32> to vector<8x8x256xf32>
    %c0_3 = arith.constant 0 : index
    %c0_4 = arith.constant 0 : index
    %2 = vector.load %arg3[%c0_3, %c0_4] : memref<1x256xf32, #tpu.memory_space<vmem>>, vector<1x256xf32>
    %3 = vector.shape_cast %2 : vector<1x256xf32> to vector<1x1x256xf32>
    %4 = vector.broadcast %3 : vector<1x1x256xf32> to vector<8x8x256xf32>
    %5 = arith.mulf %1, %4 : vector<8x8x256xf32>
    %c0_5 = arith.constant 0 : index
    %c0_6 = arith.constant 0 : index
    %6 = vector.load %arg4[%c0_5, %c0_6] : memref<1x256xf32, #tpu.memory_space<vmem>>, vector<1x256xf32>
    %7 = vector.shape_cast %6 : vector<1x256xf32> to vector<1x1x256xf32>
    %8 = vector.broadcast %7 : vector<1x1x256xf32> to vector<8x8x256xf32>
    %9 = arith.addf %5, %8 : vector<8x8x256xf32>
    %cst = arith.constant 0.000000e+00 : f32
    %10 = vector.broadcast %cst : f32 to vector<8x8x256xf32>
    %11 = arith.maximumf %9, %10 : vector<8x8x256xf32>
    %12 = vector.shape_cast %11 : vector<8x8x256xf32> to vector<4x2x8x256xf32>
    %13 = vector.extract_strided_slice %12 {offsets = [0, 0, 0, 0], sizes = [4, 1, 8, 256], strides = [1, 1, 1, 1]} : vector<4x2x8x256xf32> to vector<4x1x8x256xf32>
    %14 = vector.shape_cast %13 : vector<4x1x8x256xf32> to vector<4x8x256xf32>
    %15 = vector.extract_strided_slice %12 {offsets = [0, 1, 0, 0], sizes = [4, 1, 8, 256], strides = [1, 1, 1, 1]} : vector<4x2x8x256xf32> to vector<4x1x8x256xf32>
    %16 = vector.shape_cast %15 : vector<4x1x8x256xf32> to vector<4x8x256xf32>
    %17 = vector.extract_strided_slice %14 {offsets = [0, 0, 0], sizes = [4, 8, 128], strides = [1, 1, 1]} : vector<4x8x256xf32> to vector<4x8x128xf32>
    %18 = vector.extract_strided_slice %14 {offsets = [0, 0, 128], sizes = [4, 8, 128], strides = [1, 1, 1]} : vector<4x8x256xf32> to vector<4x8x128xf32>
    %19 = vector.extract_strided_slice %16 {offsets = [0, 0, 0], sizes = [4, 8, 128], strides = [1, 1, 1]} : vector<4x8x256xf32> to vector<4x8x128xf32>
    %20 = vector.extract_strided_slice %16 {offsets = [0, 0, 128], sizes = [4, 8, 128], strides = [1, 1, 1]} : vector<4x8x256xf32> to vector<4x8x128xf32>
    %c4_i32 = arith.constant 4 : i32
    %21 = arith.muli %arg1, %c4_i32 : i32
    %22 = tpu.iota {dimensions = array<i32: 0>} : vector<4x8x128xi32>
    %23 = vector.broadcast %21 : i32 to vector<4x8x128xi32>
    %24 = arith.addi %23, %22 : vector<4x8x128xi32>
    %c2_i32 = arith.constant 2 : i32
    %25 = vector.broadcast %c2_i32 : i32 to vector<4x8x128xi32>
    %26 = arith.muli %25, %24 : vector<4x8x128xi32>
    %27 = tpu.iota {dimensions = array<i32: 1>} : vector<4x8x128xi32>
    %c2_i32_7 = arith.constant 2 : i32
    %28 = vector.broadcast %c2_i32_7 : i32 to vector<4x8x128xi32>
    %29 = arith.muli %28, %27 : vector<4x8x128xi32>
    %c16_i32 = arith.constant 16 : i32
    %30 = vector.broadcast %c16_i32 : i32 to vector<4x8x128xi32>
    %31 = arith.muli %26, %30 : vector<4x8x128xi32>
    %32 = arith.addi %31, %29 : vector<4x8x128xi32>
    %c0_i32 = arith.constant 0 : i32
    %33 = vector.broadcast %c0_i32 : i32 to vector<4x8x128xi32>
    %34 = arith.addi %26, %33 : vector<4x8x128xi32>
    %c16_i32_8 = arith.constant 16 : i32
    %35 = vector.broadcast %c16_i32_8 : i32 to vector<4x8x128xi32>
    %36 = arith.muli %34, %35 : vector<4x8x128xi32>
    %c1_i32 = arith.constant 1 : i32
    %37 = vector.broadcast %c1_i32 : i32 to vector<4x8x128xi32>
    %38 = arith.addi %29, %37 : vector<4x8x128xi32>
    %39 = arith.addi %36, %38 : vector<4x8x128xi32>
    %40 = arith.cmpf ogt, %18, %17 : vector<4x8x128xf32>
    %41 = arith.select %40, %39, %32 : vector<4x8x128xi1>, vector<4x8x128xi32>
    %42 = arith.select %40, %18, %17 : vector<4x8x128xi1>, vector<4x8x128xf32>
    %c1_i32_9 = arith.constant 1 : i32
    %43 = vector.broadcast %c1_i32_9 : i32 to vector<4x8x128xi32>
    %44 = arith.addi %26, %43 : vector<4x8x128xi32>
    %c16_i32_10 = arith.constant 16 : i32
    %45 = vector.broadcast %c16_i32_10 : i32 to vector<4x8x128xi32>
    %46 = arith.muli %44, %45 : vector<4x8x128xi32>
    %c0_i32_11 = arith.constant 0 : i32
    %47 = vector.broadcast %c0_i32_11 : i32 to vector<4x8x128xi32>
    %48 = arith.addi %29, %47 : vector<4x8x128xi32>
    %49 = arith.addi %46, %48 : vector<4x8x128xi32>
    %50 = arith.cmpf ogt, %19, %42 : vector<4x8x128xf32>
    %51 = arith.select %50, %49, %41 : vector<4x8x128xi1>, vector<4x8x128xi32>
    %52 = arith.select %50, %19, %42 : vector<4x8x128xi1>, vector<4x8x128xf32>
    %c1_i32_12 = arith.constant 1 : i32
    %53 = vector.broadcast %c1_i32_12 : i32 to vector<4x8x128xi32>
    %54 = arith.addi %26, %53 : vector<4x8x128xi32>
    %c16_i32_13 = arith.constant 16 : i32
    %55 = vector.broadcast %c16_i32_13 : i32 to vector<4x8x128xi32>
    %56 = arith.muli %54, %55 : vector<4x8x128xi32>
    %c1_i32_14 = arith.constant 1 : i32
    %57 = vector.broadcast %c1_i32_14 : i32 to vector<4x8x128xi32>
    %58 = arith.addi %29, %57 : vector<4x8x128xi32>
    %59 = arith.addi %56, %58 : vector<4x8x128xi32>
    %60 = arith.cmpf ogt, %20, %52 : vector<4x8x128xf32>
    %61 = arith.select %60, %59, %51 : vector<4x8x128xi1>, vector<4x8x128xi32>
    %62 = arith.select %60, %20, %52 : vector<4x8x128xi1>, vector<4x8x128xf32>
    %c0_15 = arith.constant 0 : index
    %c0_16 = arith.constant 0 : index
    %c0_17 = arith.constant 0 : index
    %c0_18 = arith.constant 0 : index
    %63 = vector.load %arg5[%c0_15, %c0_16, %c0_17, %c0_18] : memref<1x4x8x128xf32, #tpu.memory_space<vmem>>, vector<1x4x8x128xf32>
    %64 = vector.shape_cast %63 : vector<1x4x8x128xf32> to vector<4x8x128xf32>
    %65 = vector.shape_cast %62 : vector<4x8x128xf32> to vector<1x4x8x128xf32>
    tpu.vector_store %arg5[%c0_15, %c0_16, %c0_17, %c0_18], %65 {strides = array<i32>} : memref<1x4x8x128xf32, #tpu.memory_space<vmem>>, vector<1x4x8x128xf32>,
    %c0_19 = arith.constant 0 : index
    %c0_20 = arith.constant 0 : index
    %c0_21 = arith.constant 0 : index
    %c0_22 = arith.constant 0 : index
    %66 = vector.load %arg6[%c0_19, %c0_20, %c0_21, %c0_22] : memref<1x4x8x128xi32, #tpu.memory_space<vmem>>, vector<1x4x8x128xi32>
    %67 = vector.shape_cast %66 : vector<1x4x8x128xi32> to vector<4x8x128xi32>
    %68 = vector.shape_cast %61 : vector<4x8x128xi32> to vector<1x4x8x128xi32>
    tpu.vector_store %arg6[%c0_19, %c0_20, %c0_21, %c0_22], %68 {strides = array<i32>} : memref<1x4x8x128xi32, #tpu.memory_space<vmem>>, vector<1x4x8x128xi32>,
    return
  }
  func.func @transform_0(%arg0: i32, %arg1: i32) -> (i32, i32, i32, i32) {
    %c0_i32 = arith.constant 0 : i32
    %c0_i32_0 = arith.constant 0 : i32
    %c0_i32_1 = arith.constant 0 : i32
    return %arg0, %arg1, %c0_i32, %c0_i32_0 : i32, i32, i32, i32
  }
  func.func @transform_1(%arg0: i32, %arg1: i32) -> (i32, i32) {
    %c0_i32 = arith.constant 0 : i32
    %c0_i32_0 = arith.constant 0 : i32
    %c0_i32_1 = arith.constant 0 : i32
    return %c0_i32, %c0_i32_0 : i32, i32
  }
  func.func @transform_2(%arg0: i32, %arg1: i32) -> (i32, i32) {
    %c0_i32 = arith.constant 0 : i32
    %c0_i32_0 = arith.constant 0 : i32
    %c0_i32_1 = arith.constant 0 : i32
    return %c0_i32, %c0_i32_0 : i32, i32
  }
  func.func @transform_3(%arg0: i32, %arg1: i32) -> (i32, i32, i32, i32) {
    %c0_i32 = arith.constant 0 : i32
    %c0_i32_0 = arith.constant 0 : i32
    %c0_i32_1 = arith.constant 0 : i32
    return %arg0, %arg1, %c0_i32, %c0_i32_0 : i32, i32, i32, i32
  }
  func.func @transform_4(%arg0: i32, %arg1: i32) -> (i32, i32, i32, i32) {
    %c0_i32 = arith.constant 0 : i32
    %c0_i32_0 = arith.constant 0 : i32
    %c0_i32_1 = arith.constant 0 : i32
    return %arg0, %arg1, %c0_i32, %c0_i32_0 : i32, i32, i32, i32
  }
}

</mosaic_0001>

<bundles_post_ra>
// kernel: encoder_block_forward.5
= control target key start
LH: loop header
LB: loop body
LE: loop exit
PB: predicated region body
PF: predicated region fallthrough
CT: control target
= control target key end

     0   :  { %s703_s15 = smov 0   ;;  %s705_s16 = smov 0   ;;  %s1007_s0 = inlined_call_operand.vmem [shape: f32[2,16,8,256], index: 0, kind: input, shape index: {}]   ;;  %s1008_s1 = inlined_call_operand.vmem [shape: f32[1,256], index: 1, kind: input, shape index: {}]   ;;  %s1009_s2 = inlined_call_operand.vmem [shape: f32[1,256], index: 2, kind: input, shape index: {}]   ;;  %s1010_s3 = inlined_call_operand.vmem [shape: f32[2,8,8,128], index: 3, kind: output, shape index: {0}]   ;;  %s1011_s4 = inlined_call_operand.vmem [shape: s32[2,8,8,128], index: 4, kind: output, shape index: {1}]  }
   0x1   :  { %s707_s17 = smov 0   ;;  %s709_s18 = smov 0  }
   0x2   :  { %s711_s19 = smov 0  }
   0x3 LB: > { %s24_s20 = sadd.s32 1, %s668_s17  ;;  %s27_s21 = sadd.s32 1, %s672_s18  ;;  %s676_s19 = sphi %s711_s19, %s15_s19   ;;  %s672_s18 = sphi %s709_s18, %s1039_s18   ;;  %s668_s17 = sphi %s707_s17, %s1038_s17   ;;  %s664_s16 = sphi %s705_s16, %s1037_s16   ;;  %s660_s15 = sphi %s703_s15, %s1036_s15  }
   0x4   : > { %p25_p0 = scmp.ge.s32.totalorder %s24_s20, 2  ;;  %p584_p1 = scmp.ge.s32.totalorder %s676_s19, 1 }
   0x5   : > { %p189_p2 = scmp.lt.s32.totalorder %s676_s19, 5 }
   0x6   : > { %s1041_s20 = smov (%p25_p0, %s24_s20), 0  ;;  %s1043_s21 = smov (!%p25_p0, %s27_s21), %s672_s18 }
   0x7   : > { %p190_p3 = pnand %p584_p1, %p189_p2  ;;  %p29_p4 = scmp.ge.s32.totalorder %s1043_s21, 2 }
   0x8   : > { %s585_s22 = sshll.u32 (!%p190_p3), %s660_s15, 3  ;;  %p234_p5 = scmp.lt.s32.totalorder (!%p190_p3), %s664_s16, 1  ;;  %v282_v0 = vlaneseq (!%p190_p3)  ;;  %v280_v1 = vld [vmem:[%s1008_s1] sm:$0x3] (!%p190_p3) }
   0x9   : > { %s1045_s21 = smov (%p29_p4, %s1043_s21), 0  ;;  %193 = sbr.rel (%p190_p3) target bundleno = 53 (0x35), region = 32 }
   0xa   : > { %p236_p6 = scmp.lt.s32.totalorder (!%p190_p3), %s585_s22, 15  ;;  %s733_s23 = sshll.u32 (!%p190_p3), %s660_s15, 2  ;;  %v283_v2 = vshrl.u32 (!%p190_p3), %v282_v0, 7  ;;  %v308_v4 = vld [vmem:[%s1009_s2] sm:$0x3] (!%p190_p3) }
   0xb   : > { %v353_v3 = vstv (!%p190_p3), %s733_s23  ;;  %p247_p7 = scmp.lt.s32.totalorder (!%p190_p3), %s733_s23, 7 }
   0xc   : > { %v357_v5 = vmul.u32 (!%p190_p3), 2, %v353_v3  ;;  %v354_v6 = vadd.s32 (!%p190_p3), 1, %v353_v3  ;;  %v744_v7 = vadd.s32 (!%p190_p3), 2, %v353_v3  ;;  %v284_v8 = vsub.s32 (!%p190_p3), 0, %v283_v2 }
   0xd   : > { %v288_v9 = vsub.s32 (!%p190_p3), 1, %v283_v2  ;;  %v747_v10 = vmul.u32 (!%p190_p3), 2, %v283_v2  ;;  %v749_v11 = vadd.s32 (!%p190_p3), 3, %v353_v3 }
   0xe   : > { %v364_v12 = vmul.u32 (!%p190_p3), 16, %v357_v5  ;;  %v389_v13 = vadd.s32 (!%p190_p3), 1, %v357_v5  ;;  %v358_v14 = vmul.u32 (!%p190_p3), 2, %v354_v6  ;;  %v752_v15 = vrot.slane (!%p190_p3), %v280_v1, %v284_v8 }
   0xf   : > { %v754_v16 = vrot.slane (!%p190_p3), %v280_v1, %v288_v9  ;;  %v756_v17 = vrot.slane (!%p190_p3), %v308_v4, %v284_v8  ;;  %v758_v18 = vrot.slane (!%p190_p3), %v308_v4, %v288_v9  ;;  %v761_v19 = vadd.s32 (!%p190_p3), 1, %v747_v10 }
  0x10   : > { %s1047_s16 = smov (!%p234_p5, %s664_s16), 1  ;;  %s1049_s22 = smov (!%p236_p6, %s585_s22), 15  ;;  %v393_v20 = vmul.u32 16, %v389_v13  ;;  %v365_v21 = vmul.u32 16, %v358_v14  ;;  %v769_v22 = vadd.s32 %v364_v12, %v747_v10  ;;  %v771_v23 = vadd.s32 1, %v358_v14 }
  0x11   : > { %s587_s28 = sshll.u32 %s1047_s16, 5  ;;  %s586_s29 = sshll.u32 %s1049_s22, 1  ;;  %v359_v24 = vmul.u32 2, %v744_v7  ;;  %v360_v25 = vmul.u32 2, %v749_v11  ;;  %v782_v29 = vadd.s32 %v761_v19, %v364_v12 }
  0x12   : > { %s240_s30 = sadd.s32 %s587_s28, %s586_s29  ;;  %s1051_s23 = smov (!%p247_p7, %s733_s23), 7  ;;  %v785_v30 = vadd.s32 %v393_v20, %v747_v10  ;;  %v788_v31 = vadd.s32 %v393_v20, %v761_v19  ;;  %v791_v32 = vadd.s32 %v365_v21, %v747_v10  ;;  %v801_v39 = vadd.s32 %v761_v19, %v365_v21 }
  0x13   : > { %s588_s5 = sshll.u32 %s240_s30, 3  ;;  %s590_s9 = sshll.u32 %s1047_s16, 3  ;;  %v394_v45 = vmul.u32 16, %v771_v23 }
  0x14   : > { %s766_s8 = scalar_lea.vmem %s1007_s0, %s588_s5  ;;  %s813_s10 = sadd.s32 %s590_s9, %s1051_s23 }
  0x15   : > { %v264_v26 = vld [vmem:[%s766_s8] sm:$0xff]  ;;  %v265_v27 = vld [vmem:[%s766_s8 + $0x8] sm:$0xff]  ;;  %v266_v28 = vld [vmem:[%s766_s8 + $0x10] sm:$0xff]  ;;  %s591_s11 = sshll.u32 %s813_s10, 3 }
  0x16   : > { %v267_v33 = vld [vmem:[%s766_s8 + $0x18] sm:$0xff]  ;;  %v292_v34 = vmul.f32 %v752_v15, %v264_v26  ;;  %v293_v35 = vmul.f32 %v754_v16, %v265_v27  ;;  %v294_v36 = vmul.f32 %v752_v15, %v266_v28  ;;  %v268_v37 = vld [vmem:[%s766_s8 + $0x20] sm:$0xff]  ;;  %v269_v38 = vld [vmem:[%s766_s8 + $0x28] sm:$0xff]  ;;  %s852_s14 = scalar_lea.vmem %s1010_s3, %s591_s11  ;;  %s896_s22 = scalar_lea.vmem %s1011_s4, %s591_s11 }
  0x17   : > { %v295_v40 = vmul.f32 %v754_v16, %v267_v33  ;;  %v270_v41 = vld [vmem:[%s766_s8 + $0x30] sm:$0xff]  ;;  %v271_v42 = vld [vmem:[%s766_s8 + $0x38] sm:$0xff]  ;;  %v296_v43 = vmul.f32 %v752_v15, %v268_v37  ;;  %v297_v44 = vmul.f32 %v754_v16, %v269_v38  ;;  %v272_v54 = vld [vmem:[%s766_s8 + $0x40] sm:$0xff] }
  0x18   : > { %v320_v46 = vadd.f32 %v756_v17, %v292_v34  ;;  %v321_v47 = vadd.f32 %v758_v18, %v293_v35  ;;  %v322_v48 = vadd.f32 %v756_v17, %v294_v36  ;;  %v298_v49 = vmul.f32 %v752_v15, %v270_v41  ;;  %v273_v55 = vld [vmem:[%s766_s8 + $0x48] sm:$0xff]  ;;  %v274_v60 = vld [vmem:[%s766_s8 + $0x50] sm:$0xff]  ;;  %v275_v1 = vld [vmem:[%s766_s8 + $0x58] sm:$0xff] }
  0x19   : > { %v323_v50 = vadd.f32 %v758_v18, %v295_v40  ;;  %v299_v51 = vmul.f32 %v754_v16, %v271_v42  ;;  %v324_v52 = vadd.f32 %v756_v17, %v296_v43  ;;  %v325_v53 = vadd.f32 %v758_v18, %v297_v44  ;;  %v276_v34 = vld [vmem:[%s766_s8 + $0x60] sm:$0xff]  ;;  %v277_v35 = vld [vmem:[%s766_s8 + $0x68] sm:$0xff]  ;;  %v278_v41 = vld [vmem:[%s766_s8 + $0x70] sm:$0xff] }
  0x1a   : > { %v336_v56 = vmax.f32 %v320_v46, 0.0  ;;  %v337_v57 = vmax.f32 %v321_v47, 0.0  ;;  %v338_v58 = vmax.f32 %v322_v48, 0.0  ;;  %v326_v59 = vadd.f32 %v756_v17, %v298_v49  ;;  %v279_v42 = vld [vmem:[%s766_s8 + $0x78] sm:$0xff] }
  0x1b   : > { %v339_v61 = vmax.f32 %v323_v50, 0.0  ;;  %v327_v62 = vadd.f32 %v758_v18, %v299_v51  ;;  %v340_v63 = vmax.f32 %v324_v52, 0.0  ;;  %v341_v0 = vmax.f32 %v325_v53, 0.0 }
  0x1c   : > { %vm826_vm0 = vcmp.gt.f32.partialorder %v337_v57, %v336_v56  ;;  %v342_v3 = vmax.f32 %v326_v59, 0.0  ;;  %v300_v4 = vmul.f32 %v752_v15, %v272_v54  ;;  %v301_v5 = vmul.f32 %v754_v16, %v273_v55 }
  0x1d   : > { %v385_v6 = vsel %vm826_vm0, %v337_v57, %v336_v56  ;;  %v343_v8 = vmax.f32 %v327_v62, 0.0  ;;  %vm834_vm1 = vcmp.gt.f32.partialorder %v341_v0, %v340_v63  ;;  %v302_v12 = vmul.f32 %v752_v15, %v274_v60 }
  0x1e   : > { %vm839_vm2 = vcmp.gt.f32.partialorder %v338_v58, %v385_v6  ;;  %v386_v14 = vsel %vm834_vm1, %v341_v0, %v340_v63  ;;  %v303_v20 = vmul.f32 %v754_v16, %v275_v1  ;;  %v328_v21 = vadd.f32 %v756_v17, %v300_v4 }
  0x1f   : > { %v409_v26 = vsel %vm839_vm2, %v338_v58, %v385_v6  ;;  %vm856_vm3 = vcmp.gt.f32.partialorder %v342_v3, %v386_v14  ;;  %v329_v28 = vadd.f32 %v758_v18, %v301_v5  ;;  %v330_v33 = vadd.f32 %v756_v17, %v302_v12 }
  0x20   : > { %vm864_vm4 = vcmp.gt.f32.partialorder %v339_v61, %v409_v26  ;;  %v410_v37 = vsel %vm856_vm3, %v342_v3, %v386_v14  ;;  %v331_v38 = vadd.f32 %v758_v18, %v303_v20  ;;  %v344_v40 = vmax.f32 %v328_v21, 0.0 }
  0x21   : > { %v425_v43 = vsel %vm864_vm4, %v339_v61, %v409_v26  ;;  %vm875_vm5 = vcmp.gt.f32.partialorder %v343_v8, %v410_v37  ;;  %v345_v46 = vmax.f32 %v329_v28, 0.0  ;;  %v346_v47 = vmax.f32 %v330_v33, 0.0 }
  0x22   : > { %429 = vst [vmem:[%s852_s14] sm:$0xff] %v425_v43  ;;  %v426_v48 = vsel %vm875_vm5, %v343_v8, %v410_v37  ;;  %v347_v49 = vmax.f32 %v331_v38, 0.0  ;;  %v304_v50 = vmul.f32 %v752_v15, %v276_v34  ;;  %v305_v51 = vmul.f32 %v754_v16, %v277_v35 }
  0x23   : > { %430 = vst [vmem:[%s852_s14 + $0x8] sm:$0xff] %v426_v48  ;;  %vm885_vm6 = vcmp.gt.f32.partialorder %v345_v46, %v344_v40  ;;  %v306_v53 = vmul.f32 %v752_v15, %v278_v41  ;;  %v307_v54 = vmul.f32 %v754_v16, %v279_v42  ;;  %v381_v55 = vsel %vm826_vm0, %v782_v29, %v769_v22 }
  0x24   : > { %v387_v56 = vsel %vm885_vm6, %v345_v46, %v344_v40  ;;  %v332_v57 = vadd.f32 %v756_v17, %v304_v50  ;;  %v333_v15 = vadd.f32 %v758_v18, %v305_v51  ;;  %v405_v16 = vsel %vm839_vm2, %v785_v30, %v381_v55 }
  0x25   : > { %vm909_vm7 = vcmp.gt.f32.partialorder %v346_v47, %v387_v56  ;;  %v334_v59 = vadd.f32 %v756_v17, %v306_v53  ;;  %v335_v22 = vadd.f32 %v758_v18, %v307_v54  ;;  %v421_v29 = vsel %vm864_vm4, %v788_v31, %v405_v16 }
  0x26   : > { %v411_v60 = vsel %vm909_vm7, %v346_v47, %v387_v56  ;;  %v348_v61 = vmax.f32 %v332_v57, 0.0  ;;  %v349_v62 = vmax.f32 %v333_v15, 0.0  ;;  %433 = vst [vmem:[%s896_s22] sm:$0xff] %v421_v29  ;;  %v382_v30 = vsel %vm834_vm1, %v801_v39, %v791_v32 }
  0x27   : > { %vm925_vm8 = vcmp.gt.f32.partialorder %v347_v49, %v411_v60  ;;  %v350_v18 = vmax.f32 %v334_v59, 0.0  ;;  %v351_v63 = vmax.f32 %v335_v22, 0.0  ;;  %v398_v31 = vadd.s32 %v394_v45, %v747_v10 }
  0x28   : > { %v427_v0 = vsel %vm925_vm8, %v347_v49, %v411_v60  ;;  %vm934_vm9 = vcmp.gt.f32.partialorder %v349_v62, %v348_v61  ;;  %v414_v32 = vadd.s32 %v394_v45, %v761_v19  ;;  %v366_v39 = vmul.u32 16, %v359_v24 }
  0x29   : > { %431 = vst [vmem:[%s852_s14 + $0x10] sm:$0xff] %v427_v0  ;;  %v388_v2 = vsel %vm934_vm9, %v349_v62, %v348_v61  ;;  %v406_v3 = vsel %vm856_vm3, %v398_v31, %v382_v30  ;;  %v391_v4 = vadd.s32 1, %v359_v24  ;;  %v367_v5 = vmul.u32 16, %v360_v25 }
  0x2a   : > { %vm952_vm10 = vcmp.gt.f32.partialorder %v350_v18, %v388_v2  ;;  %v422_v45 = vsel %vm875_vm5, %v414_v32, %v406_v3  ;;  %v370_v6 = vadd.s32 %v366_v39, %v747_v10  ;;  %v375_v8 = vadd.s32 %v761_v19, %v366_v39 }
  0x2b   : > { %v412_v9 = vsel %vm952_vm10, %v350_v18, %v388_v2  ;;  %434 = vst [vmem:[%s896_s22 + $0x8] sm:$0xff] %v422_v45  ;;  %v395_v7 = vmul.u32 16, %v391_v4  ;;  %v371_v24 = vadd.s32 %v367_v5, %v747_v10  ;;  %v376_v12 = vadd.s32 %v761_v19, %v367_v5 }
  0x2c   : > { %vm965_vm11 = vcmp.gt.f32.partialorder %v351_v63, %v412_v9  ;;  %v383_v14 = vsel %vm885_vm6, %v375_v8, %v370_v6  ;;  %v392_v20 = vadd.s32 1, %v360_v25 }
  0x2d   : > { %v428_v21 = vsel %vm965_vm11, %v351_v63, %v412_v9  ;;  %v399_v26 = vadd.s32 %v395_v7, %v747_v10  ;;  %v415_v27 = vadd.s32 %v395_v7, %v761_v19  ;;  %v384_v34 = vsel %vm934_vm9, %v376_v12, %v371_v24 }
  0x2e   : > { %432 = vst [vmem:[%s852_s14 + $0x18] sm:$0xff] %v428_v21  ;;  %v396_v28 = vmul.u32 16, %v392_v20 }
  0x2f   : > { %v407_v33 = vsel %vm909_vm7, %v399_v26, %v383_v14 }
  0x30   : > { %v423_v35 = vsel %vm925_vm8, %v415_v27, %v407_v33  ;;  %v400_v11 = vadd.s32 %v396_v28, %v747_v10  ;;  %v416_v25 = vadd.s32 %v396_v28, %v761_v19 }
  0x31   : > { %435 = vst [vmem:[%s896_s22 + $0x10] sm:$0xff] %v423_v35 }
  0x32   : > { %v408_v36 = vsel %vm952_vm10, %v400_v11, %v384_v34 }
  0x33   : > { %v424_v37 = vsel %vm965_vm11, %v416_v25, %v408_v36 }
  0x34   : > { %436 = vst [vmem:[%s896_s22 + $0x18] sm:$0xff] %v424_v37 }
  0x35 PF: > { %s15_s19 = sadd.s32 1, %s676_s19   ;;  %s1036_s15 = smov %s668_s17 }
  0x36   : > { %p12_p8 = scmp.ge.s32.totalorder %s15_s19, 6   ;;  %s1037_s16 = smov %s672_s18 }
  0x37   : > { %s1038_s17 = smov %s1041_s20  ;;  %s1039_s18 = smov %s1045_s21 }
  0x38   :  { %14 = sbr.rel (!%p12_p8) target bundleno = 3 (0x3), region = 74 }

// kernel: encoder_block_forward.3
= control target key start
LH: loop header
LB: loop body
LE: loop exit
PB: predicated region body
PF: predicated region fallthrough
CT: control target
= control target key end

     0   :  { %s3012_s24 = smov 0   ;;  %s3014_s25 = smov 0   ;;  %s4192_s0 = inlined_call_operand.vmem [shape: f32[2,16,16,128], index: 0, kind: input, shape index: {}, may-alias: {0,1,2}]   ;;  %s4193_s1 = inlined_call_operand.vmem [shape: f32[2,16,16,128], index: 1, kind: input, shape index: {}, may-alias: {0,1,2}]   ;;  %s4194_s2 = inlined_call_operand.vmem [shape: f32[2,16,16,128], index: 2, kind: input, shape index: {}, may-alias: {0,1,2}]   ;;  %s4195_s3 = inlined_call_operand.vmem [shape: f32[1152,128], index: 3, kind: input, shape index: {}]   ;;  %s4196_s4 = inlined_call_operand.vmem [shape: f32[1,128], index: 4, kind: input, shape index: {}]   ;;  %s4197_s5 = inlined_call_operand.vmem [shape: f32[1,128], index: 5, kind: input, shape index: {}]   ;;  %s4198_s6 = inlined_call_operand.vmem [shape: f32[2,16,16,128], index: 6, kind: output, shape index: {0}]   ;;  %s4199_s7 = inlined_call_operand.vmem [shape: f32[2,2,2,128], index: 7, kind: output, shape index: {1}]  }
   0x1   :  { %s3016_s26 = smov 0   ;;  %s3018_s27 = smov 0  }
   0x2   :  { %s3020_s28 = smov 0  }
   0x3 LB: > { %s27_s4 = sadd.s32 1, %s2961_s26  ;;  %s30_s5 = sadd.s32 1, %s2965_s27  ;;  %s2969_s28 = sphi %s3020_s28, %s18_s28   ;;  %s2965_s27 = sphi %s3018_s27, %s4208_s27   ;;  %s2961_s26 = sphi %s3016_s26, %s4207_s26   ;;  %s2957_s25 = sphi %s3014_s25, %s4206_s25   ;;  %s2953_s24 = sphi %s3012_s24, %s4205_s24  }
   0x4   : > { %p28_p0 = scmp.ge.s32.totalorder %s27_s4, 2  ;;  %p2168_p1 = scmp.ge.s32.totalorder %s2969_s28, 1 }
   0x5   : > { %p328_p2 = scmp.lt.s32.totalorder %s2969_s28, 5 }
   0x6   : > { %s4210_s4 = smov (%p28_p0, %s27_s4), 0  ;;  %s4212_s5 = smov (!%p28_p0, %s30_s5), %s2965_s27 }
   0x7   : > { %p329_p3 = pnand %p2168_p1, %p328_p2  ;;  %p32_p4 = scmp.ge.s32.totalorder %s4212_s5, 2 }
   0x8   : > { %v1041_v0 = vld [vmem:[%s4195_s3 + $0x80] sm:$0xff] (!%p329_p3)  ;;  %v1042_v1 = vld [vmem:[%s4195_s3 + $0x88] sm:$0xff] (!%p329_p3)  ;;  %s3056_s12 = sshll.u32 (!%p329_p3), %s2953_s24, 3  ;;  %p405_p5 = scmp.lt.s32.totalorder (!%p329_p3), %s2957_s25, 1  ;;  %v544_v3 = vlaneseq (!%p329_p3)  ;;  %v1043_v12 = vld [vmem:[%s4195_s3 + $0x90] sm:$0xff] (!%p329_p3)  ;;  %vm566_vm2 = vcmask (!%p329_p3), 1040384  }
   0x9   : > { %s4214_s5 = smov (%p32_p4, %s4212_s5), 0  ;;  %332 = sbr.rel (%p329_p3) target bundleno = 435 (0x1b3), region = 44 }
   0xa   : > { %v1073_v2 = vld [vmem:[%s4195_s3 + $0x180] sm:$0xff] (!%p329_p3)  ;;  %v2712_v4 = vpack.c.bf16 (!%p329_p3), %v1042_v1, %v1041_v0  ;;  %v1074_v5 = vld [vmem:[%s4195_s3 + $0x188] sm:$0xff] (!%p329_p3)  ;;  %p407_p6 = scmp.lt.s32.totalorder (!%p329_p3), %s3056_s12, 15  ;;  %s3070_s19 = sadd.s32 (!%p329_p3), 4294967295, %s3056_s12  ;;  %v3084_v13 = vshrl.u32 (!%p329_p3), %v544_v3, 7  ;;  %v1044_v15 = vld [vmem:[%s4195_s3 + $0x98] sm:$0xff] (!%p329_p3) }
   0xb   : > { %v1025_v6 = vld [vmem:[%s4195_s3] sm:$0xff] (!%p329_p3)  ;;  %v1026_v7 = vld [vmem:[%s4195_s3 + $0x8] sm:$0xff] (!%p329_p3)  ;;  %v2744_v8 = vpack.c.bf16 (!%p329_p3), %v1074_v5, %v1073_v2  ;;  %v1075_v16 = vld [vmem:[%s4195_s3 + $0x190] sm:$0xff] (!%p329_p3)  ;;  %v2716_v18 = vpack.c.bf16 (!%p329_p3), %v1044_v15, %v1043_v12  ;;  %p417_p7 = scmp.gt.s32.totalorder (!%p329_p3), %s3070_s19, 0  ;;  %p2175_p8 = scmp.lt.s32.totalorder (!%p329_p3), %s3070_s19, 15  ;;  %vm667_vm4 = vcmask (!%p329_p3), 1046528  }
   0xc   : > { %v2714_v9 = vpack.c.bf16 (!%p329_p3), %v1026_v7, %v1025_v6  ;;  %v1057_v10 = vld [vmem:[%s4195_s3 + $0x100] sm:$0xff] (!%p329_p3)  ;;  %v1058_v11 = vld [vmem:[%s4195_s3 + $0x108] sm:$0xff] (!%p329_p3)  ;;  %2713 = vmatprep.subr.bf16.mxu0 (!%p329_p3), %v2712_v4  ;;  %v1076_v17 = vld [vmem:[%s4195_s3 + $0x198] sm:$0xff] (!%p329_p3)  ;;  %v3132_v32 = vadd.s32 (!%p329_p3), 8, %v3084_v13  ;;  %p488_p9 = scmp.eq.s32.totalorder (!%p329_p3), %s2953_s24, 0  ;;  %vm2888_vm3 = vcmp.ne.s32.totalorder (!%p329_p3), %v3084_v13, 0 }
   0xd   : > { %v2746_v14 = vpack.c.bf16 (!%p329_p3), %v1058_v11, %v1057_v10  ;;  %2745 = vmatprep.subr.bf16.mxu1 (!%p329_p3), %v2744_v8  ;;  %v2748_v19 = vpack.c.bf16 (!%p329_p3), %v1076_v17, %v1075_v16  ;;  %v1027_v20 = vld [vmem:[%s4195_s3 + $0x10] sm:$0xff] (!%p329_p3)  ;;  %v1028_v21 = vld [vmem:[%s4195_s3 + $0x18] sm:$0xff] (!%p329_p3)  ;;  %v1045_v25 = vld [vmem:[%s4195_s3 + $0xa0] sm:$0xff] (!%p329_p3)  ;;  %p494_p11 = scmp.eq.s32.totalorder (!%p329_p3), %s2953_s24, 1  ;;  %p462_p12 = scmp.lt.s32.totalorder (!%p329_p3), %s2953_s24, 1 }
   0xe   : > { %2715 = vmatpush3.bf16.msra.mxu0 (!%p329_p3), %v2714_v9  ;;  %v1059_v22 = vld [vmem:[%s4195_s3 + $0x110] sm:$0xff] (!%p329_p3)  ;;  %v2718_v23 = vpack.c.bf16 (!%p329_p3), %v1028_v21, %v1027_v20  ;;  %v1060_v24 = vld [vmem:[%s4195_s3 + $0x118] sm:$0xff] (!%p329_p3)  ;;  %v1046_v26 = vld [vmem:[%s4195_s3 + $0xa8] sm:$0xff] (!%p329_p3)  ;;  %vm2889_vm5 = vcmp.ne.s32.totalorder (!%p329_p3), %v3132_v32, 15 }
   0xf   : > { %2747 = vmatpush3.bf16.msra.mxu1 (!%p329_p3), %v2746_v14  ;;  %2717 = vmatprep.subr.bf16.mxu0 (!%p329_p3), %v2716_v18  ;;  %v2750_v27 = vpack.c.bf16 (!%p329_p3), %v1060_v24, %v1059_v22  ;;  %v2720_v28 = vpack.c.bf16 (!%p329_p3), %v1046_v26, %v1045_v25  ;;  %v1077_v29 = vld [vmem:[%s4195_s3 + $0x1a0] sm:$0xff] (!%p329_p3)  ;;  %v1078_v30 = vld [vmem:[%s4195_s3 + $0x1a8] sm:$0xff] (!%p329_p3)  ;;  %v1047_v38 = vld [vmem:[%s4195_s3 + $0xb0] sm:$0xff] (!%p329_p3) }
  0x10   : > { %s4216_s25 = smov (!%p405_p5, %s2957_s25), 1  ;;  %2749 = vmatprep.subr.bf16.mxu1 %v2748_v19  ;;  %v1029_v31 = vld [vmem:[%s4195_s3 + $0x20] sm:$0xff]  ;;  %v2752_v33 = vpack.c.bf16 %v1078_v30, %v1077_v29  ;;  %v1030_v34 = vld [vmem:[%s4195_s3 + $0x28] sm:$0xff]  ;;  %v1048_v39 = vld [vmem:[%s4195_s3 + $0xb8] sm:$0xff]  ;;  %s4224_s24 = smov (!%p462_p12, %s2953_s24), 1 }
  0x11   : > { %s3098_s15 = scalar_select %p407_p6, %s3056_s12, 15  ;;  %v1061_v35 = vld [vmem:[%s4195_s3 + $0x120] sm:$0xff]  ;;  %v1062_v36 = vld [vmem:[%s4195_s3 + $0x128] sm:$0xff]  ;;  %v2722_v37 = vpack.c.bf16 %v1030_v34, %v1029_v31  ;;  %v1079_v40 = vld [vmem:[%s4195_s3 + $0x1b0] sm:$0xff]  ;;  %v2724_v42 = vpack.c.bf16 %v1048_v39, %v1047_v38 }
  0x12   : > { %s3129_s20 = sshll.u32 %s4216_s25, 5  ;;  %2719 = vmatpush3.bf16.msra.mxu0 %v2718_v23  ;;  %v2754_v41 = vpack.c.bf16 %v1062_v36, %v1061_v35  ;;  %v1080_v43 = vld [vmem:[%s4195_s3 + $0x1b8] sm:$0xff]  ;;  %v1031_v44 = vld [vmem:[%s4195_s3 + $0x30] sm:$0xff]  ;;  %v1049_v49 = vld [vmem:[%s4195_s3 + $0xc0] sm:$0xff] }
  0x13   : > { %s2170_s9 = sshll.u32 %s3098_s15, 1  ;;  %2751 = vmatpush3.bf16.msra.mxu1 %v2750_v27  ;;  %2721 = vmatprep.subr.bf16.mxu0 %v2720_v28  ;;  %v1032_v45 = vld [vmem:[%s4195_s3 + $0x38] sm:$0xff]  ;;  %v2756_v46 = vpack.c.bf16 %v1080_v43, %v1079_v40  ;;  %v1063_v47 = vld [vmem:[%s4195_s3 + $0x130] sm:$0xff]  ;;  %v1050_v50 = vld [vmem:[%s4195_s3 + $0xc8] sm:$0xff] }
  0x14   : > { %s418_s30 = scalar_select %p417_p7, %s3070_s19, 0  ;;  %2753 = vmatprep.subr.bf16.mxu1 %v2752_v33  ;;  %v1064_v48 = vld [vmem:[%s4195_s3 + $0x138] sm:$0xff]  ;;  %v1081_v51 = vld [vmem:[%s4195_s3 + $0x1c0] sm:$0xff]  ;;  %v1082_v52 = vld [vmem:[%s4195_s3 + $0x1c8] sm:$0xff]  ;;  %v2726_v53 = vpack.c.bf16 %v1032_v45, %v1031_v44  ;;  %v2728_v55 = vpack.c.bf16 %v1050_v50, %v1049_v49 }
  0x15   : > { %s3176_s17 = sadd.s32 %s3129_s20, %s2170_s9  ;;  %v2758_v54 = vpack.c.bf16 %v1064_v48, %v1063_v47  ;;  %v1033_v56 = vld [vmem:[%s4195_s3 + $0x40] sm:$0xff]  ;;  %v1034_v57 = vld [vmem:[%s4195_s3 + $0x48] sm:$0xff]  ;;  %v2760_v59 = vpack.c.bf16 %v1082_v52, %v1081_v51  ;;  %v1051_v61 = vld [vmem:[%s4195_s3 + $0xd0] sm:$0xff]  ;;  %s433_s19 = sadd.s32 8, %s3056_s12  ;;  %v2971_v51 = vmov 0.0  }
  0x16   : > { %s4218_s30 = smov (!%p2175_p8, %s418_s30), 15  ;;  %2723 = vmatpush3.bf16.msra.mxu0 %v2722_v37  ;;  %v1065_v58 = vld [vmem:[%s4195_s3 + $0x140] sm:$0xff]  ;;  %v1066_v60 = vld [vmem:[%s4195_s3 + $0x148] sm:$0xff]  ;;  %v1052_v62 = vld [vmem:[%s4195_s3 + $0xd8] sm:$0xff]  ;;  %s2172_s29 = sshll.u32 %s3176_s17, 3  ;;  %v2730_v1 = vpack.c.bf16 %v1034_v57, %v1033_v56  ;;  %v567_v52 = vrot.slane %v2971_v51, 7 }
  0x17   : > { %2755 = vmatpush3.bf16.msra.mxu1 %v2754_v41  ;;  %2725 = vmatprep.subr.bf16.mxu0 %v2724_v42  ;;  %s2180_s14 = sshll.u32 %s4218_s30, 1  ;;  %v1083_v63 = vld [vmem:[%s4195_s3 + $0x1d0] sm:$0xff]  ;;  %v1084_v0 = vld [vmem:[%s4195_s3 + $0x1d8] sm:$0xff]  ;;  %p3222_p10 = scmp.lt.s32.totalorder %s433_s19, 15  ;;  %v2762_v2 = vpack.c.bf16 %v1066_v60, %v1065_v58  ;;  %v2732_v3 = vpack.c.bf16 %v1052_v62, %v1051_v61  ;;  %v1053_v9 = vld [vmem:[%s4195_s3 + $0xe0] sm:$0xff] }
  0x18   : > { %2757 = vmatprep.subr.bf16.mxu1 %v2756_v46  ;;  %s425_s9 = sadd.s32 %s2180_s14, %s3129_s20  ;;  %v1035_v4 = vld [vmem:[%s4195_s3 + $0x50] sm:$0xff]  ;;  %v1036_v5 = vld [vmem:[%s4195_s3 + $0x58] sm:$0xff]  ;;  %v2764_v7 = vpack.c.bf16 %v1084_v0, %v1083_v63  ;;  %v1054_v10 = vld [vmem:[%s4195_s3 + $0xe8] sm:$0xff]  ;;  %s3262_s16 = scalar_lea.vmem %s4192_s0, %s2172_s29 }
  0x19   : > { %s2182_s13 = sshll.u32 %s425_s9, 3  ;;  %v1067_v6 = vld [vmem:[%s4195_s3 + $0x150] sm:$0xff]  ;;  %v1068_v8 = vld [vmem:[%s4195_s3 + $0x158] sm:$0xff]  ;;  %s4220_s19 = smov (!%p3222_p10, %s433_s19), 15  ;;  %v1085_v11 = vld [vmem:[%s4195_s3 + $0x1e0] sm:$0xff]  ;;  %v2734_v16 = vpack.c.bf16 %v1036_v5, %v1035_v4  ;;  %v2736_v22 = vpack.c.bf16 %v1054_v10, %v1053_v9 }
  0x1a   : > { %2727 = vmatpush3.bf16.msra.mxu0 %v2726_v53  ;;  %s3220_s18 = scalar_lea.vmem %s4193_s1, %s2182_s13  ;;  %v1086_v12 = vld [vmem:[%s4195_s3 + $0x1e8] sm:$0xff]  ;;  %v1037_v14 = vld [vmem:[%s4195_s3 + $0x60] sm:$0xff]  ;;  %s4222_s19 = smov (!%p3222_p10, %s4220_s19), 15  ;;  %v2766_v21 = vpack.c.bf16 %v1068_v8, %v1067_v6  ;;  %v1055_v23 = vld [vmem:[%s4195_s3 + $0xf0] sm:$0xff] }
  0x1b   : > { %2759 = vmatpush3.bf16.msra.mxu1 %v2758_v54  ;;  %2729 = vmatprep.subr.bf16.mxu0 %v2728_v55  ;;  %s489_s10 = scalar_select %p488_p9, 1, 0  ;;  %v1038_v17 = vld [vmem:[%s4195_s3 + $0x68] sm:$0xff]  ;;  %v1069_v18 = vld [vmem:[%s4195_s3 + $0x160] sm:$0xff]  ;;  %v1056_v24 = vld [vmem:[%s4195_s3 + $0xf8] sm:$0xff]  ;;  %v2768_v26 = vpack.c.bf16 %v1086_v12, %v1085_v11 }
  0x1c   : > { %2761 = vmatprep.subr.bf16.mxu1 %v2760_v59  ;;  %v1070_v19 = vld [vmem:[%s4195_s3 + $0x168] sm:$0xff]  ;;  %v468_v27 = vld [vmem:[%s3220_s18] sm:$0xff]  ;;  %s3299_s14 = sshll.u32 %s4222_s19, 1  ;;  %v1087_v30 = vld [vmem:[%s4195_s3 + $0x1f0] sm:$0xff]  ;;  %v2738_v34 = vpack.c.bf16 %v1038_v17, %v1037_v14  ;;  %v2740_v37 = vpack.c.bf16 %v1056_v24, %v1055_v23  ;;  %s2194_s17 = sshll.u32 %s4216_s25, 1 }
  0x1d   : > { %v490_v15 = vstv %s489_s10  ;;  %v3286_v25 = vld [vmem:[%s3220_s18 + $0x8] sm:$0xff]  ;;  %v3297_v29 = vld [vmem:[%s3262_s16] sm:$0xff]  ;;  %v1088_v31 = vld [vmem:[%s4195_s3 + $0x1f8] sm:$0xff]  ;;  %s442_s18 = sadd.s32 %s3299_s14, %s3129_s20  ;;  %v2770_v36 = vpack.c.bf16 %v1070_v19, %v1069_v18  ;;  %s4137_s10 = scalar_lea.vmem %s4198_s6, %s2172_s29 }
  0x1e   : > { %2731 = vmatpush3.bf16.msra.mxu0 %v2730_v1  ;;  %vm3273_vm0 = vcmp.eq.s32.totalorder %v490_v15, 1  ;;  %v572_v35 = vrot.slane %v3297_v29, 7  ;;  %v1039_v38 = vld [vmem:[%s4195_s3 + $0x70] sm:$0xff]  ;;  %v1040_v39 = vld [vmem:[%s4195_s3 + $0x78] sm:$0xff]  ;;  %v2772_v42 = vpack.c.bf16 %v1088_v31, %v1087_v30  ;;  %v1105_v45 = vld [vmem:[%s4195_s3 + $0x280] sm:$0xff]  ;;  %v671_v8 = vrot.slane %v3297_v29, 1  ;;  %s465_s29 = sadd.s32 %s2194_s17, %s4224_s24 }
  0x1f   : > { %2763 = vmatpush3.bf16.msra.mxu1 %v2762_v2  ;;  %2733 = vmatprep.subr.bf16.mxu0 %v2732_v3  ;;  %v3292_v28 = vsel %vm3273_vm0, 0.0, %v3286_v25  ;;  %vm2200_vm1 = vmneg %vm3273_vm0  ;;  %v1071_v40 = vld [vmem:[%s4195_s3 + $0x170] sm:$0xff]  ;;  %v492_v41 = vsel %vm3273_vm0, 0.0, %v468_v27  ;;  %v1072_v43 = vld [vmem:[%s4195_s3 + $0x178] sm:$0xff]  ;;  %v2742_v49 = vpack.c.bf16 %v1040_v39, %v1039_v38  ;;  %s3509_s13 = scalar_select %p494_p11, 1, 0 }
  0x20   : > { %2765 = vmatprep.subr.bf16.mxu1 %v2764_v7  ;;  %v570_v33 = vrot.slane %v3292_v28, 7  ;;  %2201 = vmatprep.mubr.msk.f32.mxu0 %vm2200_vm1, %v468_v27  ;;  %v1106_v46 = vld [vmem:[%s4195_s3 + $0x288] sm:$0xff]  ;;  %v1137_v48 = vld [vmem:[%s4195_s3 + $0x380] sm:$0xff]  ;;  %v568_v50 = vrot.slane %v492_v41, 7  ;;  %v2774_v54 = vpack.c.bf16 %v1072_v43, %v1071_v40  ;;  %v668_v55 = vrot.slane %v492_v41, 1  ;;  %v3362_v61 = vld [vmem:[%s3262_s16 + $0x10] sm:$0xff] }
  0x21   : > { %v3344_v47 = vld [vmem:[%s3262_s16 + $0x8] sm:$0xff]  ;;  %v669_v56 = vrot.slane %v3292_v28, 1  ;;  %v2776_v57 = vpack.c.bf16 %v1106_v46, %v1105_v45  ;;  %v1089_v58 = vld [vmem:[%s4195_s3 + $0x200] sm:$0xff]  ;;  %v1107_v62 = vld [vmem:[%s4195_s3 + $0x290] sm:$0xff]  ;;  %v576_v11 = vrot.slane %v3362_v61, 7  ;;  %v675_v46 = vrot.slane %v3362_v61, 1 }
  0x22   : > { %2735 = vmatpush3.bf16.msra.mxu0 %v2734_v16  ;;  %v3332_v44 = vsel %vm566_vm2, %v570_v33, %v572_v35  ;;  %v1138_v53 = vld [vmem:[%s4195_s3 + $0x388] sm:$0xff]  ;;  %v574_v60 = vrot.slane %v3344_v47, 7  ;;  %v1108_v0 = vld [vmem:[%s4195_s3 + $0x298] sm:$0xff]  ;;  %v1121_v1 = vld [vmem:[%s4195_s3 + $0x300] sm:$0xff]  ;;  %v569_v3 = vsel %vm566_vm2, %v567_v52, %v568_v50  ;;  %v571_v23 = vsel %vm566_vm2, %v568_v50, %v570_v33  ;;  %s2189_s23 = sshll.u32 %s442_s18, 3  ;;  %s2195_s20 = sshll.u32 %s465_s29, 1 }
  0x23   : > { %2767 = vmatpush3.bf16.msra.mxu1 %v2766_v21  ;;  %2737 = vmatprep.subr.bf16.mxu0 %v2736_v22  ;;  %v1090_v59 = vld [vmem:[%s4195_s3 + $0x208] sm:$0xff]  ;;  %v2808_v63 = vpack.c.bf16 %v1138_v53, %v1137_v48  ;;  %v1139_v5 = vld [vmem:[%s4195_s3 + $0x390] sm:$0xff]  ;;  %v1140_v6 = vld [vmem:[%s4195_s3 + $0x398] sm:$0xff]  ;;  %v670_v7 = vsel %vm667_vm4, %v668_v55, %v669_v56  ;;  %v2780_v12 = vpack.c.bf16 %v1108_v0, %v1107_v62  ;;  %v673_v28 = vrot.slane %v3344_v47, 1  ;;  %s3606_s18 = scalar_lea.vmem %s4194_s2, %s2189_s23 }
  0x24   : > { %2769 = vmatprep.subr.bf16.mxu1 %v2768_v26  ;;  %2221 = vmatprep.mubr.msk.f32.mxu1 %vm2888_vm3, %v3332_v44  ;;  %v1122_v2 = vld [vmem:[%s4195_s3 + $0x308] sm:$0xff]  ;;  %v2778_v4 = vpack.c.bf16 %v1090_v59, %v1089_v58  ;;  %v1091_v9 = vld [vmem:[%s4195_s3 + $0x210] sm:$0xff]  ;;  %v3389_v10 = vsel %vm566_vm2, %v572_v35, %v574_v60  ;;  %v1092_v14 = vld [vmem:[%s4195_s3 + $0x218] sm:$0xff]  ;;  %v2812_v19 = vpack.c.bf16 %v1140_v6, %v1139_v5 }
  0x25   : > { %v3396_v15 = vld [vmem:[%s3262_s16 + $0x18] sm:$0xff]  ;;  %v1109_v16 = vld [vmem:[%s4195_s3 + $0x2a0] sm:$0xff]  ;;  %v2810_v17 = vpack.c.bf16 %v1122_v2, %v1121_v1  ;;  %v1110_v18 = vld [vmem:[%s4195_s3 + $0x2a8] sm:$0xff]  ;;  %v672_v27 = vsel %vm667_vm4, %v669_v56, %v671_v8  ;;  %v2782_v30 = vpack.c.bf16 %v1092_v14, %v1091_v9  ;;  %v3433_v33 = vsel %vm566_vm2, %v574_v60, %v576_v11 }
  0x26   : > { %2739 = vmatpush3.bf16.msra.mxu0 %v2738_v34  ;;  %v1123_v21 = vld [vmem:[%s4195_s3 + $0x310] sm:$0xff]  ;;  %v1124_v22 = vld [vmem:[%s4195_s3 + $0x318] sm:$0xff]  ;;  %v1141_v24 = vld [vmem:[%s4195_s3 + $0x3a0] sm:$0xff]  ;;  %v578_v34 = vrot.slane %v3396_v15, 7  ;;  %v2784_v20 = vpack.c.bf16 %v1110_v18, %v1109_v16  ;;  %v3468_v45 = vsel %vm667_vm4, %v671_v8, %v673_v28  ;;  %v3513_v0 = vsel %vm667_vm4, %v673_v28, %v675_v46 }
  0x27   : > { %2771 = vmatpush3.bf16.msra.mxu1 %v2770_v36  ;;  %2741 = vmatprep.subr.bf16.mxu0 %v2740_v37  ;;  %v1142_v26 = vld [vmem:[%s4195_s3 + $0x3a8] sm:$0xff]  ;;  %v3430_v31 = vld [vmem:[%s3262_s16 + $0x20] sm:$0xff]  ;;  %v1111_v36 = vld [vmem:[%s4195_s3 + $0x2b0] sm:$0xff]  ;;  %v2814_v37 = vpack.c.bf16 %v1124_v22, %v1123_v21  ;;  %v677_v1 = vrot.slane %v3396_v15, 1 }
  0x28   : > { %2773 = vmatprep.subr.bf16.mxu1 %v2772_v42  ;;  %v1094_v35 = vld [vmem:[%s4195_s3 + $0x228] sm:$0xff]  ;;  %v1112_v38 = vld [vmem:[%s4195_s3 + $0x2b8] sm:$0xff]  ;;  %v2816_v39 = vpack.c.bf16 %v1142_v26, %v1141_v24  ;;  %v1125_v40 = vld [vmem:[%s4195_s3 + $0x320] sm:$0xff]  ;;  %v3475_v50 = vsel %vm566_vm2, %v576_v11, %v578_v34  ;;  %v580_v52 = vrot.slane %v3430_v31, 7 }
  0x29   : > { %v1126_v41 = vld [vmem:[%s4195_s3 + $0x328] sm:$0xff]  ;;  %v1143_v42 = vld [vmem:[%s4195_s3 + $0x3b0] sm:$0xff]  ;;  %v1144_v43 = vld [vmem:[%s4195_s3 + $0x3b8] sm:$0xff]  ;;  %v2788_v53 = vpack.c.bf16 %v1112_v38, %v1111_v36  ;;  %v3565_v24 = vsel %vm667_vm4, %v675_v46, %v677_v1 }
  0x2a   : > { %2743 = vmatpush3.bf16.msra.mxu0 %v2742_v49  ;;  %v3472_v49 = vld [vmem:[%s3262_s16 + $0x28] sm:$0xff]  ;;  %v1096_v55 = vld [vmem:[%s4195_s3 + $0x238] sm:$0xff]  ;;  %v1113_v56 = vld [vmem:[%s4195_s3 + $0x2c0] sm:$0xff]  ;;  %v2820_v59 = vpack.c.bf16 %v1144_v43, %v1143_v42  ;;  %v3523_v5 = vsel %vm566_vm2, %v578_v34, %v580_v52 }
  0x2b   : > { %2775 = vmatpush3.bf16.msra.mxu1 %v2774_v54  ;;  %2777 = vmatprep.subr.bf16.mxu0 %v2776_v57  ;;  %v1095_v54 = vld [vmem:[%s4195_s3 + $0x230] sm:$0xff]  ;;  %v2818_v57 = vpack.c.bf16 %v1126_v41, %v1125_v40  ;;  %v1114_v58 = vld [vmem:[%s4195_s3 + $0x2c8] sm:$0xff]  ;;  %v1128_v62 = vld [vmem:[%s4195_s3 + $0x338] sm:$0xff]  ;;  %v582_v6 = vrot.slane %v3472_v49, 7  ;;  %v681_v26 = vrot.slane %v3472_v49, 1 }
  0x2c   : > { %2809 = vmatprep.subr.bf16.mxu1 %v2808_v63  ;;  %v1127_v60 = vld [vmem:[%s4195_s3 + $0x330] sm:$0xff]  ;;  %v1146_v63 = vld [vmem:[%s4195_s3 + $0x3c8] sm:$0xff]  ;;  %v1097_v8 = vld [vmem:[%s4195_s3 + $0x240] sm:$0xff] }
  0x2d   : > { %2203 = vmatmul.mubr.msk.f32.vlgmr.msra.gmra.mrb[0].mxu0 %vm2888_vm3, %v569_v3  ;;  %v3517_v2 = vld [vmem:[%s3262_s16 + $0x30] sm:$0xff]  ;;  %v2790_v3 = vpack.c.bf16 %v1096_v55, %v1095_v54  ;;  %v1098_v9 = vld [vmem:[%s4195_s3 + $0x248] sm:$0xff]  ;;  %v1116_v14 = vld [vmem:[%s4195_s3 + $0x2d8] sm:$0xff] }
  0x2e   : > { %1379 = vmatmul.mubr.f32.vlgmr.msra.gmra.mrb[0].mxu1 %v670_v7  ;;  %2779 = vmatpush3.bf16.msra.mxu0 %v2778_v4  ;;  %v3520_v4 = vld [vmem:[%s3262_s16 + $0x38] sm:$0xff]  ;;  %v2792_v7 = vpack.c.bf16 %v1114_v58, %v1113_v56  ;;  %v1115_v11 = vld [vmem:[%s4195_s3 + $0x2d0] sm:$0xff]  ;;  %v1130_v18 = vld [vmem:[%s4195_s3 + $0x348] sm:$0xff]  ;;  %v2794_v28 = vpack.c.bf16 %v1098_v9, %v1097_v8 }
  0x2f   : > { %2205 = vmatprep.mubr.msk.f32.mxu0 %vm2200_vm1, %v3286_v25  ;;  %1383 = vmatprep.mubr.f32.mxu1 %v3389_v10  ;;  %v1093_v25 = vld [vmem:[%s4195_s3 + $0x220] sm:$0xff]  ;;  %v1147_v21 = vld [vmem:[%s4195_s3 + $0x3d0] sm:$0xff]  ;;  %v1148_v22 = vld [vmem:[%s4195_s3 + $0x3d8] sm:$0xff] }
  0x30   : > { %2781 = vmatprep.subr.bf16.mxu0 %v2780_v12  ;;  %2811 = vmatpush3.bf16.msra.mxu1 %v2810_v17  ;;  %v2786_v48 = vpack.c.bf16 %v1094_v35, %v1093_v25  ;;  %v2822_v12 = vpack.c.bf16 %v1128_v62, %v1127_v60  ;;  %v1129_v17 = vld [vmem:[%s4195_s3 + $0x340] sm:$0xff]  ;;  %v1100_v34 = vld [vmem:[%s4195_s3 + $0x258] sm:$0xff]  ;;  %v2796_v25 = vpack.c.bf16 %v1116_v14, %v1115_v11  ;;  %v1118_v36 = vld [vmem:[%s4195_s3 + $0x2e8] sm:$0xff]  ;;  %v683_v62 = vrot.slane %v3517_v2, 1 }
  0x31   : > { %1239 = vmatmul.mubr.f32.gmra.mrb[2].mxu0 %v571_v23  ;;  %2813 = vmatprep.subr.bf16.mxu1 %v2812_v19  ;;  %v584_v19 = vrot.slane %v3517_v2, 7  ;;  %v496_v23 = vstv %s3509_s13  ;;  %v1117_v35 = vld [vmem:[%s4195_s3 + $0x2e0] sm:$0xff]  ;;  %v2826_v38 = vpack.c.bf16 %v1130_v18, %v1129_v17  ;;  %v2828_v40 = vpack.c.bf16 %v1148_v22, %v1147_v21  ;;  %v1131_v41 = vld [vmem:[%s4195_s3 + $0x350] sm:$0xff]  ;;  %v1132_v42 = vld [vmem:[%s4195_s3 + $0x358] sm:$0xff]  ;;  %s467_s13 = scalar_lea.vmem %s4199_s7, %s2195_s20 }
  0x32   : > { %2223 = vmatmul.mubr.msk.f32.gmra.mrb[2].mxu1 %vm2889_vm5, %v672_v27  ;;  %1243 = vmatprep.mubr.f32.mxu0 %v3297_v29  ;;  %v586_v27 = vrot.slane %v3520_v4, 7  ;;  %vm3625_vm6 = vcmp.eq.s32.totalorder %v496_v23, 1  ;;  %v1120_v60 = vld [vmem:[%s4195_s3 + $0x2f8] sm:$0xff]  ;;  %v1151_v11 = vld [vmem:[%s4195_s3 + $0x3f0] sm:$0xff]  ;;  %v859_v17 = vrot.slane %v2971_v51, 1  ;;  %v3688_v22 = vld [vmem:[%s3262_s16 + $0x48] sm:$0xff] }
  0x33   : > { %2225 = vmatprep.mubr.msk.f32.mxu1 %vm2888_vm3, %v3433_v33  ;;  %2783 = vmatpush3.bf16.msra.mxu0 %v2782_v30  ;;  %v1099_v30 = vld [vmem:[%s4195_s3 + $0x250] sm:$0xff]  ;;  %v3614_v46 = vsel %vm566_vm2, %v582_v6, %v584_v19  ;;  %vm2282_vm7 = vmneg %vm3625_vm6 }
  0x34   : > { %2785 = vmatprep.subr.bf16.mxu0 %v2784_v20  ;;  %2815 = vmatpush3.bf16.msra.mxu1 %v2814_v37  ;;  %v3576_v20 = vsel %vm566_vm2, %v580_v52, %v582_v6  ;;  %v3587_v37 = vld [vmem:[%s4195_s3 + $0x260] sm:$0xff]  ;;  %v1150_v52 = vld [vmem:[%s4195_s3 + $0x3e8] sm:$0xff]  ;;  %v3638_v56 = vsel %vm566_vm2, %v584_v19, %v586_v27  ;;  %v2798_v58 = vpack.c.bf16 %v1100_v34, %v1099_v30 }
  0x35   : > { %2207 = vmatmul.mubr.msk.f32.gmra.mrb[4].mxu0 %vm2888_vm3, %v3332_v44  ;;  %2817 = vmatprep.subr.bf16.mxu1 %v2816_v39  ;;  %v1145_v44 = vld [vmem:[%s4195_s3 + $0x3c0] sm:$0xff]  ;;  %v3595_v39 = vld [vmem:[%s4195_s3 + $0x268] sm:$0xff] }
  0x36   : > { %1389 = vmatmul.mubr.f32.gmra.mrb[4].mxu1 %v3468_v45  ;;  %1248 = vmatprep.mubr.f32.mxu0 %v3344_v47  ;;  %v2824_v16 = vpack.c.bf16 %v1146_v63, %v1145_v44  ;;  %v2800_v44 = vpack.c.bf16 %v1118_v36, %v1117_v35  ;;  %v2802_v63 = vpack.c.bf16 %v3595_v39, %v3587_v37  ;;  %v1134_v6 = vld [vmem:[%s4195_s3 + $0x368] sm:$0xff]  ;;  %v1104_v35 = vld [vmem:[%s4195_s3 + $0x278] sm:$0xff]  ;;  %v1135_v37 = vld [vmem:[%s4195_s3 + $0x370] sm:$0xff] }
  0x37   : > { %1393 = vmatprep.mubr.f32.mxu1 %v3475_v50  ;;  %2787 = vmatpush3.bf16.msra.mxu0 %v2786_v48  ;;  %v1149_v48 = vld [vmem:[%s4195_s3 + $0x3e0] sm:$0xff] }
  0x38   : > { %2789 = vmatprep.subr.bf16.mxu0 %v2788_v53  ;;  %2819 = vmatpush3.bf16.msra.mxu1 %v2818_v57  ;;  %v3623_v53 = vld [vmem:[%s3262_s16 + $0x78] sm:$0xff]  ;;  %v3641_v57 = vld [vmem:[%s3262_s16 + $0x40] sm:$0xff]  ;;  %v2832_v8 = vpack.c.bf16 %v1150_v52, %v1149_v48 }
  0x39   : > { %1249 = vmatmul.mubr.f32.gmra.mrb[6].mxu0 %v3389_v10  ;;  %2821 = vmatprep.subr.bf16.mxu1 %v2820_v59  ;;  %v679_v10 = vrot.slane %v3430_v31, 1  ;;  %v1119_v59 = vld [vmem:[%s4195_s3 + $0x2f0] sm:$0xff]  ;;  %v752_v9 = vrot.slane %v3623_v53, 7  ;;  %v791_v18 = vrot.slane %v3623_v53, 1  ;;  %v588_v34 = vrot.slane %v3641_v57, 7 }
  0x3a   : > { %2227 = vmatmul.mubr.msk.f32.gmra.mrb[6].mxu1 %vm2889_vm5, %v3513_v0  ;;  %1253 = vmatprep.mubr.f32.mxu0 %v3362_v61  ;;  %v2804_v51 = vpack.c.bf16 %v1120_v60, %v1119_v59  ;;  %v3739_v59 = vsel %vm667_vm4, %v681_v26, %v683_v62  ;;  %v685_v60 = vrot.slane %v3520_v4, 1 }
  0x3b   : > { %2229 = vmatprep.mubr.msk.f32.mxu1 %vm2888_vm3, %v3523_v5  ;;  %2791 = vmatpush3.bf16.msra.mxu0 %v2790_v3  ;;  %v3611_v43 = vsel %vm667_vm4, %v677_v1, %v679_v10  ;;  %v3633_v55 = vsel %vm667_vm4, %v679_v10, %v681_v26  ;;  %v2830_v1 = vpack.c.bf16 %v1132_v42, %v1131_v41  ;;  %v1133_v3 = vld [vmem:[%s4195_s3 + $0x360] sm:$0xff]  ;;  %v1154_v42 = vld [vmem:[%s4195_s3 + $0x408] sm:$0xff]  ;;  %v3752_v26 = vld [vmem:[%s3262_s16 + $0x50] sm:$0xff] }
  0x3c   : > { %2793 = vmatprep.subr.bf16.mxu0 %v2792_v7  ;;  %2823 = vmatpush3.bf16.msra.mxu1 %v2822_v12  ;;  %v3659_v7 = vld [vmem:[%s3606_s18] sm:$0xff]  ;;  %v1152_v12 = vld [vmem:[%s4195_s3 + $0x3f8] sm:$0xff]  ;;  %v2834_v23 = vpack.c.bf16 %v1134_v6, %v1133_v3  ;;  %v590_v3 = vrot.slane %v3688_v22, 7 }
  0x3d   : > { %2209 = vmatmul.mubr.msk.f32.gmra.mrb[8].mxu0 %vm2888_vm3, %v3433_v33  ;;  %2825 = vmatprep.subr.bf16.mxu1 %v2824_v16  ;;  %v498_v14 = vsel %vm3625_vm6, 0.0, %v3659_v7  ;;  %v3673_v16 = vld [vmem:[%s3606_s18 + $0x8] sm:$0xff]  ;;  %v2836_v36 = vpack.c.bf16 %v1152_v12, %v1151_v11  ;;  %v1153_v41 = vld [vmem:[%s4195_s3 + $0x400] sm:$0xff]  ;;  %v592_v12 = vrot.slane %v3752_v26, 7 }
  0x3e   : > { %1399 = vmatmul.mubr.f32.gmra.mrb[8].mxu1 %v3565_v24  ;;  %1258 = vmatprep.mubr.f32.mxu0 %v3396_v15  ;;  %v793_v10 = vrot.slane %v498_v14, 1  ;;  %v816_v19 = vrot.slane %v498_v14, 7  ;;  %v499_v21 = vsel %vm3625_vm6, 0.0, %v3673_v16  ;;  %v3768_v11 = vsel %vm566_vm2, %v588_v34, %v590_v3  ;;  %v3776_v14 = vld [vmem:[%s3262_s16 + $0x58] sm:$0xff] }
  0x3f   : > { %1403 = vmatprep.mubr.f32.mxu1 %v3576_v20  ;;  %2795 = vmatpush3.bf16.msra.mxu0 %v2794_v28  ;;  %v818_v28 = vrot.slane %v499_v21, 7  ;;  %v857_v30 = vrot.slane %v499_v21, 1  ;;  %v3792_v21 = vld [vmem:[%s3262_s16 + $0x60] sm:$0xff] }
  0x40   : > { %2797 = vmatprep.subr.bf16.mxu0 %v2796_v25  ;;  %2827 = vmatpush3.bf16.msra.mxu1 %v2826_v38  ;;  %v1103_v25 = vld [vmem:[%s4195_s3 + $0x270] sm:$0xff]  ;;  %v3703_v38 = vsel %vm566_vm2, %v752_v9, %v816_v19  ;;  %v3708_v39 = vsel %vm667_vm4, %v791_v18, %v793_v10 }
  0x41   : > { %1259 = vmatmul.mubr.f32.gmra.mrb[10].mxu0 %v3475_v50  ;;  %2829 = vmatprep.subr.bf16.mxu1 %v2828_v40  ;;  %v1136_v40 = vld [vmem:[%s4195_s3 + $0x378] sm:$0xff]  ;;  %v3723_v48 = vsel %vm566_vm2, %v816_v19, %v818_v28  ;;  %v3726_v52 = vsel %vm667_vm4, %v793_v10, %v857_v30  ;;  %v3787_v10 = vsel %vm566_vm2, %v590_v3, %v592_v12  ;;  %v594_v19 = vrot.slane %v3776_v14, 7 }
  0x42   : > { %2231 = vmatmul.mubr.msk.f32.gmra.mrb[10].mxu1 %vm2889_vm5, %v3611_v43  ;;  %1263 = vmatprep.mubr.f32.mxu0 %v3430_v31  ;;  %v2838_v6 = vpack.c.bf16 %v1136_v40, %v1135_v37  ;;  %v3828_v40 = vld [vmem:[%s3262_s16 + $0x70] sm:$0xff] }
  0x43   : > { %2233 = vmatprep.mubr.msk.f32.mxu1 %vm2888_vm3, %v3614_v46  ;;  %2799 = vmatpush3.bf16.msra.mxu0 %v2798_v58  ;;  %v3729_v58 = vsel %vm667_vm4, %v857_v30, %v859_v17  ;;  %v689_v17 = vrot.slane %v3688_v22, 1  ;;  %v3806_v28 = vsel %vm566_vm2, %v592_v12, %v594_v19  ;;  %v596_v30 = vrot.slane %v3792_v21, 7 }
  0x44   : > { %2801 = vmatprep.subr.bf16.mxu0 %v2800_v44  ;;  %2831 = vmatpush3.bf16.msra.mxu1 %v2830_v1  ;;  %v2806_v44 = vpack.c.bf16 %v1104_v35, %v1103_v25  ;;  %v3745_v1 = vsel %vm566_vm2, %v586_v27, %v588_v34  ;;  %v3764_v27 = vsel %vm667_vm4, %v683_v62, %v685_v60  ;;  %v3813_v34 = vld [vmem:[%s3262_s16 + $0x68] sm:$0xff]  ;;  %v693_v35 = vrot.slane %v3776_v14, 1 }
  0x45   : > { %2211 = vmatmul.mubr.msk.f32.gmra.mrb[12].mxu0 %vm2888_vm3, %v3523_v5  ;;  %2833 = vmatprep.subr.bf16.mxu1 %v2832_v8  ;;  %v3748_v8 = vpack.c.bf16 %v1154_v42, %v1153_v41  ;;  %v598_v37 = vrot.slane %v3813_v34, 7  ;;  %v695_v42 = vrot.slane %v3792_v21, 1 }
  0x46   : > { %1409 = vmatmul.mubr.f32.gmra.mrb[12].mxu1 %v3633_v55  ;;  %1268 = vmatprep.mubr.f32.mxu0 %v3472_v49 }
  0x47   : > { %1413 = vmatprep.mubr.f32.mxu1 %v3638_v56  ;;  %2803 = vmatpush3.bf16.msra.mxu0 %v2802_v63  ;;  %v687_v63 = vrot.slane %v3641_v57, 1  ;;  %v3852_v3 = vsel %vm667_vm4, %v693_v35, %v695_v42 }
  0x48   : > { %2805 = vmatprep.subr.bf16.mxu0 %v2804_v51  ;;  %2835 = vmatpush3.bf16.msra.mxu1 %v2834_v23  ;;  %v691_v23 = vrot.slane %v3752_v26, 1 }
  0x49   : > { %1269 = vmatmul.mubr.f32.gmra.mrb[14].mxu0 %v3576_v20  ;;  %2837 = vmatprep.subr.bf16.mxu1 %v2836_v36  ;;  %v3783_v62 = vsel %vm667_vm4, %v685_v60, %v687_v63  ;;  %v3802_v51 = vsel %vm667_vm4, %v687_v63, %v689_v17  ;;  %v3823_v36 = vsel %vm566_vm2, %v594_v19, %v596_v30 }
  0x4a   : > { %2235 = vmatmul.mubr.msk.f32.gmra.mrb[14].mxu1 %vm2889_vm5, %v3739_v59  ;;  %1273 = vmatprep.mubr.f32.mxu0 %v3517_v2  ;;  %v3819_v25 = vsel %vm667_vm4, %v689_v17, %v691_v23  ;;  %v3838_v41 = vsel %vm667_vm4, %v691_v23, %v693_v35  ;;  %v3842_v60 = vsel %vm566_vm2, %v596_v30, %v598_v37  ;;  %v699_v17 = vrot.slane %v3828_v40, 1  ;;  %v1156_v30 = vld [vmem:[%s4195_s3 + $0x418] sm:$0xff] }
  0x4b   : > { %2237 = vmatprep.mubr.msk.f32.mxu1 %vm2888_vm3, %v3745_v1  ;;  %2807 = vmatpush3.bf16.msra.mxu0 %v2806_v44  ;;  %v750_v44 = vrot.slane %v3828_v40, 7 }
  0x4c   : > { %2839 = vmatpush3.bf16.msra.mxu1 %v2838_v6  ;;  %2841 = vmatprep.subr.bf16.mxu0 %v3748_v8  ;;  %v697_v6 = vrot.slane %v3813_v34, 1 }
  0x4d   : > { %2213 = vmatmul.mubr.msk.f32.gmra.mrb[16].mxu0 %vm2888_vm3, %v3614_v46  ;;  %2872 = vmatprep.subr.bf16.mxu1 %v3748_v8  ;;  %v3856_v63 = vsel %vm566_vm2, %v598_v37, %v750_v44  ;;  %v3873_v19 = vsel %vm566_vm2, %v750_v44, %v752_v9  ;;  %v1155_v9 = vld [vmem:[%s4195_s3 + $0x410] sm:$0xff]  ;;  %v1157_v37 = vld [vmem:[%s4195_s3 + $0x420] sm:$0xff] }
  0x4e   : > { %1419 = vmatmul.mubr.f32.gmra.mrb[16].mxu1 %v3764_v27  ;;  %1278 = vmatprep.mubr.f32.mxu0 %v3520_v4  ;;  %v3867_v12 = vsel %vm667_vm4, %v695_v42, %v697_v6  ;;  %v3884_v23 = vsel %vm667_vm4, %v697_v6, %v699_v17  ;;  %v2844_v35 = vpack.c.bf16 %v1156_v30, %v1155_v9  ;;  %v1158_v42 = vld [vmem:[%s4195_s3 + $0x428] sm:$0xff] }
  0x4f   : > { %1423 = vmatprep.mubr.f32.mxu1 %v3768_v11  ;;  %v1166_v6 = vld [vmem:[%s4195_s3 + $0x468] sm:$0xff] }
  0x51   : > { %1279 = vmatmul.mubr.f32.gmra.mrb[18].mxu0 %v3638_v56 }
  0x52   : > { %2239 = vmatmul.mubr.msk.f32.gmra.mrb[18].mxu1 %vm2889_vm5, %v3783_v62  ;;  %1283 = vmatprep.mubr.f32.mxu0 %v3641_v57 }
  0x53   : > { %2241 = vmatprep.mubr.msk.f32.mxu1 %vm2888_vm3, %v3787_v10 }
  0x55   : > { %2215 = vmatmul.mubr.msk.f32.gmra.mrb[20].mxu0 %vm2888_vm3, %v3745_v1 }
  0x56   : > { %1429 = vmatmul.mubr.f32.gmra.mrb[20].mxu1 %v3802_v51  ;;  %1288 = vmatprep.mubr.f32.mxu0 %v3688_v22 }
  0x57   : > { %1433 = vmatprep.mubr.f32.mxu1 %v3806_v28 }
  0x59   : > { %1289 = vmatmul.mubr.f32.gmra.mrb[22].mxu0 %v3768_v11 }
  0x5a   : > { %2243 = vmatmul.mubr.msk.f32.gmra.mrb[22].mxu1 %vm2889_vm5, %v3819_v25  ;;  %1293 = vmatprep.mubr.f32.mxu0 %v3752_v26 }
  0x5b   : > { %2245 = vmatprep.mubr.msk.f32.mxu1 %vm2888_vm3, %v3823_v36 }
  0x5d   : > { %2217 = vmatmul.mubr.msk.f32.gmra.mrb[24].mxu0 %vm2888_vm3, %v3787_v10 }
  0x5e   : > { %1439 = vmatmul.mubr.f32.gmra.mrb[24].mxu1 %v3838_v41  ;;  %1298 = vmatprep.mubr.f32.mxu0 %v3776_v14 }
  0x5f   : > { %1443 = vmatprep.mubr.f32.mxu1 %v3842_v60 }
  0x61   : > { %1299 = vmatmul.mubr.f32.gmra.mrb[26].mxu0 %v3806_v28 }
  0x62   : > { %2247 = vmatmul.mubr.msk.f32.gmra.mrb[26].mxu1 %vm2889_vm5, %v3852_v3  ;;  %1303 = vmatprep.mubr.f32.mxu0 %v3792_v21 }
  0x63   : > { %2249 = vmatprep.mubr.msk.f32.mxu1 %vm2888_vm3, %v3856_v63 }
  0x65   : > { %2219 = vmatmul.mubr.msk.f32.gmra.mrb[28].mxu0 %vm2888_vm3, %v3823_v36 }
  0x66   : > { %1449 = vmatmul.mubr.f32.gmra.mrb[28].mxu1 %v3867_v12  ;;  %1308 = vmatprep.mubr.f32.mxu0 %v3813_v34 }
  0x67   : > { %1453 = vmatprep.mubr.f32.mxu1 %v3873_v19 }
  0x69   : > { %1309 = vmatmul.mubr.f32.gmra.mrb[30].mxu0 %v3842_v60 }
  0x6a   : > { %2251 = vmatmul.mubr.msk.f32.gmra.mrb[30].mxu1 %vm2889_vm5, %v3884_v23  ;;  %1523 = vmatprep.mubr.f32.mxu0 %v3468_v45  ;;  %v1159_v45 = vld [vmem:[%s4195_s3 + $0x430] sm:$0xff] }
  0x6b   : > { %1668 = vmatprep.mubr.f32.mxu1 %v3362_v61 }
  0x6d   : > { %1524 = vmatmul.mubr.f32.vlgmr.msra.gmra.mrb[32].mxu0 %v3297_v29  ;;  %v2848_v29 = vpack.c.bf16 %v1158_v42, %v1157_v37 }
  0x6e   : > { %2269 = vmatmul.mubr.msk.f32.vlgmr.msra.gmra.mrb[32].mxu1 %vm2888_vm3, %v3433_v33  ;;  %2843 = vmatpush3.bf16.msra.mxu0 %v3748_v8  ;;  %v1160_v33 = vld [vmem:[%s4195_s3 + $0x438] sm:$0xff] }
  0x6f   : > { %2253 = vmatprep.mubr.msk.f32.mxu0 %vm2889_vm5, %v3513_v0  ;;  %1673 = vmatprep.mubr.f32.mxu1 %v3396_v15  ;;  %v2852_v0 = vpack.c.bf16 %v1160_v33, %v1159_v45 }
  0x70   : > { %2845 = vmatprep.subr.bf16.mxu0 %v2844_v35  ;;  %2880 = vmatpush3.bf16.msra.mxu1 %v3748_v8  ;;  %v1162_v8 = vld [vmem:[%s4195_s3 + $0x448] sm:$0xff] }
  0x71   : > { %1529 = vmatmul.mubr.f32.gmra.mrb[34].mxu0 %v3344_v47  ;;  %2873 = vmatprep.subr.bf16.mxu1 %v2844_v35  ;;  %v1161_v47 = vld [vmem:[%s4195_s3 + $0x440] sm:$0xff] }
  0x72   : > { %1674 = vmatmul.mubr.f32.gmra.mrb[34].mxu1 %v3475_v50  ;;  %1533 = vmatprep.mubr.f32.mxu0 %v3565_v24  ;;  %v1163_v50 = vld [vmem:[%s4195_s3 + $0x450] sm:$0xff] }
  0x73   : > { %1678 = vmatprep.mubr.f32.mxu1 %v3430_v31  ;;  %2847 = vmatpush3.bf16.msra.mxu0 %v2844_v35 }
  0x74   : > { %2849 = vmatprep.subr.bf16.mxu0 %v2848_v29  ;;  %2881 = vmatpush3.bf16.msra.mxu1 %v2844_v35 }
  0x75   : > { %1534 = vmatmul.mubr.f32.gmra.mrb[36].mxu0 %v3362_v61  ;;  %2874 = vmatprep.subr.bf16.mxu1 %v2848_v29  ;;  %v2856_v61 = vpack.c.bf16 %v1162_v8, %v1161_v47 }
  0x76   : > { %2271 = vmatmul.mubr.msk.f32.gmra.mrb[36].mxu1 %vm2888_vm3, %v3523_v5  ;;  %2255 = vmatprep.mubr.msk.f32.mxu0 %vm2889_vm5, %v3611_v43  ;;  %v1164_v5 = vld [vmem:[%s4195_s3 + $0x458] sm:$0xff] }
  0x77   : > { %1683 = vmatprep.mubr.f32.mxu1 %v3472_v49  ;;  %2851 = vmatpush3.bf16.msra.mxu0 %v2848_v29  ;;  %v2860_v44 = vpack.c.bf16 %v1164_v5, %v1163_v50 }
  0x78   : > { %2853 = vmatprep.subr.bf16.mxu0 %v2852_v0  ;;  %2882 = vmatpush3.bf16.msra.mxu1 %v2848_v29 }
  0x79   : > { %1539 = vmatmul.mubr.f32.gmra.mrb[38].mxu0 %v3396_v15  ;;  %2875 = vmatprep.subr.bf16.mxu1 %v2852_v0  ;;  %v1165_v15 = vld [vmem:[%s4195_s3 + $0x460] sm:$0xff] }
  0x7a   : > { %1684 = vmatmul.mubr.f32.gmra.mrb[38].mxu1 %v3576_v20  ;;  %1543 = vmatprep.mubr.f32.mxu0 %v3633_v55  ;;  %v1167_v20 = vld [vmem:[%s4195_s3 + $0x470] sm:$0xff] }
  0x7b   : > { %1688 = vmatprep.mubr.f32.mxu1 %v3517_v2  ;;  %2855 = vmatpush3.bf16.msra.mxu0 %v2852_v0 }
  0x7c   : > { %2857 = vmatprep.subr.bf16.mxu0 %v2856_v61  ;;  %2883 = vmatpush3.bf16.msra.mxu1 %v2852_v0 }
  0x7d   : > { %1544 = vmatmul.mubr.f32.gmra.mrb[40].mxu0 %v3430_v31  ;;  %2876 = vmatprep.subr.bf16.mxu1 %v2856_v61  ;;  %v2864_v31 = vpack.c.bf16 %v1166_v6, %v1165_v15 }
  0x7e   : > { %2273 = vmatmul.mubr.msk.f32.gmra.mrb[40].mxu1 %vm2888_vm3, %v3614_v46  ;;  %2257 = vmatprep.mubr.msk.f32.mxu0 %vm2889_vm5, %v3739_v59  ;;  %v1168_v46 = vld [vmem:[%s4195_s3 + $0x478] sm:$0xff] }
  0x7f   : > { %1693 = vmatprep.mubr.f32.mxu1 %v3520_v4  ;;  %2859 = vmatpush3.bf16.msra.mxu0 %v2856_v61  ;;  %v2868_v9 = vpack.c.bf16 %v1168_v46, %v1167_v20 }
  0x80   : > { %2861 = vmatprep.subr.bf16.mxu0 %v2860_v44  ;;  %2884 = vmatpush3.bf16.msra.mxu1 %v2856_v61 }
  0x81   : > { %1549 = vmatmul.mubr.f32.gmra.mrb[42].mxu0 %v3472_v49  ;;  %2877 = vmatprep.subr.bf16.mxu1 %v2860_v44  ;;  %v792_v49 = vsel %vm667_vm4, %v699_v17, %v791_v18 }
  0x82   : > { %1694 = vmatmul.mubr.f32.gmra.mrb[42].mxu1 %v3638_v56  ;;  %1553 = vmatprep.mubr.f32.mxu0 %v3764_v27 }
  0x83   : > { %1698 = vmatprep.mubr.f32.mxu1 %v3641_v57  ;;  %2863 = vmatpush3.bf16.msra.mxu0 %v2860_v44 }
  0x84   : > { %2865 = vmatprep.subr.bf16.mxu0 %v2864_v31  ;;  %2885 = vmatpush3.bf16.msra.mxu1 %v2860_v44 }
  0x85   : > { %1554 = vmatmul.mubr.f32.gmra.mrb[44].mxu0 %v3517_v2  ;;  %2878 = vmatprep.subr.bf16.mxu1 %v2864_v31 }
  0x86   : > { %2275 = vmatmul.mubr.msk.f32.gmra.mrb[44].mxu1 %vm2888_vm3, %v3745_v1  ;;  %2259 = vmatprep.mubr.msk.f32.mxu0 %vm2889_vm5, %v3783_v62 }
  0x87   : > { %1703 = vmatprep.mubr.f32.mxu1 %v3688_v22  ;;  %2867 = vmatpush3.bf16.msra.mxu0 %v2864_v31 }
  0x88   : > { %2869 = vmatprep.subr.bf16.mxu0 %v2868_v9  ;;  %2886 = vmatpush3.bf16.msra.mxu1 %v2864_v31 }
  0x89   : > { %1559 = vmatmul.mubr.f32.gmra.mrb[46].mxu0 %v3520_v4  ;;  %2879 = vmatprep.subr.bf16.mxu1 %v2868_v9 }
  0x8a   : > { %1704 = vmatmul.mubr.f32.gmra.mrb[46].mxu1 %v3768_v11  ;;  %1563 = vmatprep.mubr.f32.mxu0 %v3802_v51 }
  0x8b   : > { %1708 = vmatprep.mubr.f32.mxu1 %v3752_v26  ;;  %2871 = vmatpush3.bf16.msra.mxu0 %v2868_v9 }
  0x8c   : > { %2887 = vmatpush3.bf16.msra.mxu1 %v2868_v9 }
  0x8d   : > { %1564 = vmatmul.mubr.f32.gmra.mrb[48].mxu0 %v3641_v57 }
  0x8e   : > { %2277 = vmatmul.mubr.msk.f32.gmra.mrb[48].mxu1 %vm2888_vm3, %v3787_v10  ;;  %2261 = vmatprep.mubr.msk.f32.mxu0 %vm2889_vm5, %v3819_v25 }
  0x8f   : > { %1713 = vmatprep.mubr.f32.mxu1 %v3776_v14 }
  0x91   : > { %1569 = vmatmul.mubr.f32.gmra.mrb[50].mxu0 %v3688_v22 }
  0x92   : > { %1714 = vmatmul.mubr.f32.gmra.mrb[50].mxu1 %v3806_v28  ;;  %1573 = vmatprep.mubr.f32.mxu0 %v3838_v41 }
  0x93   : > { %1718 = vmatprep.mubr.f32.mxu1 %v3792_v21 }
  0x95   : > { %1574 = vmatmul.mubr.f32.gmra.mrb[52].mxu0 %v3752_v26 }
  0x96   : > { %2279 = vmatmul.mubr.msk.f32.gmra.mrb[52].mxu1 %vm2888_vm3, %v3823_v36  ;;  %2263 = vmatprep.mubr.msk.f32.mxu0 %vm2889_vm5, %v3852_v3 }
  0x97   : > { %1723 = vmatprep.mubr.f32.mxu1 %v3813_v34 }
  0x99   : > { %1579 = vmatmul.mubr.f32.gmra.mrb[54].mxu0 %v3776_v14 }
  0x9a   : > { %1724 = vmatmul.mubr.f32.gmra.mrb[54].mxu1 %v3842_v60  ;;  %1583 = vmatprep.mubr.f32.mxu0 %v3867_v12 }
  0x9b   : > { %1728 = vmatprep.mubr.f32.mxu1 %v3828_v40 }
  0x9d   : > { %1584 = vmatmul.mubr.f32.gmra.mrb[56].mxu0 %v3792_v21 }
  0x9e   : > { %2281 = vmatmul.mubr.msk.f32.gmra.mrb[56].mxu1 %vm2888_vm3, %v3856_v63  ;;  %2265 = vmatprep.mubr.msk.f32.mxu0 %vm2889_vm5, %v3884_v23 }
  0x9f   : > { %1733 = vmatprep.mubr.f32.mxu1 %v3623_v53 }
  0xa1   : > { %1589 = vmatmul.mubr.f32.gmra.mrb[58].mxu0 %v3813_v34 }
  0xa2   : > { %1734 = vmatmul.mubr.f32.gmra.mrb[58].mxu1 %v3873_v19  ;;  %1593 = vmatprep.mubr.f32.mxu0 %v792_v49 }
  0xa3   : > { %2283 = vmatprep.mubr.msk.f32.mxu1 %vm2282_vm7, %v3659_v7 }
  0xa5   : > { %1594 = vmatmul.mubr.f32.gmra.mrb[60].mxu0 %v3828_v40 }
  0xa6   : > { %2285 = vmatmul.mubr.msk.f32.gmra.mrb[60].mxu1 %vm2888_vm3, %v3703_v38  ;;  %2267 = vmatprep.mubr.msk.f32.mxu0 %vm2889_vm5, %v3708_v39 }
  0xa7   : > { %2287 = vmatprep.mubr.msk.f32.mxu1 %vm2282_vm7, %v3673_v16 }
  0xa9   : > { %1599 = vmatmul.mubr.f32.gmra.mrb[62].mxu0 %v3623_v53 }
  0xaa   : > { %1744 = vmatmul.mubr.f32.gmra.mrb[62].mxu1 %v3723_v48  ;;  %2688 = vmatprep.mubr.f32.mxu0 %v3565_v24 }
  0xab   : > { %2700 = vmatprep.mubr.f32.mxu1 %v3838_v41 }
  0xad   : > { %2689 = vmatmul.mubr.msk.f32.vlgmr.msra.gmra.mrb[64].mxu0 %vm2889_vm5, %v3611_v43 }
  0xae   : > { %2701 = vmatmul.mubr.msk.f32.vlgmr.msra.gmra.mrb[64].mxu1 %vm2889_vm5, %v3852_v3  ;;  %2691 = vmatprep.mubr.f32.mxu0 %v3633_v55 }
  0xaf   : > { %2703 = vmatprep.mubr.f32.mxu1 %v3867_v12 }
  0xb1   : > { %2692 = vmatmul.mubr.msk.f32.gmra.mrb[66].mxu0 %vm2889_vm5, %v3739_v59 }
  0xb2   : > { %2704 = vmatmul.mubr.msk.f32.gmra.mrb[66].mxu1 %vm2889_vm5, %v3884_v23  ;;  %2694 = vmatprep.mubr.f32.mxu0 %v3764_v27 }
  0xb3   : > { %2706 = vmatprep.mubr.f32.mxu1 %v792_v49 }
  0xb5   : > { %2695 = vmatmul.mubr.msk.f32.gmra.mrb[68].mxu0 %vm2889_vm5, %v3783_v62 }
  0xb6   : > { %2707 = vmatmul.mubr.msk.f32.gmra.mrb[68].mxu1 %vm2889_vm5, %v3708_v39  ;;  %2697 = vmatprep.mubr.f32.mxu0 %v3802_v51 }
  0xb7   : > { %2709 = vmatprep.mubr.f32.mxu1 %v3726_v52 }
  0xb9   : > { %2698 = vmatmul.mubr.msk.f32.gmra.mrb[70].mxu0 %vm2889_vm5, %v3819_v25 }
  0xba   : > { %2710 = vmatmul.mubr.msk.f32.gmra.mrb[70].mxu1 %vm2889_vm5, %v3729_v58 }
 0x100   : > { %v2336_v13 = vpop.f32.mrb[0].mxu0 }
 0x101   : > { %v2416_v2 = vpop.f32.mrb[0].mxu1  ;;  %v2337_v4 = vpop.f32.mrb[1].mxu0 }
 0x102   : > { %v2338_v24 = vadd.f32 %v2337_v4, %v2336_v13  ;;  %v2417_v43 = vpop.f32.mrb[1].mxu1 }
 0x103   : > { %v2418_v53 = vadd.f32 %v2417_v43, %v2416_v2 }
 0x104   : > { %v2339_v54 = vpop.f32.mrb[2].mxu0 }
 0x105   : > { %v4067_v55 = vadd.f32 %v2418_v53, %v2338_v24  ;;  %v2419_v56 = vpop.f32.mrb[2].mxu1  ;;  %v2340_v57 = vpop.f32.mrb[3].mxu0 }
 0x106   : > { %v2341_v7 = vadd.f32 %v2340_v57, %v2339_v54  ;;  %v2420_v16 = vpop.f32.mrb[3].mxu1 }
 0x107   : > { %v2421_v18 = vadd.f32 %v2420_v16, %v2419_v56 }
 0x108   : > { %v2342_v22 = vpop.f32.mrb[4].mxu0 }
 0x109   : > { %v4069_v38 = vadd.f32 %v2421_v18, %v2341_v7  ;;  %v2422_v39 = vpop.f32.mrb[4].mxu1  ;;  %v2343_v32 = vpop.f32.mrb[5].mxu0 }
 0x10a   : > { %v2344_v48 = vadd.f32 %v2343_v32, %v2342_v22  ;;  %v2423_v52 = vpop.f32.mrb[5].mxu1 }
 0x10b   : > { %v2424_v58 = vadd.f32 %v2423_v52, %v2422_v39 }
 0x10c   : > { %v2345_v59 = vpop.f32.mrb[6].mxu0 }
 0x10d   : > { %v4071_v1 = vadd.f32 %v2424_v58, %v2344_v48  ;;  %v2425_v26 = vpop.f32.mrb[6].mxu1  ;;  %v2346_v27 = vpop.f32.mrb[7].mxu0 }
 0x10e   : > { %v2347_v11 = vadd.f32 %v2346_v27, %v2345_v59  ;;  %v2426_v14 = vpop.f32.mrb[7].mxu1 }
 0x10f   : > { %v2427_v62 = vadd.f32 %v2426_v14, %v2425_v26 }
 0x110   : > { %v2348_v10 = vpop.f32.mrb[8].mxu0 }
 0x111   : > { %v4073_v21 = vadd.f32 %v2427_v62, %v2347_v11  ;;  %v2428_v51 = vpop.f32.mrb[8].mxu1  ;;  %v2349_v28 = vpop.f32.mrb[9].mxu0 }
 0x112   : > { %v2350_v34 = vadd.f32 %v2349_v28, %v2348_v10  ;;  %v2429_v25 = vpop.f32.mrb[9].mxu1 }
 0x113   : > { %v2430_v36 = vadd.f32 %v2429_v25, %v2428_v51 }
 0x114   : > { %v2351_v40 = vpop.f32.mrb[10].mxu0 }
 0x115   : > { %v4075_v41 = vadd.f32 %v2430_v36, %v2350_v34  ;;  %v2431_v60 = vpop.f32.mrb[10].mxu1  ;;  %v2352_v3 = vpop.f32.mrb[11].mxu0 }
 0x116   : > { %v2353_v63 = vadd.f32 %v2352_v3, %v2351_v40  ;;  %v2432_v12 = vpop.f32.mrb[11].mxu1 }
 0x117   : > { %v2433_v17 = vadd.f32 %v2432_v12, %v2431_v60 }
 0x118   : > { %v2354_v19 = vpop.f32.mrb[12].mxu0 }
 0x119   : > { %v4077_v23 = vadd.f32 %v2433_v17, %v2353_v63  ;;  %v2434_v30 = vpop.f32.mrb[12].mxu1  ;;  %v2355_v35 = vpop.f32.mrb[13].mxu0 }
 0x11a   : > { %v2356_v37 = vadd.f32 %v2355_v35, %v2354_v19  ;;  %v2435_v42 = vpop.f32.mrb[13].mxu1 }
 0x11b   : > { %v2436_v29 = vadd.f32 %v2435_v42, %v2434_v30 }
 0x11c   : > { %v2357_v45 = vpop.f32.mrb[14].mxu0 }
 0x11d   : > { %v4079_v33 = vadd.f32 %v2436_v29, %v2356_v37  ;;  %v2437_v0 = vpop.f32.mrb[14].mxu1  ;;  %v2358_v47 = vpop.f32.mrb[15].mxu0 }
 0x11e   : > { %v2359_v8 = vadd.f32 %v2358_v47, %v2357_v45  ;;  %v2438_v61 = vpop.f32.mrb[15].mxu1 }
 0x11f   : > { %v2439_v50 = vadd.f32 %v2438_v61, %v2437_v0 }
 0x120   : > { %v2360_v5 = vpop.f32.mrb[16].mxu0 }
 0x121   : > { %v4081_v44 = vadd.f32 %v2439_v50, %v2359_v8  ;;  %v2440_v15 = vpop.f32.mrb[16].mxu1  ;;  %v2361_v6 = vpop.f32.mrb[17].mxu0 }
 0x122   : > { %v2362_v31 = vadd.f32 %v2361_v6, %v2360_v5  ;;  %v2441_v20 = vpop.f32.mrb[17].mxu1 }
 0x123   : > { %v2442_v46 = vadd.f32 %v2441_v20, %v2440_v15 }
 0x124   : > { %v2363_v9 = vpop.f32.mrb[18].mxu0 }
 0x125   : > { %v4083_v49 = vadd.f32 %v2442_v46, %v2362_v31  ;;  %v2443_v13 = vpop.f32.mrb[18].mxu1  ;;  %v2364_v2 = vpop.f32.mrb[19].mxu0 }
 0x126   : > { %v2365_v4 = vadd.f32 %v2364_v2, %v2363_v9  ;;  %v2444_v24 = vpop.f32.mrb[19].mxu1 }
 0x127   : > { %v2445_v43 = vadd.f32 %v2444_v24, %v2443_v13 }
 0x128   : > { %v2366_v53 = vpop.f32.mrb[20].mxu0 }
 0x129   : > { %v4085_v54 = vadd.f32 %v2445_v43, %v2365_v4  ;;  %v2446_v56 = vpop.f32.mrb[20].mxu1  ;;  %v2367_v57 = vpop.f32.mrb[21].mxu0 }
 0x12a   : > { %v2368_v7 = vadd.f32 %v2367_v57, %v2366_v53  ;;  %v2447_v16 = vpop.f32.mrb[21].mxu1 }
 0x12b   : > { %v2448_v18 = vadd.f32 %v2447_v16, %v2446_v56 }
 0x12c   : > { %v2369_v22 = vpop.f32.mrb[22].mxu0 }
 0x12d   : > { %v4087_v39 = vadd.f32 %v2448_v18, %v2368_v7  ;;  %v2449_v32 = vpop.f32.mrb[22].mxu1  ;;  %v2370_v48 = vpop.f32.mrb[23].mxu0 }
 0x12e   : > { %v2371_v52 = vadd.f32 %v2370_v48, %v2369_v22  ;;  %v2450_v58 = vpop.f32.mrb[23].mxu1 }
 0x12f   : > { %v2451_v59 = vadd.f32 %v2450_v58, %v2449_v32 }
 0x130   : > { %v2372_v26 = vpop.f32.mrb[24].mxu0 }
 0x131   : > { %v4089_v27 = vadd.f32 %v2451_v59, %v2371_v52  ;;  %v2452_v11 = vpop.f32.mrb[24].mxu1  ;;  %v2373_v14 = vpop.f32.mrb[25].mxu0 }
 0x132   : > { %v2374_v62 = vadd.f32 %v2373_v14, %v2372_v26  ;;  %v2453_v10 = vpop.f32.mrb[25].mxu1 }
 0x133   : > { %v2454_v51 = vadd.f32 %v2453_v10, %v2452_v11 }
 0x134   : > { %v2375_v28 = vpop.f32.mrb[26].mxu0 }
 0x135   : > { %v4091_v34 = vadd.f32 %v2454_v51, %v2374_v62  ;;  %v2455_v25 = vpop.f32.mrb[26].mxu1  ;;  %v2376_v36 = vpop.f32.mrb[27].mxu0 }
 0x136   : > { %v2377_v40 = vadd.f32 %v2376_v36, %v2375_v28  ;;  %v2456_v60 = vpop.f32.mrb[27].mxu1 }
 0x137   : > { %v2457_v3 = vadd.f32 %v2456_v60, %v2455_v25 }
 0x138   : > { %v2378_v63 = vpop.f32.mrb[28].mxu0 }
 0x139   : > { %v4093_v12 = vadd.f32 %v2457_v3, %v2377_v40  ;;  %v2458_v17 = vpop.f32.mrb[28].mxu1  ;;  %v2379_v19 = vpop.f32.mrb[29].mxu0 }
 0x13a   : > { %v2380_v30 = vadd.f32 %v2379_v19, %v2378_v63  ;;  %v2459_v35 = vpop.f32.mrb[29].mxu1 }
 0x13b   : > { %v2460_v37 = vadd.f32 %v2459_v35, %v2458_v17 }
 0x13c   : > { %v2381_v42 = vpop.f32.mrb[30].mxu0 }
 0x13d   : > { %v4095_v29 = vadd.f32 %v2460_v37, %v2380_v30  ;;  %v2461_v45 = vpop.f32.mrb[30].mxu1  ;;  %v2382_v0 = vpop.f32.mrb[31].mxu0 }
 0x13e   : > { %v2383_v47 = vadd.f32 %v2382_v0, %v2381_v42  ;;  %v2462_v8 = vpop.f32.mrb[31].mxu1 }
 0x13f   : > { %v2463_v61 = vadd.f32 %v2462_v8, %v2461_v45 }
 0x140   : > { %v2496_v50 = vpop.f32.mrb[32].mxu0 }
 0x141   : > { %v4097_v5 = vadd.f32 %v2463_v61, %v2383_v47  ;;  %v2497_v15 = vpop.f32.mrb[33].mxu0  ;;  %v2576_v6 = vpop.f32.mrb[32].mxu1 }
 0x142   : > { %v2498_v31 = vadd.f32 %v2497_v15, %v2496_v50  ;;  %v2577_v20 = vpop.f32.mrb[33].mxu1 }
 0x143   : > { %v2578_v46 = vadd.f32 %v2577_v20, %v2576_v6 }
 0x144   : > { %v1526_v9 = vadd.f32 %v2498_v31, %v4067_v55  ;;  %v2499_v13 = vpop.f32.mrb[34].mxu0 }
 0x145   : > { %v2500_v2 = vpop.f32.mrb[35].mxu0  ;;  %v2579_v4 = vpop.f32.mrb[34].mxu1 }
 0x146   : > { %v2501_v24 = vadd.f32 %v2500_v2, %v2499_v13  ;;  %v2580_v43 = vpop.f32.mrb[35].mxu1  ;;  %v4100_v53 = vadd.f32 %v2578_v46, %v1526_v9 }
 0x147   : > { %v2581_v56 = vadd.f32 %v2580_v43, %v2579_v4 }
 0x148   : > { %v1531_v57 = vadd.f32 %v2501_v24, %v4069_v38  ;;  %v2502_v7 = vpop.f32.mrb[36].mxu0 }
 0x149   : > { %v2503_v16 = vpop.f32.mrb[37].mxu0  ;;  %v2582_v18 = vpop.f32.mrb[36].mxu1 }
 0x14a   : > { %v2504_v22 = vadd.f32 %v2503_v16, %v2502_v7  ;;  %v2583_v32 = vpop.f32.mrb[37].mxu1  ;;  %v4103_v48 = vadd.f32 %v2581_v56, %v1531_v57 }
 0x14b   : > { %v2584_v52 = vadd.f32 %v2583_v32, %v2582_v18 }
 0x14c   : > { %v1536_v55 = vadd.f32 %v2504_v22, %v4071_v1  ;;  %v2505_v58 = vpop.f32.mrb[38].mxu0 }
 0x14d   : > { %v2506_v59 = vpop.f32.mrb[39].mxu0  ;;  %v2585_v26 = vpop.f32.mrb[38].mxu1 }
 0x14e   : > { %v2507_v11 = vadd.f32 %v2506_v59, %v2505_v58  ;;  %v2586_v14 = vpop.f32.mrb[39].mxu1  ;;  %v4106_v62 = vadd.f32 %v2584_v52, %v1536_v55 }
 0x14f   : > { %v2587_v10 = vadd.f32 %v2586_v14, %v2585_v26 }
 0x150   : > { %v1541_v38 = vadd.f32 %v2507_v11, %v4073_v21  ;;  %v2508_v51 = vpop.f32.mrb[40].mxu0 }
 0x151   : > { %v2509_v28 = vpop.f32.mrb[41].mxu0  ;;  %v2588_v25 = vpop.f32.mrb[40].mxu1 }
 0x152   : > { %v2510_v36 = vadd.f32 %v2509_v28, %v2508_v51  ;;  %v2589_v40 = vpop.f32.mrb[41].mxu1  ;;  %v4109_v60 = vadd.f32 %v2587_v10, %v1541_v38 }
 0x153   : > { %v2590_v3 = vadd.f32 %v2589_v40, %v2588_v25 }
 0x154   : > { %v1546_v1 = vadd.f32 %v2510_v36, %v4075_v41  ;;  %v2511_v63 = vpop.f32.mrb[42].mxu0 }
 0x155   : > { %v2512_v17 = vpop.f32.mrb[43].mxu0  ;;  %v2591_v19 = vpop.f32.mrb[42].mxu1 }
 0x156   : > { %v2513_v30 = vadd.f32 %v2512_v17, %v2511_v63  ;;  %v2592_v35 = vpop.f32.mrb[43].mxu1  ;;  %v4112_v37 = vadd.f32 %v2590_v3, %v1546_v1 }
 0x157   : > { %v2593_v42 = vadd.f32 %v2592_v35, %v2591_v19 }
 0x158   : > { %v1551_v21 = vadd.f32 %v2513_v30, %v4077_v23  ;;  %v2514_v45 = vpop.f32.mrb[44].mxu0 }
 0x159   : > { %v2515_v0 = vpop.f32.mrb[45].mxu0  ;;  %v2594_v47 = vpop.f32.mrb[44].mxu1 }
 0x15a   : > { %v2516_v8 = vadd.f32 %v2515_v0, %v2514_v45  ;;  %v2595_v61 = vpop.f32.mrb[45].mxu1  ;;  %v4115_v50 = vadd.f32 %v2593_v42, %v1551_v21 }
 0x15b   : > { %v2596_v15 = vadd.f32 %v2595_v61, %v2594_v47 }
 0x15c   : > { %v1556_v41 = vadd.f32 %v2516_v8, %v4079_v33  ;;  %v2517_v6 = vpop.f32.mrb[46].mxu0 }
 0x15d   : > { %v2518_v31 = vpop.f32.mrb[47].mxu0  ;;  %v2597_v20 = vpop.f32.mrb[46].mxu1 }
 0x15e   : > { %v2519_v46 = vadd.f32 %v2518_v31, %v2517_v6  ;;  %v2598_v9 = vpop.f32.mrb[47].mxu1  ;;  %v4118_v13 = vadd.f32 %v2596_v15, %v1556_v41 }
 0x15f   : > { %v2599_v2 = vadd.f32 %v2598_v9, %v2597_v20 }
 0x160   : > { %v1561_v23 = vadd.f32 %v2519_v46, %v4081_v44  ;;  %v2520_v4 = vpop.f32.mrb[48].mxu0 }
 0x161   : > { %v2521_v24 = vpop.f32.mrb[49].mxu0  ;;  %v2600_v43 = vpop.f32.mrb[48].mxu1 }
 0x162   : > { %v2522_v56 = vadd.f32 %v2521_v24, %v2520_v4  ;;  %v2601_v57 = vpop.f32.mrb[49].mxu1  ;;  %v4121_v7 = vadd.f32 %v2599_v2, %v1561_v23 }
 0x163   : > { %v2602_v16 = vadd.f32 %v2601_v57, %v2600_v43 }
 0x164   : > { %v1566_v33 = vadd.f32 %v2522_v56, %v4083_v49  ;;  %v2523_v18 = vpop.f32.mrb[50].mxu0 }
 0x165   : > { %v2524_v22 = vpop.f32.mrb[51].mxu0  ;;  %v2603_v32 = vpop.f32.mrb[50].mxu1 }
 0x166   : > { %v2525_v52 = vadd.f32 %v2524_v22, %v2523_v18  ;;  %v2604_v55 = vpop.f32.mrb[51].mxu1  ;;  %v1711_v58 = vadd.f32 %v2602_v16, %v1566_v33 }
 0x167   : > { %v2605_v59 = vadd.f32 %v2604_v55, %v2603_v32 }
 0x168   : > { %v1571_v26 = vadd.f32 %v2525_v52, %v4085_v54  ;;  %v2526_v44 = vpop.f32.mrb[52].mxu0 }
 0x169   : > { %v2527_v11 = vpop.f32.mrb[53].mxu0  ;;  %v2606_v14 = vpop.f32.mrb[52].mxu1 }
 0x16a   : > { %v2528_v10 = vadd.f32 %v2527_v11, %v2526_v44  ;;  %v2607_v38 = vpop.f32.mrb[53].mxu1  ;;  %v1716_v51 = vadd.f32 %v2605_v59, %v1571_v26 }
 0x16b   : > { %v2608_v28 = vadd.f32 %v2607_v38, %v2606_v14 }
 0x16c   : > { %v1576_v25 = vadd.f32 %v2528_v10, %v4087_v39  ;;  %v2529_v36 = vpop.f32.mrb[54].mxu0 }
 0x16d   : > { %v2530_v49 = vpop.f32.mrb[55].mxu0  ;;  %v2609_v40 = vpop.f32.mrb[54].mxu1 }
 0x16e   : > { %v2531_v3 = vadd.f32 %v2530_v49, %v2529_v36  ;;  %v2610_v1 = vpop.f32.mrb[55].mxu1  ;;  %v1721_v63 = vadd.f32 %v2608_v28, %v1576_v25 }
 0x16f   : > { %v2611_v17 = vadd.f32 %v2610_v1, %v2609_v40 }
 0x170   : > { %v1581_v19 = vadd.f32 %v2531_v3, %v4089_v27  ;;  %v2532_v30 = vpop.f32.mrb[56].mxu0 }
 0x171   : > { %v2533_v54 = vpop.f32.mrb[57].mxu0  ;;  %v2612_v35 = vpop.f32.mrb[56].mxu1 }
 0x172   : > { %v2534_v42 = vadd.f32 %v2533_v54, %v2532_v30  ;;  %v2613_v21 = vpop.f32.mrb[57].mxu1  ;;  %v1726_v45 = vadd.f32 %v2611_v17, %v1581_v19 }
 0x173   : > { %v2614_v0 = vadd.f32 %v2613_v21, %v2612_v35 }
 0x174   : > { %v1586_v47 = vadd.f32 %v2534_v42, %v4091_v34  ;;  %v2535_v8 = vpop.f32.mrb[58].mxu0 }
 0x175   : > { %v2536_v39 = vpop.f32.mrb[59].mxu0  ;;  %v2615_v61 = vpop.f32.mrb[58].mxu1 }
 0x176   : > { %v2537_v15 = vadd.f32 %v2536_v39, %v2535_v8  ;;  %v2616_v41 = vpop.f32.mrb[59].mxu1  ;;  %v1731_v6 = vadd.f32 %v2614_v0, %v1586_v47 }
 0x177   : > { %v2617_v31 = vadd.f32 %v2616_v41, %v2615_v61 }
 0x178   : > { %v1591_v20 = vadd.f32 %v2537_v15, %v4093_v12  ;;  %v2538_v27 = vpop.f32.mrb[60].mxu0 }
 0x179   : > { %v2539_v46 = vpop.f32.mrb[61].mxu0  ;;  %v2618_v9 = vpop.f32.mrb[60].mxu1 }
 0x17a   : > { %v2540_v2 = vadd.f32 %v2539_v46, %v2538_v27  ;;  %v2619_v23 = vpop.f32.mrb[61].mxu1  ;;  %v1736_v4 = vadd.f32 %v2617_v31, %v1591_v20 }
 0x17b   : > { %v2620_v24 = vadd.f32 %v2619_v23, %v2618_v9 }
 0x17c   : > { %v1596_v43 = vadd.f32 %v2540_v2, %v4095_v29  ;;  %v2541_v34 = vpop.f32.mrb[62].mxu0 }
 0x17d   : > { %v2542_v56 = vpop.f32.mrb[63].mxu0  ;;  %v2621_v57 = vpop.f32.mrb[62].mxu1 }
 0x17e   : > { %v2543_v16 = vadd.f32 %v2542_v56, %v2541_v34  ;;  %v2622_v33 = vpop.f32.mrb[63].mxu1  ;;  %v4130_v18 = vadd.f32 %v2620_v24, %v1596_v43 }
 0x17f   : > { %v2623_v22 = vadd.f32 %v2622_v33, %v2621_v57 }
 0x180   : > { %v1601_v12 = vadd.f32 %v2543_v16, %v4097_v5  ;;  %v2690_v29 = vpop.f32.mrb[64].mxu0 }
 0x181   : > { %v1821_v32 = vadd.f32 %v2690_v29, %v4103_v48  ;;  %v2702_v52 = vpop.f32.mrb[64].mxu1  ;;  %v1815_v55 = vpop.f32.mrb[65].mxu0 }
 0x182   : > { %v4141_v59 = vadd.f32 %v2702_v52, %v1716_v51  ;;  %v1816_v26 = vadd.f32 %v1815_v55, %v4100_v53  ;;  %v1855_v44 = vpop.f32.mrb[65].mxu1  ;;  %v1746_v11 = vadd.f32 %v2623_v22, %v1601_v12 }
 0x183   : > { %1895 = vst [vmem:[%s4137_s10 + $0x8] sm:$0xff] %v1821_v32  ;;  %v1933_v14 = vmul.f32 %v1821_v32, %v1821_v32  ;;  %v1856_v10 = vadd.f32 %v1855_v44, %v1711_v58 }
 0x184   : > { %1903 = vst [vmem:[%s4137_s10 + $0x48] sm:$0xff] %v4141_v59  ;;  %1894 = vst [vmem:[%s4137_s10] sm:$0xff] %v1816_v26  ;;  %v1910_v5 = vadd.f32 %v1821_v32, %v1816_v26  ;;  %v1932_v38 = vmul.f32 %v1816_v26, %v1816_v26  ;;  %v2693_v48 = vpop.f32.mrb[66].mxu0 }
 0x185   : > { %1902 = vst [vmem:[%s4137_s10 + $0x40] sm:$0xff] %v1856_v10  ;;  %v1831_v51 = vadd.f32 %v2693_v48, %v4109_v60  ;;  %v2705_v28 = vpop.f32.mrb[66].mxu1  ;;  %v1825_v53 = vpop.f32.mrb[67].mxu0  ;;  %v1940_v43 = vmul.f32 %v1856_v10, %v1856_v10 }
 0x186   : > { %v1948_v25 = vadd.f32 %v1933_v14, %v1932_v38  ;;  %v1871_v36 = vadd.f32 %v2705_v28, %v1726_v45  ;;  %v1826_v49 = vadd.f32 %v1825_v53, %v4106_v62  ;;  %v1865_v40 = vpop.f32.mrb[67].mxu1 }
 0x187   : > { %1897 = vst [vmem:[%s4137_s10 + $0x18] sm:$0xff] %v1831_v51  ;;  %v1866_v58 = vadd.f32 %v1865_v40, %v1721_v63  ;;  %v1935_v19 = vmul.f32 %v1831_v51, %v1831_v51 }
 0x188   : > { %1905 = vst [vmem:[%s4137_s10 + $0x58] sm:$0xff] %v1871_v36  ;;  %1896 = vst [vmem:[%s4137_s10 + $0x10] sm:$0xff] %v1826_v49  ;;  %v1911_v3 = vadd.f32 %v1910_v5, %v1826_v49  ;;  %v1934_v1 = vmul.f32 %v1826_v49, %v1826_v49  ;;  %v2696_v17 = vpop.f32.mrb[68].mxu0  ;;  %v1943_v12 = vmul.f32 %v1871_v36, %v1871_v36 }
 0x189   : > { %1904 = vst [vmem:[%s4137_s10 + $0x50] sm:$0xff] %v1866_v58  ;;  %v1841_v60 = vadd.f32 %v2696_v17, %v4115_v50  ;;  %v2708_v30 = vpop.f32.mrb[68].mxu1  ;;  %v1835_v54 = vpop.f32.mrb[69].mxu0  ;;  %v1942_v33 = vmul.f32 %v1866_v58, %v1866_v58 }
 0x18a   : > { %v1949_v35 = vadd.f32 %v1948_v25, %v1934_v1  ;;  %v1881_v62 = vadd.f32 %v2708_v30, %v1736_v4  ;;  %v1836_v42 = vadd.f32 %v1835_v54, %v4112_v37  ;;  %v1912_v63 = vadd.f32 %v1911_v3, %v1831_v51  ;;  %v1875_v21 = vpop.f32.mrb[69].mxu1 }
 0x18b   : > { %1899 = vst [vmem:[%s4137_s10 + $0x28] sm:$0xff] %v1841_v60  ;;  %v1876_v45 = vadd.f32 %v1875_v21, %v1731_v6  ;;  %v1937_v39 = vmul.f32 %v1841_v60, %v1841_v60 }
 0x18c   : > { %1907 = vst [vmem:[%s4137_s10 + $0x68] sm:$0xff] %v1881_v62  ;;  %1898 = vst [vmem:[%s4137_s10 + $0x20] sm:$0xff] %v1836_v42  ;;  %v1913_v0 = vadd.f32 %v1912_v63, %v1836_v42  ;;  %v1936_v47 = vmul.f32 %v1836_v42, %v1836_v42  ;;  %v1950_v8 = vadd.f32 %v1949_v35, %v1935_v19  ;;  %v2699_v50 = vpop.f32.mrb[70].mxu0 }
 0x18d   : > { %1906 = vst [vmem:[%s4137_s10 + $0x60] sm:$0xff] %v1876_v45  ;;  %v1851_v61 = vadd.f32 %v2699_v50, %v4121_v7  ;;  %v2711_v15 = vpop.f32.mrb[70].mxu1  ;;  %v1845_v37 = vpop.f32.mrb[71].mxu0  ;;  %v1944_v52 = vmul.f32 %v1876_v45, %v1876_v45  ;;  %v1945_v44 = vmul.f32 %v1881_v62, %v1881_v62 }
 0x18e   : > { %v1951_v41 = vadd.f32 %v1950_v8, %v1936_v47  ;;  %v1891_v31 = vadd.f32 %v2711_v15, %v1746_v11  ;;  %v1846_v6 = vadd.f32 %v1845_v37, %v4118_v13  ;;  %v1914_v20 = vadd.f32 %v1913_v0, %v1841_v60  ;;  %v1885_v27 = vpop.f32.mrb[71].mxu1 }
 0x18f   : > { %1901 = vst [vmem:[%s4137_s10 + $0x38] sm:$0xff] %v1851_v61  ;;  %v1886_v46 = vadd.f32 %v1885_v27, %v4130_v18  ;;  %v1939_v4 = vmul.f32 %v1851_v61, %v1851_v61  ;;  %v1941_v13 = vmul.f32 %v4141_v59, %v4141_v59 }
 0x190   : > { %1909 = vst [vmem:[%s4137_s10 + $0x78] sm:$0xff] %v1891_v31  ;;  %1900 = vst [vmem:[%s4137_s10 + $0x30] sm:$0xff] %v1846_v6  ;;  %v1915_v9 = vadd.f32 %v1914_v20, %v1846_v6  ;;  %v1938_v2 = vmul.f32 %v1846_v6, %v1846_v6  ;;  %v1952_v23 = vadd.f32 %v1951_v41, %v1937_v39 }
 0x191   : > { %1908 = vst [vmem:[%s4137_s10 + $0x70] sm:$0xff] %v1886_v46  ;;  %v1946_v5 = vmul.f32 %v1886_v46, %v1886_v46 }
 0x192   : > { %v1916_v24 = vadd.f32 %v1915_v9, %v1851_v61  ;;  %v1953_v7 = vadd.f32 %v1952_v23, %v1938_v2 }
 0x194   : > { %v1917_v34 = vadd.f32 %v1916_v24, %v1856_v10  ;;  %v1954_v56 = vadd.f32 %v1953_v7, %v1939_v4 }
 0x196   : > { %v1918_v57 = vadd.f32 %v1917_v34, %v4141_v59  ;;  %v1955_v16 = vadd.f32 %v1954_v56, %v1940_v43  ;;  %v1947_v59 = vmul.f32 %v1891_v31, %v1891_v31 }
 0x198   : > { %v1956_v18 = vadd.f32 %v1955_v16, %v1941_v13  ;;  %v1919_v22 = vadd.f32 %v1918_v57, %v1866_v58 }
 0x19a   : > { %v1920_v29 = vadd.f32 %v1919_v22, %v1871_v36  ;;  %v1957_v32 = vadd.f32 %v1956_v18, %v1942_v33 }
 0x19c   : > { %v1921_v55 = vadd.f32 %v1920_v29, %v1876_v45  ;;  %v1958_v26 = vadd.f32 %v1957_v32, %v1943_v12 }
 0x19e   : > { %v1922_v11 = vadd.f32 %v1921_v55, %v1881_v62  ;;  %v1959_v14 = vadd.f32 %v1958_v26, %v1944_v52 }
 0x1a0   : > { %v1923_v10 = vadd.f32 %v1922_v11, %v1886_v46  ;;  %v1960_v38 = vadd.f32 %v1959_v14, %v1945_v44 }
 0x1a2   : > { %v1924_v48 = vadd.f32 %v1923_v10, %v1891_v31  ;;  %v1961_v51 = vadd.f32 %v1960_v38, %v1946_v5 }
 0x1a4   : > { %v1925_v28 = vrot.slane %v1924_v48, 4  ;;  %v1962_v53 = vadd.f32 %v1961_v51, %v1947_v59 }
 0x1a6   : > { %v1926_v25 = vadd.f32 %v1925_v28, %v1924_v48  ;;  %v1963_v36 = vrot.slane %v1962_v53, 4 }
 0x1a8   : > { %v1927_v49 = vrot.slane %v1926_v25, 2  ;;  %v1964_v40 = vadd.f32 %v1963_v36, %v1962_v53 }
 0x1aa   : > { %v1928_v58 = vadd.f32 %v1927_v49, %v1926_v25  ;;  %v1965_v3 = vrot.slane %v1964_v40, 2 }
 0x1ac   : > { %v1929_v1 = vrot.slane %v1928_v58, 1  ;;  %v1966_v17 = vadd.f32 %v1965_v3, %v1964_v40 }
 0x1ae   : > { %v1930_v19 = vadd.f32 %v1929_v1, %v1928_v58  ;;  %v1967_v60 = vrot.slane %v1966_v17, 1 }
 0x1b0   : > { %1931 = vst [vmem:[%s467_s13] sm:$0x1] %v1930_v19  ;;  %v1968_v30 = vadd.f32 %v1967_v60, %v1966_v17 }
 0x1b2   : > { %1969 = vst [vmem:[%s467_s13 + $0x1] sm:$0x1] %v1968_v30 }
 0x1b3 PF: > { %s18_s28 = sadd.s32 1, %s2969_s28   ;;  %s4205_s24 = smov %s2961_s26 }
 0x1b4   : > { %p15_p13 = scmp.ge.s32.totalorder %s18_s28, 6   ;;  %s4206_s25 = smov %s2965_s27 }
 0x1b5   : > { %s4207_s26 = smov %s4210_s4  ;;  %s4208_s27 = smov %s4214_s5 }
 0x1b6   :  { %17 = sbr.rel (!%p15_p13) target bundleno = 3 (0x3), region = 92 }

// kernel: encoder_block_forward.4
= control target key start
LH: loop header
LB: loop body
LE: loop exit
PB: predicated region body
PF: predicated region fallthrough
CT: control target
= control target key end

     0   :  { %s3088_s24 = smov 0   ;;  %s3090_s25 = smov 0   ;;  %s4308_s0 = inlined_call_operand.vmem [shape: f32[2,16,16,128], index: 0, kind: input, shape index: {}, may-alias: {0,1,2}]   ;;  %s4309_s1 = inlined_call_operand.vmem [shape: f32[2,16,16,128], index: 1, kind: input, shape index: {}, may-alias: {0,1,2}]   ;;  %s4310_s2 = inlined_call_operand.vmem [shape: f32[2,16,16,128], index: 2, kind: input, shape index: {}, may-alias: {0,1,2}]   ;;  %s4311_s3 = inlined_call_operand.vmem [shape: f32[1152,128], index: 3, kind: input, shape index: {}]   ;;  %s4312_s4 = inlined_call_operand.vmem [shape: f32[1,128], index: 4, kind: input, shape index: {}]   ;;  %s4313_s5 = inlined_call_operand.vmem [shape: f32[1,128], index: 5, kind: input, shape index: {}]   ;;  %s4314_s6 = inlined_call_operand.vmem [shape: f32[2,16,16,128], index: 6, kind: output, shape index: {0}]   ;;  %s4315_s7 = inlined_call_operand.vmem [shape: f32[2,2,2,128], index: 7, kind: output, shape index: {1}]  }
   0x1   :  { %s3092_s26 = smov 0   ;;  %s3094_s27 = smov 0  }
   0x2   :  { %s3096_s28 = smov 0  }
   0x3 LB: > { %s27_s29 = sadd.s32 1, %s3037_s26  ;;  %s30_s30 = sadd.s32 1, %s3041_s27  ;;  %s3045_s28 = sphi %s3096_s28, %s18_s28   ;;  %s3041_s27 = sphi %s3094_s27, %s4330_s27   ;;  %s3037_s26 = sphi %s3092_s26, %s4329_s26   ;;  %s3033_s25 = sphi %s3090_s25, %s4328_s25   ;;  %s3029_s24 = sphi %s3088_s24, %s4327_s24  }
   0x4   : > { %p28_p0 = scmp.ge.s32.totalorder %s27_s29, 2  ;;  %p2242_p1 = scmp.ge.s32.totalorder %s3045_s28, 1 }
   0x5   : > { %p328_p2 = scmp.lt.s32.totalorder %s3045_s28, 5 }
   0x6   : > { %s4332_s29 = smov (%p28_p0, %s27_s29), 0  ;;  %s4334_s30 = smov (!%p28_p0, %s30_s30), %s3041_s27 }
   0x7   : > { %p329_p3 = pnand %p2242_p1, %p328_p2  ;;  %p32_p4 = scmp.ge.s32.totalorder %s4334_s30, 2 }
   0x8   : > { %v1115_v0 = vld [vmem:[%s4311_s3 + $0x80] sm:$0xff] (!%p329_p3)  ;;  %v1116_v1 = vld [vmem:[%s4311_s3 + $0x88] sm:$0xff] (!%p329_p3)  ;;  %s3132_s14 = sshll.u32 (!%p329_p3), %s3029_s24, 3  ;;  %p405_p5 = scmp.lt.s32.totalorder (!%p329_p3), %s3033_s25, 1  ;;  %v618_v3 = vlaneseq (!%p329_p3)  ;;  %v1117_v12 = vld [vmem:[%s4311_s3 + $0x90] sm:$0xff] (!%p329_p3)  ;;  %vm640_vm0 = vcmask (!%p329_p3), 1040384  }
   0x9   : > { %s4336_s30 = smov (%p32_p4, %s4334_s30), 0  ;;  %332 = sbr.rel (%p329_p3) target bundleno = 435 (0x1b3), region = 44 }
   0xa   : > { %4316 = sst [smem:[#allocation4_spill]] %s4336_s30  ;;  %v1147_v2 = vld [vmem:[%s4311_s3 + $0x180] sm:$0xff] (!%p329_p3)  ;;  %v2788_v4 = vpack.c.bf16 (!%p329_p3), %v1116_v1, %v1115_v0  ;;  %v1148_v5 = vld [vmem:[%s4311_s3 + $0x188] sm:$0xff] (!%p329_p3)  ;;  %p407_p6 = scmp.lt.s32.totalorder (!%p329_p3), %s3132_s14, 15  ;;  %v3157_v13 = vshrl.u32 (!%p329_p3), %v618_v3, 7  ;;  %v1118_v15 = vld [vmem:[%s4311_s3 + $0x98] sm:$0xff] (!%p329_p3) }
   0xb   : > { %v1099_v6 = vld [vmem:[%s4311_s3] sm:$0xff] (!%p329_p3)  ;;  %v1100_v7 = vld [vmem:[%s4311_s3 + $0x8] sm:$0xff] (!%p329_p3)  ;;  %v2820_v8 = vpack.c.bf16 (!%p329_p3), %v1148_v5, %v1147_v2  ;;  %s3155_s11 = sadd.s32 (!%p329_p3), 4294967295, %s3132_s14  ;;  %v1149_v16 = vld [vmem:[%s4311_s3 + $0x190] sm:$0xff] (!%p329_p3)  ;;  %v2792_v18 = vpack.c.bf16 (!%p329_p3), %v1118_v15, %v1117_v12  ;;  %s433_s8 = sadd.s32 (!%p329_p3), 8, %s3132_s14  ;;  %vm741_vm1 = vcmask (!%p329_p3), 1046528  }
   0xc   : > { %v2790_v9 = vpack.c.bf16 (!%p329_p3), %v1100_v7, %v1099_v6  ;;  %v1131_v10 = vld [vmem:[%s4311_s3 + $0x100] sm:$0xff] (!%p329_p3)  ;;  %v1132_v11 = vld [vmem:[%s4311_s3 + $0x108] sm:$0xff] (!%p329_p3)  ;;  %2789 = vmatprep.subr.bf16.mxu0 (!%p329_p3), %v2788_v4  ;;  %v1150_v17 = vld [vmem:[%s4311_s3 + $0x198] sm:$0xff] (!%p329_p3)  ;;  %p417_p7 = scmp.gt.s32.totalorder (!%p329_p3), %s3155_s11, 0  ;;  %v3208_v32 = vadd.s32 (!%p329_p3), 8, %v3157_v13  ;;  %p2249_p8 = scmp.lt.s32.totalorder (!%p329_p3), %s3155_s11, 15 }
   0xd   : > { %v2822_v14 = vpack.c.bf16 (!%p329_p3), %v1132_v11, %v1131_v10  ;;  %2821 = vmatprep.subr.bf16.mxu1 (!%p329_p3), %v2820_v8  ;;  %v2824_v19 = vpack.c.bf16 (!%p329_p3), %v1150_v17, %v1149_v16  ;;  %v1101_v20 = vld [vmem:[%s4311_s3 + $0x10] sm:$0xff] (!%p329_p3)  ;;  %v1102_v21 = vld [vmem:[%s4311_s3 + $0x18] sm:$0xff] (!%p329_p3)  ;;  %v1119_v25 = vld [vmem:[%s4311_s3 + $0xa0] sm:$0xff] (!%p329_p3)  ;;  %p3220_p9 = scmp.lt.s32.totalorder (!%p329_p3), %s433_s8, 15  ;;  %p562_p10 = scmp.eq.s32.totalorder (!%p329_p3), %s3029_s24, 0  ;;  %vm2964_vm2 = vcmp.ne.s32.totalorder (!%p329_p3), %v3157_v13, 0 }
   0xe   : > { %2791 = vmatpush3.bf16.msra.mxu0 (!%p329_p3), %v2790_v9  ;;  %v1133_v22 = vld [vmem:[%s4311_s3 + $0x110] sm:$0xff] (!%p329_p3)  ;;  %v2794_v23 = vpack.c.bf16 (!%p329_p3), %v1102_v21, %v1101_v20  ;;  %v1134_v24 = vld [vmem:[%s4311_s3 + $0x118] sm:$0xff] (!%p329_p3)  ;;  %v1120_v26 = vld [vmem:[%s4311_s3 + $0xa8] sm:$0xff] (!%p329_p3)  ;;  %vm2965_vm5 = vcmp.ne.s32.totalorder (!%p329_p3), %v3208_v32, 15  ;;  %p568_p11 = scmp.eq.s32.totalorder (!%p329_p3), %s3029_s24, 1  ;;  %p462_p12 = scmp.lt.s32.totalorder (!%p329_p3), %s3029_s24, 1 }
   0xf   : > { %2823 = vmatpush3.bf16.msra.mxu1 (!%p329_p3), %v2822_v14  ;;  %2793 = vmatprep.subr.bf16.mxu0 (!%p329_p3), %v2792_v18  ;;  %v2826_v27 = vpack.c.bf16 (!%p329_p3), %v1134_v24, %v1133_v22  ;;  %v2796_v28 = vpack.c.bf16 (!%p329_p3), %v1120_v26, %v1119_v25  ;;  %v1151_v29 = vld [vmem:[%s4311_s3 + $0x1a0] sm:$0xff] (!%p329_p3)  ;;  %v1152_v30 = vld [vmem:[%s4311_s3 + $0x1a8] sm:$0xff] (!%p329_p3)  ;;  %v1121_v38 = vld [vmem:[%s4311_s3 + $0xb0] sm:$0xff] (!%p329_p3) }
  0x10   : > { %s4338_s25 = smov (!%p405_p5, %s3033_s25), 1  ;;  %2825 = vmatprep.subr.bf16.mxu1 %v2824_v19  ;;  %v1103_v31 = vld [vmem:[%s4311_s3 + $0x20] sm:$0xff]  ;;  %v2828_v33 = vpack.c.bf16 %v1152_v30, %v1151_v29  ;;  %v1104_v34 = vld [vmem:[%s4311_s3 + $0x28] sm:$0xff]  ;;  %v1122_v39 = vld [vmem:[%s4311_s3 + $0xb8] sm:$0xff]  ;;  %s4340_s8 = smov (!%p3220_p9, %s433_s8), 15  ;;  %v3047_v29 = vmov 0.0  }
  0x11   : > { %s3185_s9 = scalar_select %p407_p6, %s3132_s14, 15  ;;  %v1135_v35 = vld [vmem:[%s4311_s3 + $0x120] sm:$0xff]  ;;  %v1136_v36 = vld [vmem:[%s4311_s3 + $0x128] sm:$0xff]  ;;  %v2798_v37 = vpack.c.bf16 %v1104_v34, %v1103_v31  ;;  %v1153_v40 = vld [vmem:[%s4311_s3 + $0x1b0] sm:$0xff]  ;;  %v2800_v42 = vpack.c.bf16 %v1122_v39, %v1121_v38  ;;  %v3373_v30 = vrot.slane %v3047_v29, 7 }
  0x12   : > { %2795 = vmatpush3.bf16.msra.mxu0 %v2794_v23  ;;  %s3235_s12 = sshll.u32 %s4338_s25, 5  ;;  %v2830_v41 = vpack.c.bf16 %v1136_v36, %v1135_v35  ;;  %v1154_v43 = vld [vmem:[%s4311_s3 + $0x1b8] sm:$0xff]  ;;  %v1105_v44 = vld [vmem:[%s4311_s3 + $0x30] sm:$0xff]  ;;  %v1123_v49 = vld [vmem:[%s4311_s3 + $0xc0] sm:$0xff]  ;;  %s4344_s8 = smov (!%p3220_p9, %s4340_s8), 15 }
  0x13   : > { %2827 = vmatpush3.bf16.msra.mxu1 %v2826_v27  ;;  %2797 = vmatprep.subr.bf16.mxu0 %v2796_v28  ;;  %v1106_v45 = vld [vmem:[%s4311_s3 + $0x38] sm:$0xff]  ;;  %s418_s20 = scalar_select %p417_p7, %s3155_s11, 0  ;;  %v2832_v46 = vpack.c.bf16 %v1154_v43, %v1153_v40  ;;  %v1137_v47 = vld [vmem:[%s4311_s3 + $0x130] sm:$0xff]  ;;  %v1124_v50 = vld [vmem:[%s4311_s3 + $0xc8] sm:$0xff] }
  0x14   : > { %2829 = vmatprep.subr.bf16.mxu1 %v2828_v33  ;;  %v1138_v48 = vld [vmem:[%s4311_s3 + $0x138] sm:$0xff]  ;;  %v1155_v51 = vld [vmem:[%s4311_s3 + $0x1c0] sm:$0xff]  ;;  %v1156_v52 = vld [vmem:[%s4311_s3 + $0x1c8] sm:$0xff]  ;;  %v2802_v53 = vpack.c.bf16 %v1106_v45, %v1105_v44  ;;  %v2804_v55 = vpack.c.bf16 %v1124_v50, %v1123_v49  ;;  %s4318_s14 = sshll.u32 %s3185_s9, 1  ;;  %s3297_s9 = sshll.u32 %s4344_s8, 1 }
  0x15   : > { %s4342_s20 = smov (!%p2249_p8, %s418_s20), 15  ;;  %v2834_v54 = vpack.c.bf16 %v1138_v48, %v1137_v47  ;;  %v1107_v56 = vld [vmem:[%s4311_s3 + $0x40] sm:$0xff]  ;;  %v1108_v57 = vld [vmem:[%s4311_s3 + $0x48] sm:$0xff]  ;;  %s3285_s17 = sadd.s32 %s3235_s12, %s4318_s14  ;;  %v2836_v59 = vpack.c.bf16 %v1156_v52, %v1155_v51  ;;  %v1125_v61 = vld [vmem:[%s4311_s3 + $0xd0] sm:$0xff] }
  0x16   : > { %2799 = vmatpush3.bf16.msra.mxu0 %v2798_v37  ;;  %v1139_v58 = vld [vmem:[%s4311_s3 + $0x140] sm:$0xff]  ;;  %s2254_s18 = sshll.u32 %s4342_s20, 1  ;;  %v1140_v60 = vld [vmem:[%s4311_s3 + $0x148] sm:$0xff]  ;;  %v1126_v62 = vld [vmem:[%s4311_s3 + $0xd8] sm:$0xff]  ;;  %v2806_v1 = vpack.c.bf16 %v1108_v57, %v1107_v56  ;;  %s4319_s22 = sshll.u32 %s3285_s17, 3 }
  0x17   : > { %2831 = vmatpush3.bf16.msra.mxu1 %v2830_v41  ;;  %2801 = vmatprep.subr.bf16.mxu0 %v2800_v42  ;;  %s425_s15 = sadd.s32 %s2254_s18, %s3235_s12  ;;  %v1157_v63 = vld [vmem:[%s4311_s3 + $0x1d0] sm:$0xff]  ;;  %v1158_v0 = vld [vmem:[%s4311_s3 + $0x1d8] sm:$0xff]  ;;  %v2838_v3 = vpack.c.bf16 %v1140_v60, %v1139_v58  ;;  %v2808_v4 = vpack.c.bf16 %v1126_v62, %v1125_v61  ;;  %v1127_v9 = vld [vmem:[%s4311_s3 + $0xe0] sm:$0xff]  ;;  %s3346_s13 = scalar_lea.vmem %s4308_s0, %s4319_s22 }
  0x18   : > { %2833 = vmatprep.subr.bf16.mxu1 %v2832_v46  ;;  %s2256_s19 = sshll.u32 %s425_s15, 3  ;;  %v1109_v2 = vld [vmem:[%s4311_s3 + $0x50] sm:$0xff]  ;;  %v1110_v5 = vld [vmem:[%s4311_s3 + $0x58] sm:$0xff]  ;;  %v2840_v8 = vpack.c.bf16 %v1158_v0, %v1157_v63  ;;  %v1128_v10 = vld [vmem:[%s4311_s3 + $0xe8] sm:$0xff]  ;;  %s4322_s20 = sadd.s32 %s3297_s9, %s3235_s12 }
  0x19   : > { %v1141_v6 = vld [vmem:[%s4311_s3 + $0x150] sm:$0xff]  ;;  %v1142_v7 = vld [vmem:[%s4311_s3 + $0x158] sm:$0xff]  ;;  %v1159_v11 = vld [vmem:[%s4311_s3 + $0x1e0] sm:$0xff]  ;;  %s427_s21 = scalar_lea.vmem %s4309_s1, %s2256_s19  ;;  %v2810_v16 = vpack.c.bf16 %v1110_v5, %v1109_v2  ;;  %v2812_v21 = vpack.c.bf16 %v1128_v10, %v1127_v9  ;;  %s2263_s14 = sshll.u32 %s4322_s20, 3 }
  0x1a   : > { %2803 = vmatpush3.bf16.msra.mxu0 %v2802_v53  ;;  %v1160_v12 = vld [vmem:[%s4311_s3 + $0x1e8] sm:$0xff]  ;;  %v1111_v14 = vld [vmem:[%s4311_s3 + $0x60] sm:$0xff]  ;;  %v1129_v19 = vld [vmem:[%s4311_s3 + $0xf0] sm:$0xff]  ;;  %v2842_v20 = vpack.c.bf16 %v1142_v7, %v1141_v6  ;;  %s563_s11 = scalar_select %p562_p10, 1, 0 }
  0x1b   : > { %2835 = vmatpush3.bf16.msra.mxu1 %v2834_v54  ;;  %2805 = vmatprep.subr.bf16.mxu0 %v2804_v55  ;;  %v1112_v15 = vld [vmem:[%s4311_s3 + $0x68] sm:$0xff]  ;;  %v1143_v17 = vld [vmem:[%s4311_s3 + $0x160] sm:$0xff]  ;;  %v1130_v22 = vld [vmem:[%s4311_s3 + $0xf8] sm:$0xff]  ;;  %v2844_v25 = vpack.c.bf16 %v1160_v12, %v1159_v11  ;;  %s3788_s12 = scalar_lea.vmem %s4310_s2, %s2263_s14  ;;  %s4325_s9 = sshll.u32 %s3285_s17, 3 }
  0x1c   : > { %2837 = vmatprep.subr.bf16.mxu1 %v2836_v59  ;;  %v1144_v18 = vld [vmem:[%s4311_s3 + $0x168] sm:$0xff]  ;;  %v468_v23 = vld [vmem:[%s427_s21] sm:$0xff]  ;;  %v1161_v31 = vld [vmem:[%s4311_s3 + $0x1f0] sm:$0xff]  ;;  %v2814_v38 = vpack.c.bf16 %v1112_v15, %v1111_v14  ;;  %v2816_v40 = vpack.c.bf16 %v1130_v22, %v1129_v19  ;;  %v564_v48 = vstv %s563_s11  ;;  %s3818_s30 = scalar_select %p568_p11, 1, 0 }
  0x1d   : > { %v469_v24 = vld [vmem:[%s427_s21 + $0x8] sm:$0xff]  ;;  %v3364_v26 = vld [vmem:[%s4312_s4] ss:$0 sm:$0xff]  ;;  %v1162_v33 = vld [vmem:[%s4311_s3 + $0x1f8] sm:$0xff]  ;;  %v2846_v39 = vpack.c.bf16 %v1144_v18, %v1143_v17  ;;  %vm3406_vm3 = vcmp.eq.s32.totalorder %v564_v48, 1  ;;  %s4346_s24 = smov (!%p462_p12, %s3029_s24), 1 }
  0x1e   : > { %2807 = vmatpush3.bf16.msra.mxu0 %v2806_v1  ;;  %v3369_v27 = vld [vmem:[%s4313_s5] ss:$0 sm:$0xff]  ;;  %v1113_v34 = vld [vmem:[%s4311_s3 + $0x70] sm:$0xff]  ;;  %v496_v35 = vmul.f32 %v3364_v26, %v468_v23  ;;  %v497_v36 = vmul.f32 %v3364_v26, %v469_v24  ;;  %v1114_v41 = vld [vmem:[%s4311_s3 + $0x78] sm:$0xff]  ;;  %v2848_v50 = vpack.c.bf16 %v1162_v33, %v1161_v31  ;;  %s2268_s17 = sshll.u32 %s4338_s25, 1 }
  0x1f   : > { %2839 = vmatpush3.bf16.msra.mxu1 %v2838_v3  ;;  %2809 = vmatprep.subr.bf16.mxu0 %v2808_v4  ;;  %v470_v28 = vld [vmem:[%s3346_s13] sm:$0xff]  ;;  %v471_v42 = vld [vmem:[%s3346_s13 + $0x8] sm:$0xff]  ;;  %v472_v43 = vld [vmem:[%s3346_s13 + $0x10] sm:$0xff]  ;;  %v2818_v57 = vpack.c.bf16 %v1114_v41, %v1113_v34 }
  0x20   : > { %2841 = vmatprep.subr.bf16.mxu1 %v2840_v8  ;;  %v508_v37 = vmul.f32 %v3364_v26, %v470_v28  ;;  %v1145_v44 = vld [vmem:[%s4311_s3 + $0x170] sm:$0xff]  ;;  %v1146_v45 = vld [vmem:[%s4311_s3 + $0x178] sm:$0xff]  ;;  %v504_v46 = vadd.f32 %v3369_v27, %v496_v35  ;;  %v3403_v47 = vadd.f32 %v3369_v27, %v497_v36  ;;  %v1179_v52 = vld [vmem:[%s4311_s3 + $0x280] sm:$0xff]  ;;  %v509_v54 = vmul.f32 %v3364_v26, %v471_v42 }
  0x21   : > { %v1180_v53 = vld [vmem:[%s4311_s3 + $0x288] sm:$0xff]  ;;  %v510_v55 = vmul.f32 %v3364_v26, %v472_v43  ;;  %v473_v56 = vld [vmem:[%s3346_s13 + $0x18] sm:$0xff]  ;;  %vm2276_vm4 = vmneg %vm3406_vm3  ;;  %v2850_v61 = vpack.c.bf16 %v1146_v45, %v1145_v44 }
  0x22   : > { %2811 = vmatpush3.bf16.msra.mxu0 %v2810_v16  ;;  %v524_v49 = vadd.f32 %v3369_v27, %v508_v37  ;;  %v506_v58 = vmax.f32 %v504_v46, 0.0  ;;  %v507_v59 = vmax.f32 %v3403_v47, 0.0  ;;  %v525_v62 = vadd.f32 %v3369_v27, %v509_v54  ;;  %v474_v1 = vld [vmem:[%s3346_s13 + $0x20] sm:$0xff]  ;;  %v1164_v7 = vld [vmem:[%s4311_s3 + $0x208] sm:$0xff]  ;;  %v1181_v15 = vld [vmem:[%s4311_s3 + $0x290] sm:$0xff] }
  0x23   : > { %2843 = vmatpush3.bf16.msra.mxu1 %v2842_v20  ;;  %2813 = vmatprep.subr.bf16.mxu0 %v2812_v21  ;;  %v526_v63 = vadd.f32 %v3369_v27, %v510_v55  ;;  %v511_v0 = vmul.f32 %v3364_v26, %v473_v56  ;;  %v2852_v5 = vpack.c.bf16 %v1180_v53, %v1179_v52  ;;  %v1163_v6 = vld [vmem:[%s4311_s3 + $0x200] sm:$0xff]  ;;  %v1182_v16 = vld [vmem:[%s4311_s3 + $0x298] sm:$0xff]  ;;  %v1212_v24 = vld [vmem:[%s4311_s3 + $0x388] sm:$0xff] }
  0x24   : > { %2845 = vmatprep.subr.bf16.mxu1 %v2844_v25  ;;  %v3422_v60 = vmax.f32 %v524_v49, 0.0  ;;  %v566_v2 = vsel %vm3406_vm3, 0.0, %v506_v58  ;;  %v567_v3 = vsel %vm3406_vm3, 0.0, %v507_v59  ;;  %2277 = vmatprep.mubr.msk.f32.mxu0 %vm2276_vm4, %v506_v58  ;;  %v3444_v12 = vmax.f32 %v525_v62, 0.0  ;;  %v1211_v23 = vld [vmem:[%s4311_s3 + $0x380] sm:$0xff]  ;;  %v1166_v31 = vld [vmem:[%s4311_s3 + $0x218] sm:$0xff] }
  0x25   : > { %v642_v8 = vrot.slane %v566_v2, 7  ;;  %v742_v9 = vrot.slane %v566_v2, 1  ;;  %v743_v10 = vrot.slane %v567_v3, 1  ;;  %v644_v11 = vrot.slane %v567_v3, 7  ;;  %v1195_v37 = vld [vmem:[%s4311_s3 + $0x300] sm:$0xff]  ;;  %v1184_v42 = vld [vmem:[%s4311_s3 + $0x2a8] sm:$0xff] }
  0x26   : > { %2815 = vmatpush3.bf16.msra.mxu0 %v2814_v38  ;;  %v646_v4 = vrot.slane %v3422_v60, 7  ;;  %v3446_v14 = vmax.f32 %v526_v63, 0.0  ;;  %v527_v17 = vadd.f32 %v3369_v27, %v511_v0  ;;  %v512_v18 = vmul.f32 %v3364_v26, %v474_v1  ;;  %v1196_v38 = vld [vmem:[%s4311_s3 + $0x308] sm:$0xff]  ;;  %v1183_v41 = vld [vmem:[%s4311_s3 + $0x2a0] sm:$0xff]  ;;  %v1213_v47 = vld [vmem:[%s4311_s3 + $0x390] sm:$0xff] }
  0x27   : > { %2847 = vmatpush3.bf16.msra.mxu1 %v2846_v39  ;;  %2817 = vmatprep.subr.bf16.mxu0 %v2816_v40  ;;  %v643_v20 = vsel %vm640_vm0, %v3373_v30, %v642_v8  ;;  %v2854_v21 = vpack.c.bf16 %v1164_v7, %v1163_v6  ;;  %v745_v22 = vrot.slane %v3422_v60, 1  ;;  %v744_v25 = vsel %vm741_vm1, %v742_v9, %v743_v10  ;;  %v1165_v30 = vld [vmem:[%s4311_s3 + $0x210] sm:$0xff]  ;;  %v475_v39 = vld [vmem:[%s3346_s13 + $0x28] sm:$0xff]  ;;  %v1167_v49 = vld [vmem:[%s4311_s3 + $0x220] sm:$0xff] }
  0x28   : > { %2849 = vmatprep.subr.bf16.mxu1 %v2848_v50  ;;  %v3457_v19 = vsel %vm640_vm0, %v644_v11, %v646_v4  ;;  %v648_v28 = vrot.slane %v3444_v12, 7  ;;  %v650_v33 = vrot.slane %v3446_v14, 7  ;;  %v2856_v34 = vpack.c.bf16 %v1182_v16, %v1181_v15  ;;  %v476_v50 = vld [vmem:[%s3346_s13 + $0x30] sm:$0xff]  ;;  %v1168_v54 = vld [vmem:[%s4311_s3 + $0x228] sm:$0xff]  ;;  %v1214_v51 = vld [vmem:[%s4311_s3 + $0x398] sm:$0xff] }
  0x29   : > { %2297 = vmatprep.mubr.msk.f32.mxu1 %vm2964_vm2, %v3457_v19  ;;  %v3480_v35 = vmax.f32 %v527_v17, 0.0  ;;  %v528_v36 = vadd.f32 %v3369_v27, %v512_v18  ;;  %v2884_v43 = vpack.c.bf16 %v1212_v24, %v1211_v23  ;;  %v645_v44 = vsel %vm640_vm0, %v642_v8, %v644_v11  ;;  %v1185_v0 = vld [vmem:[%s4311_s3 + $0x2b0] sm:$0xff]  ;;  %v1186_v1 = vld [vmem:[%s4311_s3 + $0x2b8] sm:$0xff]  ;;  %v1215_v7 = vld [vmem:[%s4311_s3 + $0x3a0] sm:$0xff] }
  0x2a   : > { %2819 = vmatpush3.bf16.msra.mxu0 %v2818_v57  ;;  %v3493_v40 = vsel %vm640_vm0, %v646_v4, %v648_v28  ;;  %v746_v45 = vsel %vm741_vm1, %v743_v10, %v745_v22  ;;  %v747_v46 = vrot.slane %v3444_v12, 1  ;;  %v2858_v48 = vpack.c.bf16 %v1166_v31, %v1165_v30  ;;  %v477_v2 = vld [vmem:[%s3346_s13 + $0x38] sm:$0xff]  ;;  %v1216_v8 = vld [vmem:[%s4311_s3 + $0x3a8] sm:$0xff]  ;;  %v478_v16 = vld [vmem:[%s3346_s13 + $0x40] sm:$0xff] }
  0x2b   : > { %2851 = vmatpush3.bf16.msra.mxu1 %v2850_v61  ;;  %2853 = vmatprep.subr.bf16.mxu0 %v2852_v5  ;;  %v652_v52 = vrot.slane %v3480_v35, 7  ;;  %v3516_v53 = vmax.f32 %v528_v36, 0.0  ;;  %v2886_v55 = vpack.c.bf16 %v1196_v38, %v1195_v37  ;;  %v513_v56 = vmul.f32 %v3364_v26, %v475_v39  ;;  %v1198_v61 = vld [vmem:[%s4311_s3 + $0x318] sm:$0xff]  ;;  %v1187_v23 = vld [vmem:[%s4311_s3 + $0x2c0] sm:$0xff]  ;;  %v1188_v24 = vld [vmem:[%s4311_s3 + $0x2c8] sm:$0xff] }
  0x2c   : > { %v3529_v57 = vsel %vm640_vm0, %v648_v28, %v650_v33  ;;  %v2860_v58 = vpack.c.bf16 %v1184_v42, %v1183_v41  ;;  %2885 = vmatprep.subr.bf16.mxu1 %v2884_v43  ;;  %v514_v63 = vmul.f32 %v3364_v26, %v476_v50  ;;  %v3550_v3 = vsel %vm741_vm1, %v745_v22, %v747_v46  ;;  %v1199_v28 = vld [vmem:[%s4311_s3 + $0x320] sm:$0xff]  ;;  %v1200_v30 = vld [vmem:[%s4311_s3 + $0x328] sm:$0xff]  ;;  %v1190_v50 = vld [vmem:[%s4311_s3 + $0x2d8] sm:$0xff] }
  0x2d   : > { %2279 = vmatmul.mubr.msk.f32.vlgmr.msra.gmra.mrb[0].mxu0 %vm2964_vm2, %v643_v20  ;;  %v529_v62 = vadd.f32 %v3369_v27, %v513_v56  ;;  %v749_v4 = vrot.slane %v3446_v14, 1  ;;  %v2862_v5 = vpack.c.bf16 %v1168_v54, %v1167_v49  ;;  %v2888_v6 = vpack.c.bf16 %v1214_v51, %v1213_v47  ;;  %v1169_v20 = vld [vmem:[%s4311_s3 + $0x230] sm:$0xff]  ;;  %v1171_v38 = vld [vmem:[%s4311_s3 + $0x240] sm:$0xff]  ;;  %v1172_v43 = vld [vmem:[%s4311_s3 + $0x248] sm:$0xff] }
  0x2e   : > { %1453 = vmatmul.mubr.f32.vlgmr.msra.gmra.mrb[0].mxu1 %v744_v25  ;;  %2855 = vmatpush3.bf16.msra.mxu0 %v2854_v21  ;;  %v3563_v9 = vsel %vm640_vm0, %v650_v33, %v652_v52  ;;  %v654_v10 = vrot.slane %v3516_v53, 7  ;;  %v530_v17 = vadd.f32 %v3369_v27, %v514_v63  ;;  %v2864_v18 = vpack.c.bf16 %v1186_v1, %v1185_v0  ;;  %v1170_v21 = vld [vmem:[%s4311_s3 + $0x238] sm:$0xff]  ;;  %v1189_v49 = vld [vmem:[%s4311_s3 + $0x2d0] sm:$0xff] }
  0x2f   : > { %2281 = vmatprep.mubr.msk.f32.mxu0 %vm2276_vm4, %v507_v59  ;;  %1457 = vmatprep.mubr.f32.mxu1 %v3493_v40  ;;  %v1197_v59 = vld [vmem:[%s4311_s3 + $0x310] sm:$0xff]  ;;  %v3566_v11 = vmax.f32 %v529_v62, 0.0  ;;  %v515_v22 = vmul.f32 %v3364_v26, %v477_v2  ;;  %v2892_v25 = vpack.c.bf16 %v1216_v8, %v1215_v7  ;;  %v516_v31 = vmul.f32 %v3364_v26, %v478_v16  ;;  %v1202_v56 = vld [vmem:[%s4311_s3 + $0x338] sm:$0xff]  ;;  %v1191_v8 = vld [vmem:[%s4311_s3 + $0x2e0] sm:$0xff] }
  0x30   : > { %2857 = vmatprep.subr.bf16.mxu0 %v2856_v34  ;;  %2887 = vmatpush3.bf16.msra.mxu1 %v2886_v55  ;;  %v2890_v15 = vpack.c.bf16 %v1198_v61, %v1197_v59  ;;  %v3598_v33 = vsel %vm741_vm1, %v747_v46, %v749_v4  ;;  %v3601_v34 = vsel %vm640_vm0, %v652_v52, %v654_v10  ;;  %v3607_v39 = vmax.f32 %v530_v17, 0.0  ;;  %v1218_v46 = vld [vmem:[%s4311_s3 + $0x3b8] sm:$0xff]  ;;  %v1201_v55 = vld [vmem:[%s4311_s3 + $0x330] sm:$0xff]  ;;  %v1203_v17 = vld [vmem:[%s4311_s3 + $0x340] sm:$0xff] }
  0x31   : > { %1313 = vmatmul.mubr.f32.gmra.mrb[2].mxu0 %v645_v44  ;;  %2889 = vmatprep.subr.bf16.mxu1 %v2888_v6  ;;  %v656_v36 = vrot.slane %v3566_v11, 7  ;;  %v2866_v37 = vpack.c.bf16 %v1170_v21, %v1169_v20  ;;  %v531_v41 = vadd.f32 %v3369_v27, %v515_v22  ;;  %v2868_v42 = vpack.c.bf16 %v1188_v24, %v1187_v23  ;;  %v1173_v61 = vld [vmem:[%s4311_s3 + $0x250] sm:$0xff]  ;;  %v1174_v2 = vld [vmem:[%s4311_s3 + $0x258] sm:$0xff]  ;;  %v1204_v23 = vld [vmem:[%s4311_s3 + $0x348] sm:$0xff] }
  0x32   : > { %2299 = vmatmul.mubr.msk.f32.gmra.mrb[2].mxu1 %vm2965_vm5, %v746_v45  ;;  %1317 = vmatprep.mubr.f32.mxu0 %v3422_v60  ;;  %v2894_v44 = vpack.c.bf16 %v1200_v30, %v1199_v28  ;;  %v1217_v45 = vld [vmem:[%s4311_s3 + $0x3b0] sm:$0xff]  ;;  %v532_v54 = vadd.f32 %v3369_v27, %v516_v31  ;;  %v2870_v51 = vpack.c.bf16 %v1172_v43, %v1171_v38  ;;  %v658_v62 = vrot.slane %v3607_v39, 7  ;;  %v481_v16 = vld [vmem:[%s3346_s13 + $0x58] sm:$0xff]  ;;  %v1176_v38 = vld [vmem:[%s4311_s3 + $0x268] sm:$0xff] }
  0x33   : > { %2301 = vmatprep.mubr.msk.f32.mxu1 %vm2964_vm2, %v3529_v57  ;;  %2859 = vmatpush3.bf16.msra.mxu0 %v2858_v48  ;;  %v479_v48 = vld [vmem:[%s3346_s13 + $0x48] sm:$0xff]  ;;  %v3646_v47 = vsel %vm640_vm0, %v654_v10, %v656_v36  ;;  %v2896_v59 = vpack.c.bf16 %v1218_v46, %v1217_v45  ;;  %v3653_v63 = vmax.f32 %v531_v41, 0.0  ;;  %v2872_v1 = vpack.c.bf16 %v1190_v50, %v1189_v49  ;;  %v1221_v24 = vld [vmem:[%s4311_s3 + $0x3d0] sm:$0xff] }
  0x34   : > { %2861 = vmatprep.subr.bf16.mxu0 %v2860_v58  ;;  %2891 = vmatpush3.bf16.msra.mxu1 %v2890_v15  ;;  %v480_v58 = vld [vmem:[%s3346_s13 + $0x50] sm:$0xff]  ;;  %v517_v0 = vmul.f32 %v3364_v26, %v479_v48  ;;  %v755_v6 = vrot.slane %v3566_v11, 1  ;;  %v2898_v7 = vpack.c.bf16 %v1202_v56, %v1201_v55  ;;  %v1192_v10 = vld [vmem:[%s4311_s3 + $0x2e8] sm:$0xff]  ;;  %v2874_v21 = vpack.c.bf16 %v1174_v2, %v1173_v61  ;;  %v1223_v56 = vld [vmem:[%s4311_s3 + $0x3e0] sm:$0xff] }
  0x35   : > { %2283 = vmatmul.mubr.msk.f32.gmra.mrb[4].mxu0 %vm2964_vm2, %v3457_v19  ;;  %v751_v19 = vrot.slane %v3480_v35, 1  ;;  %2893 = vmatprep.subr.bf16.mxu1 %v2892_v25  ;;  %v518_v20 = vmul.f32 %v3364_v26, %v480_v58  ;;  %v1222_v25 = vld [vmem:[%s4311_s3 + $0x3d8] sm:$0xff]  ;;  %v3698_v28 = vsel %vm640_vm0, %v656_v36, %v658_v62  ;;  %v660_v30 = vrot.slane %v3653_v63, 7  ;;  %v1205_v36 = vld [vmem:[%s4311_s3 + $0x350] sm:$0xff] }
  0x36   : > { %1463 = vmatmul.mubr.f32.gmra.mrb[4].mxu1 %v3550_v3  ;;  %1322 = vmatprep.mubr.f32.mxu0 %v3444_v12  ;;  %v2876_v31 = vpack.c.bf16 %v1192_v10, %v1191_v8  ;;  %v1193_v43 = vld [vmem:[%s4311_s3 + $0x2f0] sm:$0xff]  ;;  %v519_v45 = vmul.f32 %v3364_v26, %v481_v16  ;;  %v2902_v46 = vpack.c.bf16 %v1204_v23, %v1203_v17  ;;  %v757_v49 = vrot.slane %v3607_v39, 1  ;;  %v1178_v2 = vld [vmem:[%s4311_s3 + $0x278] sm:$0xff] }
  0x37   : > { %1467 = vmatprep.mubr.f32.mxu1 %v3563_v9  ;;  %2863 = vmatpush3.bf16.msra.mxu0 %v2862_v5  ;;  %v3632_v52 = vsel %vm741_vm1, %v749_v4, %v751_v19  ;;  %v1219_v4 = vld [vmem:[%s4311_s3 + $0x3c0] sm:$0xff]  ;;  %v1220_v5 = vld [vmem:[%s4311_s3 + $0x3c8] sm:$0xff]  ;;  %v2904_v48 = vpack.c.bf16 %v1222_v25, %v1221_v24  ;;  %v3748_v58 = vsel %vm640_vm0, %v658_v62, %v660_v30  ;;  %v1226_v17 = vld [vmem:[%s4311_s3 + $0x3f8] sm:$0xff]  ;;  %v759_v23 = vrot.slane %v3653_v63, 1 }
  0x38   : > { %2865 = vmatprep.subr.bf16.mxu0 %v2864_v18  ;;  %2895 = vmatpush3.bf16.msra.mxu1 %v2894_v44  ;;  %v3685_v18 = vmax.f32 %v532_v54, 0.0  ;;  %v2900_v22 = vpack.c.bf16 %v1220_v5, %v1219_v4  ;;  %v1194_v44 = vld [vmem:[%s4311_s3 + $0x2f8] sm:$0xff]  ;;  %v482_v54 = vld [vmem:[%s3346_s13 + $0x60] sm:$0xff]  ;;  %v1208_v5 = vld [vmem:[%s4311_s3 + $0x368] sm:$0xff]  ;;  %v535_v8 = vadd.f32 %v3369_v27, %v519_v45 }
  0x39   : > { %1323 = vmatmul.mubr.f32.gmra.mrb[6].mxu0 %v3493_v40  ;;  %v753_v40 = vrot.slane %v3516_v53, 1  ;;  %2897 = vmatprep.subr.bf16.mxu1 %v2896_v59  ;;  %v485_v4 = vld [vmem:[%s3346_s13 + $0x78] sm:$0xff]  ;;  %v1207_v62 = vld [vmem:[%s4311_s3 + $0x360] sm:$0xff]  ;;  %v520_v10 = vmul.f32 %v3364_v26, %v482_v54 }
  0x3a   : > { %2303 = vmatmul.mubr.msk.f32.gmra.mrb[6].mxu1 %vm2965_vm5, %v3598_v33  ;;  %1327 = vmatprep.mubr.f32.mxu0 %v3446_v14  ;;  %v662_v50 = vrot.slane %v3685_v18, 7  ;;  %v523_v25 = vmul.f32 %v3364_v26, %v485_v4  ;;  %v3825_v45 = vmax.f32 %v535_v8, 0.0  ;;  %v570_v4 = vstv %s3818_s30  ;;  %s4253_s30 = scalar_lea.vmem %s4314_s6, %s4325_s9 }
  0x3b   : > { %2305 = vmatprep.mubr.msk.f32.mxu1 %vm2964_vm2, %v3601_v34  ;;  %2867 = vmatpush3.bf16.msra.mxu0 %v2866_v37  ;;  %v3678_v15 = vsel %vm741_vm1, %v751_v19, %v753_v40  ;;  %v533_v19 = vadd.f32 %v3369_v27, %v517_v0  ;;  %v1175_v37 = vld [vmem:[%s4311_s3 + $0x260] sm:$0xff]  ;;  %v3715_v41 = vsel %vm741_vm1, %v753_v40, %v755_v6  ;;  %vm3872_vm6 = vcmp.eq.s32.totalorder %v570_v4, 1 }
  0x3c   : > { %2869 = vmatprep.subr.bf16.mxu0 %v2868_v42  ;;  %2899 = vmatpush3.bf16.msra.mxu1 %v2898_v7  ;;  %v1206_v42 = vld [vmem:[%s4311_s3 + $0x358] sm:$0xff]  ;;  %v534_v40 = vadd.f32 %v3369_v27, %v518_v20  ;;  %v2878_v55 = vpack.c.bf16 %v1176_v38, %v1175_v37  ;;  %v2880_v0 = vpack.c.bf16 %v1194_v44, %v1193_v43  ;;  %v1225_v7 = vld [vmem:[%s4311_s3 + $0x3f0] sm:$0xff]  ;;  %v1227_v20 = vld [vmem:[%s4311_s3 + $0x400] sm:$0xff]  ;;  %v761_v44 = vrot.slane %v3685_v18, 1 }
  0x3d   : > { %2285 = vmatmul.mubr.msk.f32.gmra.mrb[8].mxu0 %vm2964_vm2, %v3529_v57  ;;  %2901 = vmatprep.subr.bf16.mxu1 %v2900_v22  ;;  %v3750_v59 = vmax.f32 %v533_v19, 0.0  ;;  %v2906_v61 = vpack.c.bf16 %v1206_v42, %v1205_v36  ;;  %v3794_v22 = vsel %vm741_vm1, %v755_v6, %v757_v49  ;;  %v3801_v19 = vsel %vm640_vm0, %v660_v30, %v662_v50  ;;  %v483_v38 = vld [vmem:[%s3346_s13 + $0x68] sm:$0xff]  ;;  %v1209_v42 = vld [vmem:[%s4311_s3 + $0x370] sm:$0xff]  ;;  %v1210_v30 = vld [vmem:[%s4311_s3 + $0x378] sm:$0xff] }
  0x3e   : > { %1473 = vmatmul.mubr.f32.gmra.mrb[8].mxu1 %v3632_v52  ;;  %1332 = vmatprep.mubr.f32.mxu0 %v3480_v35  ;;  %v3804_v37 = vmax.f32 %v534_v40, 0.0  ;;  %v2910_v6 = vpack.c.bf16 %v1208_v5, %v1207_v62  ;;  %v2912_v36 = vpack.c.bf16 %v1226_v17, %v1225_v7  ;;  %v3833_v40 = vsel %vm741_vm1, %v757_v49, %v759_v23  ;;  %vm2358_vm7 = vmneg %vm3872_vm6 }
  0x3f   : > { %1477 = vmatprep.mubr.f32.mxu1 %v3646_v47  ;;  %2871 = vmatpush3.bf16.msra.mxu0 %v2870_v51  ;;  %v1224_v51 = vld [vmem:[%s4311_s3 + $0x3e8] sm:$0xff]  ;;  %v521_v54 = vmul.f32 %v3364_v26, %v483_v38  ;;  %v763_v49 = vrot.slane %v3750_v59, 1  ;;  %v668_v62 = vrot.slane %v3825_v45, 7 }
  0x40   : > { %2873 = vmatprep.subr.bf16.mxu0 %v2872_v1  ;;  %2903 = vmatpush3.bf16.msra.mxu1 %v2902_v46  ;;  %v1177_v1 = vld [vmem:[%s4311_s3 + $0x270] sm:$0xff]  ;;  %v2908_v16 = vpack.c.bf16 %v1224_v51, %v1223_v56  ;;  %v536_v46 = vadd.f32 %v3369_v27, %v520_v10  ;;  %v487_v56 = vld [vmem:[%s3788_s12 + $0x8] sm:$0xff] }
  0x41   : > { %1333 = vmatmul.mubr.f32.gmra.mrb[10].mxu0 %v3563_v9  ;;  %2905 = vmatprep.subr.bf16.mxu1 %v2904_v48  ;;  %v2882_v24 = vpack.c.bf16 %v1178_v2, %v1177_v1  ;;  %v486_v48 = vld [vmem:[%s3788_s12] sm:$0xff]  ;;  %v2914_v1 = vpack.c.bf16 %v1210_v30, %v1209_v42  ;;  %v557_v7 = vmul.f32 %v3364_v26, %v487_v56 }
  0x42   : > { %2307 = vmatmul.mubr.msk.f32.gmra.mrb[10].mxu1 %vm2965_vm5, %v3678_v15  ;;  %1337 = vmatprep.mubr.f32.mxu0 %v3516_v53  ;;  %v556_v2 = vmul.f32 %v3364_v26, %v486_v48  ;;  %v3858_v5 = vmax.f32 %v536_v46, 0.0  ;;  %v537_v8 = vadd.f32 %v3369_v27, %v521_v54 }
  0x43   : > { %2309 = vmatprep.mubr.msk.f32.mxu1 %vm2964_vm2, %v3698_v28  ;;  %2875 = vmatpush3.bf16.msra.mxu0 %v2874_v21  ;;  %v1228_v21 = vld [vmem:[%s4311_s3 + $0x408] sm:$0xff] }
  0x44   : > { %2877 = vmatprep.subr.bf16.mxu0 %v2876_v31  ;;  %v664_v31 = vrot.slane %v3750_v59, 7  ;;  %2907 = vmatpush3.bf16.msra.mxu1 %v2906_v61  ;;  %v3814_v43 = vpack.c.bf16 %v1228_v21, %v1227_v20  ;;  %v666_v61 = vrot.slane %v3804_v37, 7  ;;  %v3867_v17 = vadd.f32 %v3369_v27, %v556_v2 }
  0x45   : > { %2287 = vmatmul.mubr.msk.f32.gmra.mrb[12].mxu0 %vm2964_vm2, %v3601_v34  ;;  %2909 = vmatprep.subr.bf16.mxu1 %v2908_v16  ;;  %v670_v38 = vrot.slane %v3858_v5, 7  ;;  %v3899_v42 = vmax.f32 %v537_v8, 0.0  ;;  %v767_v2 = vrot.slane %v3825_v45, 1 }
  0x46   : > { %1483 = vmatmul.mubr.f32.gmra.mrb[12].mxu1 %v3715_v41  ;;  %1342 = vmatprep.mubr.f32.mxu0 %v3566_v11  ;;  %v3841_v51 = vsel %vm640_vm0, %v662_v50, %v664_v31  ;;  %v3855_v50 = vsel %vm741_vm1, %v759_v23, %v761_v44  ;;  %v3870_v20 = vsel %vm640_vm0, %v664_v31, %v666_v61 }
  0x47   : > { %1487 = vmatprep.mubr.f32.mxu1 %v3748_v58  ;;  %2879 = vmatpush3.bf16.msra.mxu0 %v2878_v55  ;;  %v539_v55 = vadd.f32 %v3369_v27, %v523_v25  ;;  %v3877_v23 = vadd.f32 %v3369_v27, %v557_v7  ;;  %v560_v25 = vmax.f32 %v3867_v17, 0.0  ;;  %v3891_v31 = vsel %vm640_vm0, %v666_v61, %v668_v62 }
  0x48   : > { %2881 = vmatprep.subr.bf16.mxu0 %v2880_v0  ;;  %v484_v0 = vld [vmem:[%s3346_s13 + $0x70] sm:$0xff]  ;;  %2911 = vmatpush3.bf16.msra.mxu1 %v2910_v6  ;;  %v3940_v8 = vsel %vm640_vm0, %v668_v62, %v670_v38  ;;  %v769_v62 = vrot.slane %v3858_v5, 1  ;;  %s465_s13 = sadd.s32 %s2268_s17, %s4346_s24 }
  0x49   : > { %1343 = vmatmul.mubr.f32.gmra.mrb[14].mxu0 %v3646_v47  ;;  %2913 = vmatprep.subr.bf16.mxu1 %v2912_v36  ;;  %v522_v10 = vmul.f32 %v3364_v26, %v484_v0  ;;  %v3864_v16 = vmax.f32 %v539_v55, 0.0  ;;  %v3881_v26 = vsel %vm741_vm1, %v761_v44, %v763_v49  ;;  %v561_v6 = vmax.f32 %v3877_v23, 0.0  ;;  %s2269_s18 = sshll.u32 %s465_s13, 1 }
  0x4a   : > { %2311 = vmatmul.mubr.msk.f32.gmra.mrb[14].mxu1 %vm2965_vm5, %v3794_v22  ;;  %1347 = vmatprep.mubr.f32.mxu0 %v3607_v39  ;;  %v933_v36 = vrot.slane %v3047_v29, 1  ;;  %v572_v46 = vsel %vm3872_vm6, 0.0, %v560_v25  ;;  %s467_s16 = scalar_lea.vmem %s4315_s7, %s2269_s18 }
  0x4b   : > { %2313 = vmatprep.mubr.msk.f32.mxu1 %vm2964_vm2, %v3801_v19  ;;  %2883 = vmatpush3.bf16.msra.mxu0 %v2882_v24  ;;  %v765_v24 = vrot.slane %v3804_v37, 1  ;;  %v538_v30 = vadd.f32 %v3369_v27, %v522_v10  ;;  %v826_v44 = vrot.slane %v3864_v16, 7  ;;  %v865_v48 = vrot.slane %v3864_v16, 1 }
  0x4c   : > { %2917 = vmatprep.subr.bf16.mxu0 %v3814_v43  ;;  %2915 = vmatpush3.bf16.msra.mxu1 %v2914_v1  ;;  %v890_v54 = vrot.slane %v572_v46, 7  ;;  %v867_v55 = vrot.slane %v572_v46, 1  ;;  %v573_v29 = vsel %vm3872_vm6, 0.0, %v561_v6  ;;  %v672_v10 = vrot.slane %v3899_v42, 7 }
  0x4d   : > { %2289 = vmatmul.mubr.msk.f32.gmra.mrb[16].mxu0 %vm2964_vm2, %v3698_v28  ;;  %2948 = vmatprep.subr.bf16.mxu1 %v3814_v43  ;;  %v892_v27 = vrot.slane %v573_v29, 7  ;;  %v931_v56 = vrot.slane %v573_v29, 1  ;;  %v3918_v61 = vsel %vm741_vm1, %v763_v49, %v765_v24  ;;  %v3943_v46 = vmax.f32 %v538_v30, 0.0 }
  0x4e   : > { %1493 = vmatmul.mubr.f32.gmra.mrb[16].mxu1 %v3833_v40  ;;  %1352 = vmatprep.mubr.f32.mxu0 %v3653_v63  ;;  %v3921_v0 = vsel %vm640_vm0, %v826_v44, %v890_v54  ;;  %v3926_v1 = vsel %vm741_vm1, %v865_v48, %v867_v55  ;;  %v3958_v30 = vsel %vm640_vm0, %v670_v38, %v672_v10 }
  0x4f   : > { %1497 = vmatprep.mubr.f32.mxu1 %v3841_v51  ;;  %v3931_v4 = vsel %vm640_vm0, %v890_v54, %v892_v27  ;;  %v3934_v7 = vsel %vm741_vm1, %v867_v55, %v931_v56  ;;  %v3937_v49 = vsel %vm741_vm1, %v931_v56, %v933_v36  ;;  %v3954_v36 = vsel %vm741_vm1, %v765_v24, %v767_v2 }
  0x50   : > { %v824_v54 = vrot.slane %v3943_v46, 7  ;;  %v3968_v24 = vsel %vm741_vm1, %v767_v2, %v769_v62  ;;  %v771_v55 = vrot.slane %v3899_v42, 1  ;;  %v773_v27 = vrot.slane %v3943_v46, 1 }
  0x51   : > { %1353 = vmatmul.mubr.f32.gmra.mrb[18].mxu0 %v3748_v58 }
  0x52   : > { %2315 = vmatmul.mubr.msk.f32.gmra.mrb[18].mxu1 %vm2965_vm5, %v3855_v50  ;;  %1357 = vmatprep.mubr.f32.mxu0 %v3685_v18  ;;  %v3972_v38 = vsel %vm640_vm0, %v672_v10, %v824_v54  ;;  %v3983_v29 = vsel %vm741_vm1, %v769_v62, %v771_v55  ;;  %v3987_v56 = vsel %vm640_vm0, %v824_v54, %v826_v44  ;;  %v1229_v44 = vld [vmem:[%s4311_s3 + $0x410] sm:$0xff]  ;;  %v1230_v10 = vld [vmem:[%s4311_s3 + $0x418] sm:$0xff]  ;;  %v1231_v54 = vld [vmem:[%s4311_s3 + $0x420] sm:$0xff] }
  0x53   : > { %2317 = vmatprep.mubr.msk.f32.mxu1 %vm2964_vm2, %v3870_v20  ;;  %v3998_v2 = vsel %vm741_vm1, %v771_v55, %v773_v27  ;;  %v2920_v62 = vpack.c.bf16 %v1230_v10, %v1229_v44  ;;  %v1232_v55 = vld [vmem:[%s4311_s3 + $0x428] sm:$0xff] }
  0x54   : > { %v1240_v10 = vld [vmem:[%s4311_s3 + $0x468] sm:$0xff] }
  0x55   : > { %2291 = vmatmul.mubr.msk.f32.gmra.mrb[20].mxu0 %vm2964_vm2, %v3801_v19 }
  0x56   : > { %1503 = vmatmul.mubr.f32.gmra.mrb[20].mxu1 %v3881_v26  ;;  %1362 = vmatprep.mubr.f32.mxu0 %v3750_v59 }
  0x57   : > { %1507 = vmatprep.mubr.f32.mxu1 %v3891_v31 }
  0x59   : > { %1363 = vmatmul.mubr.f32.gmra.mrb[22].mxu0 %v3841_v51 }
  0x5a   : > { %2319 = vmatmul.mubr.msk.f32.gmra.mrb[22].mxu1 %vm2965_vm5, %v3918_v61  ;;  %1367 = vmatprep.mubr.f32.mxu0 %v3804_v37 }
  0x5b   : > { %2321 = vmatprep.mubr.msk.f32.mxu1 %vm2964_vm2, %v3940_v8 }
  0x5d   : > { %2293 = vmatmul.mubr.msk.f32.gmra.mrb[24].mxu0 %vm2964_vm2, %v3870_v20 }
  0x5e   : > { %1513 = vmatmul.mubr.f32.gmra.mrb[24].mxu1 %v3954_v36  ;;  %1372 = vmatprep.mubr.f32.mxu0 %v3825_v45 }
  0x5f   : > { %1517 = vmatprep.mubr.f32.mxu1 %v3958_v30 }
  0x61   : > { %1373 = vmatmul.mubr.f32.gmra.mrb[26].mxu0 %v3891_v31 }
  0x62   : > { %2323 = vmatmul.mubr.msk.f32.gmra.mrb[26].mxu1 %vm2965_vm5, %v3968_v24  ;;  %1377 = vmatprep.mubr.f32.mxu0 %v3858_v5 }
  0x63   : > { %2325 = vmatprep.mubr.msk.f32.mxu1 %vm2964_vm2, %v3972_v38 }
  0x65   : > { %2295 = vmatmul.mubr.msk.f32.gmra.mrb[28].mxu0 %vm2964_vm2, %v3940_v8 }
  0x66   : > { %1523 = vmatmul.mubr.f32.gmra.mrb[28].mxu1 %v3983_v29  ;;  %1382 = vmatprep.mubr.f32.mxu0 %v3899_v42 }
  0x67   : > { %1527 = vmatprep.mubr.f32.mxu1 %v3987_v56 }
  0x69   : > { %1383 = vmatmul.mubr.f32.gmra.mrb[30].mxu0 %v3958_v30 }
  0x6a   : > { %2327 = vmatmul.mubr.msk.f32.gmra.mrb[30].mxu1 %vm2965_vm5, %v3998_v2  ;;  %1597 = vmatprep.mubr.f32.mxu0 %v3550_v3  ;;  %v1233_v3 = vld [vmem:[%s4311_s3 + $0x430] sm:$0xff] }
  0x6b   : > { %1742 = vmatprep.mubr.f32.mxu1 %v3446_v14 }
  0x6d   : > { %1598 = vmatmul.mubr.f32.vlgmr.msra.gmra.mrb[32].mxu0 %v3422_v60  ;;  %v2924_v60 = vpack.c.bf16 %v1232_v55, %v1231_v54 }
  0x6e   : > { %2345 = vmatmul.mubr.msk.f32.vlgmr.msra.gmra.mrb[32].mxu1 %vm2964_vm2, %v3529_v57  ;;  %2919 = vmatpush3.bf16.msra.mxu0 %v3814_v43  ;;  %v1234_v57 = vld [vmem:[%s4311_s3 + $0x438] sm:$0xff] }
  0x6f   : > { %2329 = vmatprep.mubr.msk.f32.mxu0 %vm2965_vm5, %v3598_v33  ;;  %1747 = vmatprep.mubr.f32.mxu1 %v3480_v35  ;;  %v2928_v33 = vpack.c.bf16 %v1234_v57, %v1233_v3 }
  0x70   : > { %2921 = vmatprep.subr.bf16.mxu0 %v2920_v62  ;;  %2956 = vmatpush3.bf16.msra.mxu1 %v3814_v43  ;;  %v1236_v43 = vld [vmem:[%s4311_s3 + $0x448] sm:$0xff] }
  0x71   : > { %1603 = vmatmul.mubr.f32.gmra.mrb[34].mxu0 %v3444_v12  ;;  %2949 = vmatprep.subr.bf16.mxu1 %v2920_v62  ;;  %v1235_v12 = vld [vmem:[%s4311_s3 + $0x440] sm:$0xff] }
  0x72   : > { %1748 = vmatmul.mubr.f32.gmra.mrb[34].mxu1 %v3563_v9  ;;  %1607 = vmatprep.mubr.f32.mxu0 %v3632_v52  ;;  %v1237_v9 = vld [vmem:[%s4311_s3 + $0x450] sm:$0xff] }
  0x73   : > { %1752 = vmatprep.mubr.f32.mxu1 %v3516_v53  ;;  %2923 = vmatpush3.bf16.msra.mxu0 %v2920_v62 }
  0x74   : > { %2925 = vmatprep.subr.bf16.mxu0 %v2924_v60  ;;  %2957 = vmatpush3.bf16.msra.mxu1 %v2920_v62 }
  0x75   : > { %1608 = vmatmul.mubr.f32.gmra.mrb[36].mxu0 %v3446_v14  ;;  %2950 = vmatprep.subr.bf16.mxu1 %v2924_v60  ;;  %v2932_v14 = vpack.c.bf16 %v1236_v43, %v1235_v12 }
  0x76   : > { %2347 = vmatmul.mubr.msk.f32.gmra.mrb[36].mxu1 %vm2964_vm2, %v3601_v34  ;;  %2331 = vmatprep.mubr.msk.f32.mxu0 %vm2965_vm5, %v3678_v15  ;;  %v1238_v34 = vld [vmem:[%s4311_s3 + $0x458] sm:$0xff] }
  0x77   : > { %1757 = vmatprep.mubr.f32.mxu1 %v3566_v11  ;;  %2927 = vmatpush3.bf16.msra.mxu0 %v2924_v60  ;;  %v2936_v44 = vpack.c.bf16 %v1238_v34, %v1237_v9 }
  0x78   : > { %2929 = vmatprep.subr.bf16.mxu0 %v2928_v33  ;;  %2958 = vmatpush3.bf16.msra.mxu1 %v2924_v60 }
  0x79   : > { %1613 = vmatmul.mubr.f32.gmra.mrb[38].mxu0 %v3480_v35  ;;  %2951 = vmatprep.subr.bf16.mxu1 %v2928_v33  ;;  %v1239_v35 = vld [vmem:[%s4311_s3 + $0x460] sm:$0xff] }
  0x7a   : > { %1758 = vmatmul.mubr.f32.gmra.mrb[38].mxu1 %v3646_v47  ;;  %1617 = vmatprep.mubr.f32.mxu0 %v3715_v41  ;;  %v1241_v47 = vld [vmem:[%s4311_s3 + $0x470] sm:$0xff] }
  0x7b   : > { %1762 = vmatprep.mubr.f32.mxu1 %v3607_v39  ;;  %2931 = vmatpush3.bf16.msra.mxu0 %v2928_v33 }
  0x7c   : > { %2933 = vmatprep.subr.bf16.mxu0 %v2932_v14  ;;  %2959 = vmatpush3.bf16.msra.mxu1 %v2928_v33 }
  0x7d   : > { %1618 = vmatmul.mubr.f32.gmra.mrb[40].mxu0 %v3516_v53  ;;  %2952 = vmatprep.subr.bf16.mxu1 %v2932_v14  ;;  %v2940_v53 = vpack.c.bf16 %v1240_v10, %v1239_v35 }
  0x7e   : > { %2349 = vmatmul.mubr.msk.f32.gmra.mrb[40].mxu1 %vm2964_vm2, %v3698_v28  ;;  %2333 = vmatprep.mubr.msk.f32.mxu0 %vm2965_vm5, %v3794_v22  ;;  %v1242_v28 = vld [vmem:[%s4311_s3 + $0x478] sm:$0xff] }
  0x7f   : > { %1767 = vmatprep.mubr.f32.mxu1 %v3653_v63  ;;  %2935 = vmatpush3.bf16.msra.mxu0 %v2932_v14  ;;  %v2944_v62 = vpack.c.bf16 %v1242_v28, %v1241_v47 }
  0x80   : > { %2937 = vmatprep.subr.bf16.mxu0 %v2936_v44  ;;  %2960 = vmatpush3.bf16.msra.mxu1 %v2932_v14 }
  0x81   : > { %1623 = vmatmul.mubr.f32.gmra.mrb[42].mxu0 %v3566_v11  ;;  %2953 = vmatprep.subr.bf16.mxu1 %v2936_v44  ;;  %v866_v11 = vsel %vm741_vm1, %v773_v27, %v865_v48 }
  0x82   : > { %1768 = vmatmul.mubr.f32.gmra.mrb[42].mxu1 %v3748_v58  ;;  %1627 = vmatprep.mubr.f32.mxu0 %v3833_v40 }
  0x83   : > { %1772 = vmatprep.mubr.f32.mxu1 %v3685_v18  ;;  %2939 = vmatpush3.bf16.msra.mxu0 %v2936_v44 }
  0x84   : > { %2941 = vmatprep.subr.bf16.mxu0 %v2940_v53  ;;  %2961 = vmatpush3.bf16.msra.mxu1 %v2936_v44 }
  0x85   : > { %1628 = vmatmul.mubr.f32.gmra.mrb[44].mxu0 %v3607_v39  ;;  %2954 = vmatprep.subr.bf16.mxu1 %v2940_v53 }
  0x86   : > { %2351 = vmatmul.mubr.msk.f32.gmra.mrb[44].mxu1 %vm2964_vm2, %v3801_v19  ;;  %2335 = vmatprep.mubr.msk.f32.mxu0 %vm2965_vm5, %v3855_v50 }
  0x87   : > { %1777 = vmatprep.mubr.f32.mxu1 %v3750_v59  ;;  %2943 = vmatpush3.bf16.msra.mxu0 %v2940_v53 }
  0x88   : > { %2945 = vmatprep.subr.bf16.mxu0 %v2944_v62  ;;  %2962 = vmatpush3.bf16.msra.mxu1 %v2940_v53 }
  0x89   : > { %1633 = vmatmul.mubr.f32.gmra.mrb[46].mxu0 %v3653_v63  ;;  %2955 = vmatprep.subr.bf16.mxu1 %v2944_v62 }
  0x8a   : > { %1778 = vmatmul.mubr.f32.gmra.mrb[46].mxu1 %v3841_v51  ;;  %1637 = vmatprep.mubr.f32.mxu0 %v3881_v26 }
  0x8b   : > { %1782 = vmatprep.mubr.f32.mxu1 %v3804_v37  ;;  %2947 = vmatpush3.bf16.msra.mxu0 %v2944_v62 }
  0x8c   : > { %2963 = vmatpush3.bf16.msra.mxu1 %v2944_v62 }
  0x8d   : > { %1638 = vmatmul.mubr.f32.gmra.mrb[48].mxu0 %v3685_v18 }
  0x8e   : > { %2353 = vmatmul.mubr.msk.f32.gmra.mrb[48].mxu1 %vm2964_vm2, %v3870_v20  ;;  %2337 = vmatprep.mubr.msk.f32.mxu0 %vm2965_vm5, %v3918_v61 }
  0x8f   : > { %1787 = vmatprep.mubr.f32.mxu1 %v3825_v45 }
  0x91   : > { %1643 = vmatmul.mubr.f32.gmra.mrb[50].mxu0 %v3750_v59 }
  0x92   : > { %1788 = vmatmul.mubr.f32.gmra.mrb[50].mxu1 %v3891_v31  ;;  %1647 = vmatprep.mubr.f32.mxu0 %v3954_v36 }
  0x93   : > { %1792 = vmatprep.mubr.f32.mxu1 %v3858_v5 }
  0x95   : > { %1648 = vmatmul.mubr.f32.gmra.mrb[52].mxu0 %v3804_v37 }
  0x96   : > { %2355 = vmatmul.mubr.msk.f32.gmra.mrb[52].mxu1 %vm2964_vm2, %v3940_v8  ;;  %2339 = vmatprep.mubr.msk.f32.mxu0 %vm2965_vm5, %v3968_v24 }
  0x97   : > { %1797 = vmatprep.mubr.f32.mxu1 %v3899_v42 }
  0x99   : > { %1653 = vmatmul.mubr.f32.gmra.mrb[54].mxu0 %v3825_v45 }
  0x9a   : > { %1798 = vmatmul.mubr.f32.gmra.mrb[54].mxu1 %v3958_v30  ;;  %1657 = vmatprep.mubr.f32.mxu0 %v3983_v29 }
  0x9b   : > { %1802 = vmatprep.mubr.f32.mxu1 %v3943_v46 }
  0x9d   : > { %1658 = vmatmul.mubr.f32.gmra.mrb[56].mxu0 %v3858_v5 }
  0x9e   : > { %2357 = vmatmul.mubr.msk.f32.gmra.mrb[56].mxu1 %vm2964_vm2, %v3972_v38  ;;  %2341 = vmatprep.mubr.msk.f32.mxu0 %vm2965_vm5, %v3998_v2 }
  0x9f   : > { %1807 = vmatprep.mubr.f32.mxu1 %v3864_v16 }
  0xa1   : > { %1663 = vmatmul.mubr.f32.gmra.mrb[58].mxu0 %v3899_v42 }
  0xa2   : > { %1808 = vmatmul.mubr.f32.gmra.mrb[58].mxu1 %v3987_v56  ;;  %1667 = vmatprep.mubr.f32.mxu0 %v866_v11 }
  0xa3   : > { %2359 = vmatprep.mubr.msk.f32.mxu1 %vm2358_vm7, %v560_v25 }
  0xa5   : > { %1668 = vmatmul.mubr.f32.gmra.mrb[60].mxu0 %v3943_v46 }
  0xa6   : > { %2361 = vmatmul.mubr.msk.f32.gmra.mrb[60].mxu1 %vm2964_vm2, %v3921_v0  ;;  %2343 = vmatprep.mubr.msk.f32.mxu0 %vm2965_vm5, %v3926_v1 }
  0xa7   : > { %2363 = vmatprep.mubr.msk.f32.mxu1 %vm2358_vm7, %v561_v6 }
  0xa9   : > { %1673 = vmatmul.mubr.f32.gmra.mrb[62].mxu0 %v3864_v16 }
  0xaa   : > { %1818 = vmatmul.mubr.f32.gmra.mrb[62].mxu1 %v3931_v4  ;;  %2764 = vmatprep.mubr.f32.mxu0 %v3632_v52 }
  0xab   : > { %2776 = vmatprep.mubr.f32.mxu1 %v3954_v36 }
  0xad   : > { %2765 = vmatmul.mubr.msk.f32.vlgmr.msra.gmra.mrb[64].mxu0 %vm2965_vm5, %v3678_v15 }
  0xae   : > { %2777 = vmatmul.mubr.msk.f32.vlgmr.msra.gmra.mrb[64].mxu1 %vm2965_vm5, %v3968_v24  ;;  %2767 = vmatprep.mubr.f32.mxu0 %v3715_v41 }
  0xaf   : > { %2779 = vmatprep.mubr.f32.mxu1 %v3983_v29 }
  0xb1   : > { %2768 = vmatmul.mubr.msk.f32.gmra.mrb[66].mxu0 %vm2965_vm5, %v3794_v22 }
  0xb2   : > { %2780 = vmatmul.mubr.msk.f32.gmra.mrb[66].mxu1 %vm2965_vm5, %v3998_v2  ;;  %2770 = vmatprep.mubr.f32.mxu0 %v3833_v40 }
  0xb3   : > { %2782 = vmatprep.mubr.f32.mxu1 %v866_v11 }
  0xb5   : > { %2771 = vmatmul.mubr.msk.f32.gmra.mrb[68].mxu0 %vm2965_vm5, %v3855_v50 }
  0xb6   : > { %2783 = vmatmul.mubr.msk.f32.gmra.mrb[68].mxu1 %vm2965_vm5, %v3926_v1  ;;  %2773 = vmatprep.mubr.f32.mxu0 %v3881_v26 }
  0xb7   : > { %2785 = vmatprep.mubr.f32.mxu1 %v3934_v7 }
  0xb9   : > { %2774 = vmatmul.mubr.msk.f32.gmra.mrb[70].mxu0 %vm2965_vm5, %v3918_v61 }
  0xba   : > { %2786 = vmatmul.mubr.msk.f32.gmra.mrb[70].mxu1 %vm2965_vm5, %v3937_v49 }
 0x100   : > { %v2412_v13 = vpop.f32.mrb[0].mxu0 }
 0x101   : > { %v2492_v39 = vpop.f32.mrb[0].mxu1  ;;  %v2413_v52 = vpop.f32.mrb[1].mxu0 }
 0x102   : > { %v2414_v63 = vadd.f32 %v2413_v52, %v2412_v13  ;;  %v2493_v15 = vpop.f32.mrb[1].mxu1 }
 0x103   : > { %v2494_v18 = vadd.f32 %v2493_v15, %v2492_v39 }
 0x104   : > { %v2415_v41 = vpop.f32.mrb[2].mxu0 }
 0x105   : > { %v4183_v58 = vadd.f32 %v2494_v18, %v2414_v63  ;;  %v2495_v59 = vpop.f32.mrb[2].mxu1  ;;  %v2416_v22 = vpop.f32.mrb[3].mxu0 }
 0x106   : > { %v2417_v19 = vadd.f32 %v2416_v22, %v2415_v41  ;;  %v2496_v37 = vpop.f32.mrb[3].mxu1 }
 0x107   : > { %v2497_v45 = vadd.f32 %v2496_v37, %v2495_v59 }
 0x108   : > { %v2418_v40 = vpop.f32.mrb[4].mxu0 }
 0x109   : > { %v4185_v51 = vadd.f32 %v2497_v45, %v2417_v19  ;;  %v2498_v50 = vpop.f32.mrb[4].mxu1  ;;  %v2419_v32 = vpop.f32.mrb[5].mxu0 }
 0x10a   : > { %v2420_v5 = vadd.f32 %v2419_v32, %v2418_v40  ;;  %v2499_v16 = vpop.f32.mrb[5].mxu1 }
 0x10b   : > { %v2500_v17 = vadd.f32 %v2499_v16, %v2498_v50 }
 0x10c   : > { %v2421_v20 = vpop.f32.mrb[6].mxu0 }
 0x10d   : > { %v4187_v21 = vadd.f32 %v2500_v17, %v2420_v5  ;;  %v2501_v23 = vpop.f32.mrb[6].mxu1  ;;  %v2422_v26 = vpop.f32.mrb[7].mxu0 }
 0x10e   : > { %v2423_v25 = vadd.f32 %v2422_v26, %v2421_v20  ;;  %v2502_v31 = vpop.f32.mrb[7].mxu1 }
 0x10f   : > { %v2503_v6 = vadd.f32 %v2502_v31, %v2501_v23 }
 0x110   : > { %v2424_v42 = vpop.f32.mrb[8].mxu0 }
 0x111   : > { %v4189_v48 = vadd.f32 %v2503_v6, %v2423_v25  ;;  %v2504_v61 = vpop.f32.mrb[8].mxu1  ;;  %v2425_v0 = vpop.f32.mrb[9].mxu0 }
 0x112   : > { %v2426_v1 = vadd.f32 %v2425_v0, %v2424_v42  ;;  %v2505_v4 = vpop.f32.mrb[9].mxu1 }
 0x113   : > { %v2506_v7 = vadd.f32 %v2505_v4, %v2504_v61 }
 0x114   : > { %v2427_v49 = vpop.f32.mrb[10].mxu0 }
 0x115   : > { %v4191_v8 = vadd.f32 %v2506_v7, %v2426_v1  ;;  %v2507_v46 = vpop.f32.mrb[10].mxu1  ;;  %v2428_v36 = vpop.f32.mrb[11].mxu0 }
 0x116   : > { %v2429_v30 = vadd.f32 %v2428_v36, %v2427_v49  ;;  %v2508_v24 = vpop.f32.mrb[11].mxu1 }
 0x117   : > { %v2509_v38 = vadd.f32 %v2508_v24, %v2507_v46 }
 0x118   : > { %v2430_v29 = vpop.f32.mrb[12].mxu0 }
 0x119   : > { %v4193_v27 = vadd.f32 %v2509_v38, %v2429_v30  ;;  %v2510_v56 = vpop.f32.mrb[12].mxu1  ;;  %v2431_v2 = vpop.f32.mrb[13].mxu0 }
 0x11a   : > { %v2432_v54 = vadd.f32 %v2431_v2, %v2430_v29  ;;  %v2511_v55 = vpop.f32.mrb[13].mxu1 }
 0x11b   : > { %v2512_v60 = vadd.f32 %v2511_v55, %v2510_v56 }
 0x11c   : > { %v2433_v3 = vpop.f32.mrb[14].mxu0 }
 0x11d   : > { %v4195_v57 = vadd.f32 %v2512_v60, %v2432_v54  ;;  %v2513_v33 = vpop.f32.mrb[14].mxu1  ;;  %v2434_v12 = vpop.f32.mrb[15].mxu0 }
 0x11e   : > { %v2435_v43 = vadd.f32 %v2434_v12, %v2433_v3  ;;  %v2514_v14 = vpop.f32.mrb[15].mxu1 }
 0x11f   : > { %v2515_v9 = vadd.f32 %v2514_v14, %v2513_v33 }
 0x120   : > { %v2436_v34 = vpop.f32.mrb[16].mxu0 }
 0x121   : > { %v4197_v44 = vadd.f32 %v2515_v9, %v2435_v43  ;;  %v2516_v35 = vpop.f32.mrb[16].mxu1  ;;  %v2437_v10 = vpop.f32.mrb[17].mxu0 }
 0x122   : > { %v2438_v53 = vadd.f32 %v2437_v10, %v2436_v34  ;;  %v2517_v47 = vpop.f32.mrb[17].mxu1 }
 0x123   : > { %v2518_v28 = vadd.f32 %v2517_v47, %v2516_v35 }
 0x124   : > { %v2439_v62 = vpop.f32.mrb[18].mxu0 }
 0x125   : > { %v4199_v11 = vadd.f32 %v2518_v28, %v2438_v53  ;;  %v2519_v13 = vpop.f32.mrb[18].mxu1  ;;  %v2440_v39 = vpop.f32.mrb[19].mxu0 }
 0x126   : > { %v2441_v52 = vadd.f32 %v2440_v39, %v2439_v62  ;;  %v2520_v63 = vpop.f32.mrb[19].mxu1 }
 0x127   : > { %v2521_v15 = vadd.f32 %v2520_v63, %v2519_v13 }
 0x128   : > { %v2442_v18 = vpop.f32.mrb[20].mxu0 }
 0x129   : > { %v4201_v41 = vadd.f32 %v2521_v15, %v2441_v52  ;;  %v2522_v59 = vpop.f32.mrb[20].mxu1  ;;  %v2443_v22 = vpop.f32.mrb[21].mxu0 }
 0x12a   : > { %v2444_v19 = vadd.f32 %v2443_v22, %v2442_v18  ;;  %v2523_v37 = vpop.f32.mrb[21].mxu1 }
 0x12b   : > { %v2524_v45 = vadd.f32 %v2523_v37, %v2522_v59 }
 0x12c   : > { %v2445_v40 = vpop.f32.mrb[22].mxu0 }
 0x12d   : > { %v4203_v50 = vadd.f32 %v2524_v45, %v2444_v19  ;;  %v2525_v32 = vpop.f32.mrb[22].mxu1  ;;  %v2446_v5 = vpop.f32.mrb[23].mxu0 }
 0x12e   : > { %v2447_v16 = vadd.f32 %v2446_v5, %v2445_v40  ;;  %v2526_v17 = vpop.f32.mrb[23].mxu1 }
 0x12f   : > { %v2527_v20 = vadd.f32 %v2526_v17, %v2525_v32 }
 0x130   : > { %v2448_v23 = vpop.f32.mrb[24].mxu0 }
 0x131   : > { %v4205_v26 = vadd.f32 %v2527_v20, %v2447_v16  ;;  %v2528_v25 = vpop.f32.mrb[24].mxu1  ;;  %v2449_v31 = vpop.f32.mrb[25].mxu0 }
 0x132   : > { %v2450_v6 = vadd.f32 %v2449_v31, %v2448_v23  ;;  %v2529_v42 = vpop.f32.mrb[25].mxu1 }
 0x133   : > { %v2530_v61 = vadd.f32 %v2529_v42, %v2528_v25 }
 0x134   : > { %v2451_v0 = vpop.f32.mrb[26].mxu0 }
 0x135   : > { %v4207_v1 = vadd.f32 %v2530_v61, %v2450_v6  ;;  %v2531_v4 = vpop.f32.mrb[26].mxu1  ;;  %v2452_v7 = vpop.f32.mrb[27].mxu0 }
 0x136   : > { %v2453_v49 = vadd.f32 %v2452_v7, %v2451_v0  ;;  %v2532_v46 = vpop.f32.mrb[27].mxu1 }
 0x137   : > { %v2533_v36 = vadd.f32 %v2532_v46, %v2531_v4 }
 0x138   : > { %v2454_v30 = vpop.f32.mrb[28].mxu0 }
 0x139   : > { %v4209_v24 = vadd.f32 %v2533_v36, %v2453_v49  ;;  %v2534_v38 = vpop.f32.mrb[28].mxu1  ;;  %v2455_v29 = vpop.f32.mrb[29].mxu0 }
 0x13a   : > { %v2456_v56 = vadd.f32 %v2455_v29, %v2454_v30  ;;  %v2535_v2 = vpop.f32.mrb[29].mxu1 }
 0x13b   : > { %v2536_v54 = vadd.f32 %v2535_v2, %v2534_v38 }
 0x13c   : > { %v2457_v55 = vpop.f32.mrb[30].mxu0 }
 0x13d   : > { %v4211_v60 = vadd.f32 %v2536_v54, %v2456_v56  ;;  %v2537_v3 = vpop.f32.mrb[30].mxu1  ;;  %v2458_v33 = vpop.f32.mrb[31].mxu0 }
 0x13e   : > { %v2459_v12 = vadd.f32 %v2458_v33, %v2457_v55  ;;  %v2538_v43 = vpop.f32.mrb[31].mxu1 }
 0x13f   : > { %v2539_v14 = vadd.f32 %v2538_v43, %v2537_v3 }
 0x140   : > { %v2572_v9 = vpop.f32.mrb[32].mxu0 }
 0x141   : > { %v4213_v34 = vadd.f32 %v2539_v14, %v2459_v12  ;;  %v2573_v35 = vpop.f32.mrb[33].mxu0  ;;  %v2652_v10 = vpop.f32.mrb[32].mxu1 }
 0x142   : > { %v2574_v53 = vadd.f32 %v2573_v35, %v2572_v9  ;;  %v2653_v47 = vpop.f32.mrb[33].mxu1 }
 0x143   : > { %v2654_v28 = vadd.f32 %v2653_v47, %v2652_v10 }
 0x144   : > { %v1600_v62 = vadd.f32 %v2574_v53, %v4183_v58  ;;  %v2575_v13 = vpop.f32.mrb[34].mxu0 }
 0x145   : > { %v2576_v39 = vpop.f32.mrb[35].mxu0  ;;  %v2655_v52 = vpop.f32.mrb[34].mxu1 }
 0x146   : > { %v2577_v63 = vadd.f32 %v2576_v39, %v2575_v13  ;;  %v2656_v15 = vpop.f32.mrb[35].mxu1  ;;  %v4216_v18 = vadd.f32 %v2654_v28, %v1600_v62 }
 0x147   : > { %v2657_v59 = vadd.f32 %v2656_v15, %v2655_v52 }
 0x148   : > { %v1605_v22 = vadd.f32 %v2577_v63, %v4185_v51  ;;  %v2578_v19 = vpop.f32.mrb[36].mxu0 }
 0x149   : > { %v2579_v37 = vpop.f32.mrb[37].mxu0  ;;  %v2658_v45 = vpop.f32.mrb[36].mxu1 }
 0x14a   : > { %v2580_v40 = vadd.f32 %v2579_v37, %v2578_v19  ;;  %v2659_v32 = vpop.f32.mrb[37].mxu1  ;;  %v4219_v5 = vadd.f32 %v2657_v59, %v1605_v22 }
 0x14b   : > { %v2660_v16 = vadd.f32 %v2659_v32, %v2658_v45 }
 0x14c   : > { %v1610_v58 = vadd.f32 %v2580_v40, %v4187_v21  ;;  %v2581_v17 = vpop.f32.mrb[38].mxu0 }
 0x14d   : > { %v2582_v20 = vpop.f32.mrb[39].mxu0  ;;  %v2661_v23 = vpop.f32.mrb[38].mxu1 }
 0x14e   : > { %v2583_v25 = vadd.f32 %v2582_v20, %v2581_v17  ;;  %v2662_v31 = vpop.f32.mrb[39].mxu1  ;;  %v4222_v6 = vadd.f32 %v2660_v16, %v1610_v58 }
 0x14f   : > { %v2663_v42 = vadd.f32 %v2662_v31, %v2661_v23 }
 0x150   : > { %v1615_v51 = vadd.f32 %v2583_v25, %v4189_v48  ;;  %v2584_v61 = vpop.f32.mrb[40].mxu0 }
 0x151   : > { %v2585_v0 = vpop.f32.mrb[41].mxu0  ;;  %v2664_v4 = vpop.f32.mrb[40].mxu1 }
 0x152   : > { %v2586_v7 = vadd.f32 %v2585_v0, %v2584_v61  ;;  %v2665_v49 = vpop.f32.mrb[41].mxu1  ;;  %v4225_v46 = vadd.f32 %v2663_v42, %v1615_v51 }
 0x153   : > { %v2666_v36 = vadd.f32 %v2665_v49, %v2664_v4 }
 0x154   : > { %v1620_v21 = vadd.f32 %v2586_v7, %v4191_v8  ;;  %v2587_v30 = vpop.f32.mrb[42].mxu0 }
 0x155   : > { %v2588_v38 = vpop.f32.mrb[43].mxu0  ;;  %v2667_v29 = vpop.f32.mrb[42].mxu1 }
 0x156   : > { %v2589_v56 = vadd.f32 %v2588_v38, %v2587_v30  ;;  %v2668_v2 = vpop.f32.mrb[43].mxu1  ;;  %v4228_v54 = vadd.f32 %v2666_v36, %v1620_v21 }
 0x157   : > { %v2669_v55 = vadd.f32 %v2668_v2, %v2667_v29 }
 0x158   : > { %v1625_v48 = vadd.f32 %v2589_v56, %v4193_v27  ;;  %v2590_v3 = vpop.f32.mrb[44].mxu0 }
 0x159   : > { %v2591_v33 = vpop.f32.mrb[45].mxu0  ;;  %v2670_v12 = vpop.f32.mrb[44].mxu1 }
 0x15a   : > { %v2592_v43 = vadd.f32 %v2591_v33, %v2590_v3  ;;  %v2671_v14 = vpop.f32.mrb[45].mxu1  ;;  %v4231_v9 = vadd.f32 %v2669_v55, %v1625_v48 }
 0x15b   : > { %v2672_v35 = vadd.f32 %v2671_v14, %v2670_v12 }
 0x15c   : > { %v1630_v8 = vadd.f32 %v2592_v43, %v4195_v57  ;;  %v2593_v10 = vpop.f32.mrb[46].mxu0 }
 0x15d   : > { %v2594_v53 = vpop.f32.mrb[47].mxu0  ;;  %v2673_v47 = vpop.f32.mrb[46].mxu1 }
 0x15e   : > { %v2595_v28 = vadd.f32 %v2594_v53, %v2593_v10  ;;  %v2674_v62 = vpop.f32.mrb[47].mxu1  ;;  %v4234_v13 = vadd.f32 %v2672_v35, %v1630_v8 }
 0x15f   : > { %v2675_v39 = vadd.f32 %v2674_v62, %v2673_v47 }
 0x160   : > { %v1635_v27 = vadd.f32 %v2595_v28, %v4197_v44  ;;  %v2596_v52 = vpop.f32.mrb[48].mxu0 }
 0x161   : > { %v2597_v63 = vpop.f32.mrb[49].mxu0  ;;  %v2676_v15 = vpop.f32.mrb[48].mxu1 }
 0x162   : > { %v2598_v59 = vadd.f32 %v2597_v63, %v2596_v52  ;;  %v2677_v22 = vpop.f32.mrb[49].mxu1  ;;  %v4237_v19 = vadd.f32 %v2675_v39, %v1635_v27 }
 0x163   : > { %v2678_v37 = vadd.f32 %v2677_v22, %v2676_v15 }
 0x164   : > { %v1640_v57 = vadd.f32 %v2598_v59, %v4199_v11  ;;  %v2599_v45 = vpop.f32.mrb[50].mxu0 }
 0x165   : > { %v2600_v40 = vpop.f32.mrb[51].mxu0  ;;  %v2679_v32 = vpop.f32.mrb[50].mxu1 }
 0x166   : > { %v2601_v16 = vadd.f32 %v2600_v40, %v2599_v45  ;;  %v2680_v58 = vpop.f32.mrb[51].mxu1  ;;  %v1785_v17 = vadd.f32 %v2678_v37, %v1640_v57 }
 0x167   : > { %v2681_v20 = vadd.f32 %v2680_v58, %v2679_v32 }
 0x168   : > { %v1645_v23 = vadd.f32 %v2601_v16, %v4201_v41  ;;  %v2602_v44 = vpop.f32.mrb[52].mxu0 }
 0x169   : > { %v2603_v25 = vpop.f32.mrb[53].mxu0  ;;  %v2682_v31 = vpop.f32.mrb[52].mxu1 }
 0x16a   : > { %v2604_v42 = vadd.f32 %v2603_v25, %v2602_v44  ;;  %v2683_v51 = vpop.f32.mrb[53].mxu1  ;;  %v1790_v61 = vadd.f32 %v2681_v20, %v1645_v23 }
 0x16b   : > { %v2684_v0 = vadd.f32 %v2683_v51, %v2682_v31 }
 0x16c   : > { %v1650_v4 = vadd.f32 %v2604_v42, %v4203_v50  ;;  %v2605_v7 = vpop.f32.mrb[54].mxu0 }
 0x16d   : > { %v2606_v11 = vpop.f32.mrb[55].mxu0  ;;  %v2685_v49 = vpop.f32.mrb[54].mxu1 }
 0x16e   : > { %v2607_v36 = vadd.f32 %v2606_v11, %v2605_v7  ;;  %v2686_v21 = vpop.f32.mrb[55].mxu1  ;;  %v1795_v30 = vadd.f32 %v2684_v0, %v1650_v4 }
 0x16f   : > { %v2687_v38 = vadd.f32 %v2686_v21, %v2685_v49 }
 0x170   : > { %v1655_v29 = vadd.f32 %v2607_v36, %v4205_v26  ;;  %v2608_v56 = vpop.f32.mrb[56].mxu0 }
 0x171   : > { %v2609_v41 = vpop.f32.mrb[57].mxu0  ;;  %v2688_v2 = vpop.f32.mrb[56].mxu1 }
 0x172   : > { %v2610_v55 = vadd.f32 %v2609_v41, %v2608_v56  ;;  %v2689_v48 = vpop.f32.mrb[57].mxu1  ;;  %v1800_v3 = vadd.f32 %v2687_v38, %v1655_v29 }
 0x173   : > { %v2690_v33 = vadd.f32 %v2689_v48, %v2688_v2 }
 0x174   : > { %v1660_v12 = vadd.f32 %v2610_v55, %v4207_v1  ;;  %v2611_v43 = vpop.f32.mrb[58].mxu0 }
 0x175   : > { %v2612_v50 = vpop.f32.mrb[59].mxu0  ;;  %v2691_v14 = vpop.f32.mrb[58].mxu1 }
 0x176   : > { %v2613_v35 = vadd.f32 %v2612_v50, %v2611_v43  ;;  %v2692_v8 = vpop.f32.mrb[59].mxu1  ;;  %v1805_v10 = vadd.f32 %v2690_v33, %v1660_v12 }
 0x177   : > { %v2693_v53 = vadd.f32 %v2692_v8, %v2691_v14 }
 0x178   : > { %v1665_v47 = vadd.f32 %v2613_v35, %v4209_v24  ;;  %v2614_v26 = vpop.f32.mrb[60].mxu0 }
 0x179   : > { %v2615_v28 = vpop.f32.mrb[61].mxu0  ;;  %v2694_v62 = vpop.f32.mrb[60].mxu1 }
 0x17a   : > { %v2616_v39 = vadd.f32 %v2615_v28, %v2614_v26  ;;  %v2695_v27 = vpop.f32.mrb[61].mxu1  ;;  %v1810_v52 = vadd.f32 %v2693_v53, %v1665_v47 }
 0x17b   : > { %v2696_v63 = vadd.f32 %v2695_v27, %v2694_v62 }
 0x17c   : > { %v1670_v15 = vadd.f32 %v2616_v39, %v4211_v60  ;;  %v2617_v1 = vpop.f32.mrb[62].mxu0 }
 0x17d   : > { %v2618_v59 = vpop.f32.mrb[63].mxu0  ;;  %v2697_v22 = vpop.f32.mrb[62].mxu1 }
 0x17e   : > { %v2619_v37 = vadd.f32 %v2618_v59, %v2617_v1  ;;  %v2698_v57 = vpop.f32.mrb[63].mxu1  ;;  %v4246_v45 = vadd.f32 %v2696_v63, %v1670_v15 }
 0x17f   : > { %v2699_v40 = vadd.f32 %v2698_v57, %v2697_v22 }
 0x180   : > { %v1675_v24 = vadd.f32 %v2619_v37, %v4213_v34  ;;  %v2766_v60 = vpop.f32.mrb[64].mxu0 }
 0x181   : > { %v1895_v32 = vadd.f32 %v2766_v60, %v4219_v5  ;;  %v2778_v16 = vpop.f32.mrb[64].mxu1  ;;  %v1889_v58 = vpop.f32.mrb[65].mxu0 }
 0x182   : > { %v4257_v20 = vadd.f32 %v2778_v16, %v1790_v61  ;;  %v1890_v23 = vadd.f32 %v1889_v58, %v4216_v18  ;;  %v1929_v44 = vpop.f32.mrb[65].mxu1  ;;  %v1820_v25 = vadd.f32 %v2699_v40, %v1675_v24 }
 0x183   : > { %1969 = vst [vmem:[%s4253_s30 + $0x8] sm:$0xff] %v1895_v32  ;;  %v2007_v31 = vmul.f32 %v1895_v32, %v1895_v32  ;;  %v1930_v42 = vadd.f32 %v1929_v44, %v1785_v17 }
 0x184   : > { %1977 = vst [vmem:[%s4253_s30 + $0x48] sm:$0xff] %v4257_v20  ;;  %1968 = vst [vmem:[%s4253_s30] sm:$0xff] %v1890_v23  ;;  %v1984_v34 = vadd.f32 %v1895_v32, %v1890_v23  ;;  %v2006_v51 = vmul.f32 %v1890_v23, %v1890_v23  ;;  %v2769_v5 = vpop.f32.mrb[66].mxu0 }
 0x185   : > { %1976 = vst [vmem:[%s4253_s30 + $0x40] sm:$0xff] %v1930_v42  ;;  %v1905_v61 = vadd.f32 %v2769_v5, %v4225_v46  ;;  %v2781_v0 = vpop.f32.mrb[66].mxu1  ;;  %v1899_v18 = vpop.f32.mrb[67].mxu0  ;;  %v2014_v15 = vmul.f32 %v1930_v42, %v1930_v42 }
 0x186   : > { %v2022_v4 = vadd.f32 %v2007_v31, %v2006_v51  ;;  %v1945_v7 = vadd.f32 %v2781_v0, %v1800_v3  ;;  %v1900_v11 = vadd.f32 %v1899_v18, %v4222_v6  ;;  %v1939_v49 = vpop.f32.mrb[67].mxu1 }
 0x187   : > { %1971 = vst [vmem:[%s4253_s30 + $0x18] sm:$0xff] %v1905_v61  ;;  %v1940_v17 = vadd.f32 %v1939_v49, %v1795_v30  ;;  %v2009_v29 = vmul.f32 %v1905_v61, %v1905_v61 }
 0x188   : > { %1979 = vst [vmem:[%s4253_s30 + $0x58] sm:$0xff] %v1945_v7  ;;  %1970 = vst [vmem:[%s4253_s30 + $0x10] sm:$0xff] %v1900_v11  ;;  %v1985_v36 = vadd.f32 %v1984_v34, %v1900_v11  ;;  %v2008_v21 = vmul.f32 %v1900_v11, %v1900_v11  ;;  %v2772_v38 = vpop.f32.mrb[68].mxu0  ;;  %v2017_v24 = vmul.f32 %v1945_v7, %v1945_v7 }
 0x189   : > { %1978 = vst [vmem:[%s4253_s30 + $0x50] sm:$0xff] %v1940_v17  ;;  %v1915_v46 = vadd.f32 %v2772_v38, %v4231_v9  ;;  %v2784_v56 = vpop.f32.mrb[68].mxu1  ;;  %v1909_v41 = vpop.f32.mrb[69].mxu0  ;;  %v2016_v57 = vmul.f32 %v1940_v17, %v1940_v17 }
 0x18a   : > { %v2023_v2 = vadd.f32 %v2022_v4, %v2008_v21  ;;  %v1955_v6 = vadd.f32 %v2784_v56, %v1810_v52  ;;  %v1910_v55 = vadd.f32 %v1909_v41, %v4228_v54  ;;  %v1986_v30 = vadd.f32 %v1985_v36, %v1905_v61  ;;  %v1949_v48 = vpop.f32.mrb[69].mxu1 }
 0x18b   : > { %1973 = vst [vmem:[%s4253_s30 + $0x28] sm:$0xff] %v1915_v46  ;;  %v1950_v3 = vadd.f32 %v1949_v48, %v1805_v10  ;;  %v2011_v50 = vmul.f32 %v1915_v46, %v1915_v46 }
 0x18c   : > { %1981 = vst [vmem:[%s4253_s30 + $0x68] sm:$0xff] %v1955_v6  ;;  %1972 = vst [vmem:[%s4253_s30 + $0x20] sm:$0xff] %v1910_v55  ;;  %v1987_v33 = vadd.f32 %v1986_v30, %v1910_v55  ;;  %v2010_v12 = vmul.f32 %v1910_v55, %v1910_v55  ;;  %v2024_v43 = vadd.f32 %v2023_v2, %v2009_v29  ;;  %v2775_v9 = vpop.f32.mrb[70].mxu0 }
 0x18d   : > { %1980 = vst [vmem:[%s4253_s30 + $0x60] sm:$0xff] %v1950_v3  ;;  %v1925_v14 = vadd.f32 %v2775_v9, %v4237_v19  ;;  %v2787_v35 = vpop.f32.mrb[70].mxu1  ;;  %v1919_v54 = vpop.f32.mrb[71].mxu0  ;;  %v2018_v16 = vmul.f32 %v1950_v3, %v1950_v3  ;;  %v2019_v44 = vmul.f32 %v1955_v6, %v1955_v6 }
 0x18e   : > { %v2025_v8 = vadd.f32 %v2024_v43, %v2010_v12  ;;  %v1965_v53 = vadd.f32 %v2787_v35, %v1820_v25  ;;  %v1920_v10 = vadd.f32 %v1919_v54, %v4234_v13  ;;  %v1988_v47 = vadd.f32 %v1987_v33, %v1915_v46  ;;  %v1959_v26 = vpop.f32.mrb[71].mxu1 }
 0x18f   : > { %1975 = vst [vmem:[%s4253_s30 + $0x38] sm:$0xff] %v1925_v14  ;;  %v1960_v28 = vadd.f32 %v1959_v26, %v4246_v45  ;;  %v2013_v52 = vmul.f32 %v1925_v14, %v1925_v14  ;;  %v2015_v13 = vmul.f32 %v4257_v20, %v4257_v20 }
 0x190   : > { %1983 = vst [vmem:[%s4253_s30 + $0x78] sm:$0xff] %v1965_v53  ;;  %1974 = vst [vmem:[%s4253_s30 + $0x30] sm:$0xff] %v1920_v10  ;;  %v1989_v62 = vadd.f32 %v1988_v47, %v1920_v10  ;;  %v2012_v39 = vmul.f32 %v1920_v10, %v1920_v10  ;;  %v2026_v27 = vadd.f32 %v2025_v8, %v2011_v50 }
 0x191   : > { %1982 = vst [vmem:[%s4253_s30 + $0x70] sm:$0xff] %v1960_v28  ;;  %v2020_v34 = vmul.f32 %v1960_v28, %v1960_v28 }
 0x192   : > { %v1990_v63 = vadd.f32 %v1989_v62, %v1925_v14  ;;  %v2027_v19 = vadd.f32 %v2026_v27, %v2012_v39 }
 0x194   : > { %v1991_v1 = vadd.f32 %v1990_v63, %v1930_v42  ;;  %v2028_v59 = vadd.f32 %v2027_v19, %v2013_v52 }
 0x196   : > { %v1992_v22 = vadd.f32 %v1991_v1, %v4257_v20  ;;  %v2029_v37 = vadd.f32 %v2028_v59, %v2014_v15  ;;  %v2021_v20 = vmul.f32 %v1965_v53, %v1965_v53 }
 0x198   : > { %v2030_v45 = vadd.f32 %v2029_v37, %v2015_v13  ;;  %v1993_v40 = vadd.f32 %v1992_v22, %v1940_v17 }
 0x19a   : > { %v1994_v60 = vadd.f32 %v1993_v40, %v1945_v7  ;;  %v2031_v32 = vadd.f32 %v2030_v45, %v2016_v57 }
 0x19c   : > { %v1995_v58 = vadd.f32 %v1994_v60, %v1950_v3  ;;  %v2032_v23 = vadd.f32 %v2031_v32, %v2017_v24 }
 0x19e   : > { %v1996_v25 = vadd.f32 %v1995_v58, %v1955_v6  ;;  %v2033_v31 = vadd.f32 %v2032_v23, %v2018_v16 }
 0x1a0   : > { %v1997_v42 = vadd.f32 %v1996_v25, %v1960_v28  ;;  %v2034_v51 = vadd.f32 %v2033_v31, %v2019_v44 }
 0x1a2   : > { %v1998_v5 = vadd.f32 %v1997_v42, %v1965_v53  ;;  %v2035_v61 = vadd.f32 %v2034_v51, %v2020_v34 }
 0x1a4   : > { %v1999_v0 = vrot.slane %v1998_v5, 4  ;;  %v2036_v18 = vadd.f32 %v2035_v61, %v2021_v20 }
 0x1a6   : > { %v2000_v4 = vadd.f32 %v1999_v0, %v1998_v5  ;;  %v2037_v7 = vrot.slane %v2036_v18, 4 }
 0x1a8   : > { %v2001_v11 = vrot.slane %v2000_v4, 2  ;;  %v2038_v49 = vadd.f32 %v2037_v7, %v2036_v18 }
 0x1aa   : > { %v2002_v17 = vadd.f32 %v2001_v11, %v2000_v4  ;;  %v2039_v36 = vrot.slane %v2038_v49, 2 }
 0x1ac   : > { %v2003_v21 = vrot.slane %v2002_v17, 1  ;;  %v2040_v38 = vadd.f32 %v2039_v36, %v2038_v49 }
 0x1ae   : > { %v2004_v29 = vadd.f32 %v2003_v21, %v2002_v17  ;;  %v2041_v46 = vrot.slane %v2040_v38, 1 }
 0x1b0   : > { %2005 = vst [vmem:[%s467_s16] sm:$0x1] %v2004_v29  ;;  %v2042_v56 = vadd.f32 %v2041_v46, %v2040_v38 }
 0x1b2   : > { %2043 = vst [vmem:[%s467_s16 + $0x1] sm:$0x1] %v2042_v56 }
 0x1b3 PF: > { %s18_s28 = sadd.s32 1, %s3045_s28   ;;  %s4326_s20 = sld [smem:[#allocation4_spill]] }
 0x1b4   : > { %p15_p13 = scmp.ge.s32.totalorder %s18_s28, 6   ;;  %s4327_s24 = smov %s3037_s26 }
 0x1b5   : > { %s4328_s25 = smov %s3041_s27  ;;  %s4329_s26 = smov %s4332_s29 }
 0x1b6   :  { %17 = sbr.rel (!%p15_p13) target bundleno = 3 (0x3), region = 92 }
 0x1b9   : > { %s4330_s27 = smov %s4326_s20 }

</bundles_post_ra>
